<compile_context>
chip_gen: v7x
topology: tpu7x:2x2x1
jax: 0.10.0
libtpu: 0.0.40
codegen_flags: <defaults>
</compile_context>

<pallas_src>
import functools
import math

import jax
import jax.numpy as jnp
from jax.experimental import pallas as pl
from jax.experimental.pallas import tpu as pltpu

LANE = 128


def _round_up(x, m):
    return (x + m - 1) // m * m


def _vmem_budget_bytes():
    """Per-generation scoped-VMEM budget.

    v5e/v6e (128 MiB physical) -> ~96 MiB; v7x (64 MiB physical) -> 48 MiB.
    Falls back to the most conservative (v7x) figure if the query fails.
    """
    try:
        cap = int(pltpu.get_tpu_info().vmem_capacity_bytes)
    except Exception:
        cap = 64 << 20
    return min((cap * 3) // 4, 100 << 20)


def _pick_tiles(n128):
    """Pick (tm, tk) for the tiled path.

    tm: largest tile that divides the 128-rounded node count while keeping at
        least 2 row blocks, so both v7x TensorCores get work via the "parallel"
        grid axis.
    tk: largest reduction tile that divides it (longer contiguous DMA rows,
        fewer per-step overheads).
    Tiles are powers of two, so padding to lcm(tm, tk) == max(tm, tk).
    """
    tm_opts = [t for t in (512, 256, 128)
               if t <= n128 and n128 % t == 0 and n128 // t >= 2]
    tm = tm_opts[0] if tm_opts else min(512, n128)
    tk_opts = [t for t in (1024, 512, 256, 128) if t <= n128 and n128 % t == 0]
    tk = tk_opts[0] if tk_opts else min(1024, n128)
    return tm, tk


# ----------------------------- Pallas kernels ------------------------------

def _masked_log_softmax(z, num_classes):
    """log_softmax over the first `num_classes` lanes; padded lanes are masked."""
    col = jax.lax.broadcasted_iota(jnp.int32, z.shape, 1)
    valid = col < num_classes
    z = jnp.where(valid, z, jnp.float32(-1e30))       # mask pad classes (f32 only)
    z_max = jnp.max(z, axis=-1, keepdims=True)
    z_shift = z - z_max
    lse = jnp.log(jnp.sum(jnp.where(valid, jnp.exp(z_shift), 0.0),
                          axis=-1, keepdims=True))
    return z_shift - lse


def _gcn_fused_kernel(a_ref, xw_ref, b1_ref, w2_ref, b2_ref, o_ref, *, num_classes):
    """Whole-graph fused forward: every operand VMEM-resident, Ahat read once."""
    a = a_ref[...]
    # Layer 1: H = relu(Ahat @ XW1 + b1)   (f32 accumulation, f32 epilogue)
    h = jnp.maximum(
        jnp.dot(a, xw_ref[...], preferred_element_type=jnp.float32) + b1_ref[...],
        0.0)
    # Layer-2 feature transform fused in VMEM: Y = H @ W2   (never hits HBM)
    y = jnp.dot(h.astype(w2_ref.dtype), w2_ref[...],
                preferred_element_type=jnp.float32)
    # dropout(training=False) == identity
    # Layer 2: Z = Ahat @ Y + b2
    z = jnp.dot(a, y.astype(a.dtype), preferred_element_type=jnp.float32) + b2_ref[...]
    o_ref[...] = _masked_log_softmax(z, num_classes).astype(o_ref.dtype)


def _gcn_layer1_kernel(a_ref, xw_ref, b1_ref, w2_ref, y_ref, acc_ref, *,
                       tk, resident):
    """Accumulate Ahat @ XW1 over k; epilogue: Y = relu(acc + b1) @ W2."""
    k = pl.program_id(1)

    @pl.when(k == 0)
    def _():
        acc_ref[...] = jnp.zeros_like(acc_ref)

    if resident:      # XW1 is fully VMEM-resident; slice this k-chunk in place
        xw = xw_ref[pl.ds(pl.multiple_of(k * tk, tk), tk), :]
    else:             # streamed (tk, hp) block per k
        xw = xw_ref[...]
    acc_ref[...] += jnp.dot(a_ref[...], xw, preferred_element_type=jnp.float32)

    @pl.when(k == pl.num_programs(1) - 1)
    def _():
        h = jnp.maximum(acc_ref[...] + b1_ref[...], 0.0)          # f32 epilogue
        y_ref[...] = jnp.dot(h.astype(w2_ref.dtype), w2_ref[...],
                             preferred_element_type=jnp.float32).astype(y_ref.dtype)


def _gcn_layer2_kernel(a_ref, y_ref, b2_ref, o_ref, acc_ref, *,
                       tk, resident, num_classes):
    """Accumulate Ahat @ Y over k; epilogue: masked log_softmax(acc + b2)."""
    k = pl.program_id(1)

    @pl.when(k == 0)
    def _():
        acc_ref[...] = jnp.zeros_like(acc_ref)

    if resident:
        y = y_ref[pl.ds(pl.multiple_of(k * tk, tk), tk), :]
    else:
        y = y_ref[...]
    acc_ref[...] += jnp.dot(a_ref[...], y, preferred_element_type=jnp.float32)

    @pl.when(k == pl.num_programs(1) - 1)
    def _():
        z = acc_ref[...] + b2_ref[...]
        o_ref[...] = _masked_log_softmax(z, num_classes).astype(o_ref.dtype)


# ------------------------------ wrapper -------------------------------------

@functools.partial(jax.jit, static_argnames=("force_tiled",))
def gcn_forward(a_hat, x, w1, b1, w2, b2, *, force_tiled=False):
    n, in_feat = x.shape
    hidden = w1.shape[1]
    n_cls = w2.shape[1]

    hp = _round_up(hidden, LANE)       # lane-dense hidden width
    cp = _round_up(n_cls, LANE)        # lane-dense class width
    n128 = _round_up(max(n, 1), LANE)  # 128-rounded node count

    budget = _vmem_budget_bytes()      # per-generation VMEM budget (trace-time)

    # ---- pad parameters to lane-dense widths (zeros keep the math exact) ----
    w1p = jnp.zeros((in_feat, hp), jnp.float32).at[:, :hidden].set(w1)
    b1p = jnp.zeros((1, hp), jnp.float32).at[:, :hidden].set(b1.reshape(1, -1))
    w2p = jnp.zeros((hp, cp), jnp.float32).at[:hidden, :n_cls].set(w2)
    b2p = jnp.zeros((1, cp), jnp.float32).at[:, :n_cls].set(b2.reshape(1, -1))
    w2b = w2p.astype(jnp.bfloat16)

    # ---- choose execution path (pure Python on static shapes) --------------
    # FUSED: Ahat + XW1 (+ pipeline copies) + f32 intermediates must fit.
    fused_bytes = (2 * (2 * n128 * n128 + 2 * n128 * hp)
                   + n128 * (6 * hp + 12 * cp) + (2 << 20))
    use_fused = (not force_tiled) and n128 <= 2048 and fused_bytes <= budget // 2

    if use_fused:
        n_pad = n128
    else:
        tm, tk = _pick_tiles(n128)
        n_pad = _round_up(n128, math.lcm(tm, tk))   # power-of-two tiles: == max
        # Keep the narrow XW1 / Y operands fully VMEM-resident when small
        # relative to the budget; otherwise stream one (tk, width) block per k.
        resident = 4 * n_pad * max(hp, cp) <= budget // 4

    # ---- pad nodes; cast Ahat to bf16 *before* padding (no N^2 f32 pass) ----
    a_p = jnp.pad(a_hat.astype(jnp.bfloat16),
                  ((0, n_pad - n), (0, n_pad - n)))

    # Hoisted tiny feature transform (K = in_feat is badly MXU-shaped; do once).
    xw1 = jnp.pad(x @ w1p, ((0, n_pad - n), (0, 0))).astype(jnp.bfloat16)

    # ------------------------------ fused path ------------------------------
    if use_fused:
        out = pl.pallas_call(
            functools.partial(_gcn_fused_kernel, num_classes=n_cls),
            out_shape=jax.ShapeDtypeStruct((n_pad, cp), jnp.float32),
            grid=(1,),
            in_specs=[
                pl.BlockSpec((n_pad, n_pad), lambda i: (0, 0)),  # Ahat (resident)
                pl.BlockSpec((n_pad, hp), lambda i: (0, 0)),     # XW1 (resident)
                pl.BlockSpec((1, hp), lambda i: (0, 0)),         # b1
                pl.BlockSpec((hp, cp), lambda i: (0, 0)),        # W2
                pl.BlockSpec((1, cp), lambda i: (0, 0)),         # b2
            ],
            out_specs=pl.BlockSpec((n_pad, cp), lambda i: (0, 0)),
            compiler_params=pltpu.CompilerParams(
                dimension_semantics=("arbitrary",),
                vmem_limit_bytes=budget),
        )(a_p, xw1, b1p, w2b, b2p)
        return out[:n, :n_cls]

    # ------------------------------ tiled path ------------------------------
    grid = (n_pad // tm, n_pad // tk)
    cparams = pltpu.CompilerParams(
        dimension_semantics=("parallel", "arbitrary"),
        vmem_limit_bytes=budget)

    if resident:
        xw_spec = pl.BlockSpec((n_pad, hp), lambda i, k: (0, 0))
        y_spec = pl.BlockSpec((n_pad, cp), lambda i, k: (0, 0))
    else:
        xw_spec = pl.BlockSpec((tk, hp), lambda i, k: (k, 0))
        y_spec = pl.BlockSpec((tk, cp), lambda i, k: (k, 0))
    # NOTE: constant-index operands (b1/W2/b2 and resident XW1/Y) are fetched
    # only once; they still get a default second pipeline buffer, but with the
    # budgets above there is ample headroom, so single-buffering
    # (pipeline_mode=pl.Buffered(1)) is not required here.

    # Layer 1 (fused epilogue): Y = relu(Ahat @ XW1 + b1) @ W2   (bf16 to HBM)
    y = pl.pallas_call(
        functools.partial(_gcn_layer1_kernel, tk=tk, resident=resident),
        out_shape=jax.ShapeDtypeStruct((n_pad, cp), jnp.bfloat16),
        grid=grid,
        in_specs=[
            pl.BlockSpec((tm, tk), lambda i, k: (i, k)),   # Ahat tile
            xw_spec,                                       # XW1
            pl.BlockSpec((1, hp), lambda i, k: (0, 0)),    # b1
            pl.BlockSpec((hp, cp), lambda i, k: (0, 0)),   # W2
        ],
        out_specs=pl.BlockSpec((tm, cp), lambda i, k: (i, 0)),
        scratch_shapes=[pltpu.VMEM((tm, hp), jnp.float32)],
        compiler_params=cparams,
    )(a_p, xw1, b1p, w2b)

    # dropout(training=False) == identity

    # Layer 2: log_softmax(Ahat @ Y + b2)
    out = pl.pallas_call(
        functools.partial(_gcn_layer2_kernel, tk=tk, resident=resident,
                          num_classes=n_cls),
        out_shape=jax.ShapeDtypeStruct((n_pad, cp), jnp.float32),
        grid=grid,
        in_specs=[
            pl.BlockSpec((tm, tk), lambda i, k: (i, k)),   # Ahat tile
            y_spec,                                        # Y
            pl.BlockSpec((1, cp), lambda i, k: (0, 0)),    # b2
        ],
        out_specs=pl.BlockSpec((tm, cp), lambda i, k: (i, 0)),
        scratch_shapes=[pltpu.VMEM((tm, cp), jnp.float32)],
        compiler_params=cparams,
    )(a_p, y, b2p)

    return out[:n, :n_cls]


# ------------------------------ glue (JAX) ---------------------------------

def build_normalized_adjacency(edge_index, num_nodes):
    """Dense GCN adjacency: scatter-add edges, add self-loops, sym-normalize."""
    src, dst = edge_index[0], edge_index[1]
    a = jnp.zeros((num_nodes, num_nodes), jnp.float32)
    # PyG-style: duplicate edges accumulate (scatter-add), message src -> dst.
    a = a.at[dst, src].add(1.0)
    a = a + jnp.eye(num_nodes, dtype=jnp.float32)   # self-loops
    deg = jnp.sum(a, axis=1)
    d_inv_sqrt = jnp.where(deg > 0, 1.0 / jnp.sqrt(deg), 0.0)
    return d_inv_sqrt[:, None] * a * d_inv_sqrt[None, :]


def glorot(key, shape):
    fan_in, fan_out = shape
    limit = jnp.sqrt(6.0 / (fan_in + fan_out))
    return jax.random.uniform(key, shape, jnp.float32, -limit, limit)


def gcn_reference(a_hat, x, w1, b1, w2, b2):
    h = jnp.maximum(a_hat @ (x @ w1) + b1.reshape(1, -1), 0.0)
    z = a_hat @ (h @ w2) + b2.reshape(1, -1)
    return jax.nn.log_softmax(z, axis=1)


if __name__ == "__main__":
    key = jax.random.PRNGKey(0)
    k_x, k_e, k_w1, k_w2 = jax.random.split(key, 4)

    num_nodes = 512
    in_features = 32
    hidden = 16          # fixed by the module: GCNConv(in_features, 16)
    num_classes = 4
    num_edges = 2048

    # node features
    x = jax.random.normal(k_x, (num_nodes, in_features), jnp.float32)

    # random edge_index (2, E), made symmetric like a typical undirected graph
    src = jax.random.randint(k_e, (num_edges,), 0, num_nodes)
    dst = jnp.roll(src, 3)
    edge_index = jnp.stack(
        [jnp.concatenate([src, dst]), jnp.concatenate([dst, src])], axis=0)

    a_hat = build_normalized_adjacency(edge_index, num_nodes)

    # parameters (GCNConv: glorot weight, zero bias)
    w1 = glorot(k_w1, (in_features, hidden))
    b1 = jnp.zeros((hidden,), jnp.float32)
    w2 = glorot(k_w2, (hidden, num_classes))
    b2 = jnp.zeros((num_classes,), jnp.float32)

    ref = gcn_reference(a_hat, x, w1, b1, w2, b2)

    # --- fused single-kernel path (default for small graphs: Ahat resident) ---
    out_fused = gcn_forward(a_hat, x, w1, b1, w2, b2)
    jax.block_until_ready(out_fused)
    assert out_fused.shape == (num_nodes, num_classes)
    probs = jnp.exp(out_fused).sum(axis=1)          # log_softmax rows sum to ~1
    assert bool(jnp.all(jnp.abs(probs - 1.0) < 1e-4))
    err_fused = float(jnp.max(jnp.abs(out_fused - ref)))
    assert err_fused < 0.1, f"fused path error vs reference too large: {err_fused}"

    # --- tiled two-kernel path (large-graph code path), forced for coverage ---
    out_tiled = gcn_forward(a_hat, x, w1, b1, w2, b2, force_tiled=True)
    jax.block_until_ready(out_tiled)
    assert out_tiled.shape == (num_nodes, num_classes)
    err_tiled = float(jnp.max(jnp.abs(out_tiled - ref)))
    assert err_tiled < 0.1, f"tiled path error vs reference too large: {err_tiled}"

    print("KERNEL_OK")
</pallas_src>

<mosaic_0001>
module attributes {stable_mosaic.version = 11 : i64} {
  func.func @_gcn_fused_kernel(%arg0: i32, %arg1: memref<512x512xbf16, #tpu.memory_space<vmem>>, %arg2: memref<512x128xbf16, #tpu.memory_space<vmem>>, %arg3: memref<1x128xf32, #tpu.memory_space<vmem>>, %arg4: memref<128x128xbf16, #tpu.memory_space<vmem>>, %arg5: memref<1x128xf32, #tpu.memory_space<vmem>>, %arg6: memref<512x128xf32, #tpu.memory_space<vmem>>) attributes {dimension_semantics = [#tpu.dimension_semantics<arbitrary>], iteration_bounds = array<i64: 1>, scalar_prefetch = 0 : i64, scratch_operands = 0 : i64, tpu.core_type = #tpu.core_type<tc>, window_params = [{pipeline_mode = #tpu.pipeline_mode<synchronous>, transform_indices = @transform_0, window_bounds = array<i64: 512, 512>}, {pipeline_mode = #tpu.pipeline_mode<synchronous>, transform_indices = @transform_1, window_bounds = array<i64: 512, 128>}, {pipeline_mode = #tpu.pipeline_mode<synchronous>, transform_indices = @transform_2, window_bounds = array<i64: 1, 128>}, {pipeline_mode = #tpu.pipeline_mode<synchronous>, transform_indices = @transform_3, window_bounds = array<i64: 128, 128>}, {pipeline_mode = #tpu.pipeline_mode<synchronous>, transform_indices = @transform_4, window_bounds = array<i64: 1, 128>}, {pipeline_mode = #tpu.pipeline_mode<synchronous>, transform_indices = @transform_5, window_bounds = array<i64: 512, 128>}]} {
    %c0 = arith.constant 0 : index
    %c0_0 = arith.constant 0 : index
    %0 = vector.load %arg1[%c0, %c0_0] : memref<512x512xbf16, #tpu.memory_space<vmem>>, vector<512x512xbf16>
    %c0_1 = arith.constant 0 : index
    %c0_2 = arith.constant 0 : index
    %1 = vector.load %arg2[%c0_1, %c0_2] : memref<512x128xbf16, #tpu.memory_space<vmem>>, vector<512x128xbf16>
    %cst = arith.constant dense<0.000000e+00> : vector<512x128xf32>
    %2 = tpu.matmul %0, %1, %cst {dimension_numbers = #tpu.dot_dimension_numbers<[1], [0], [0], [1], [0, 0, 1, 1], [], []>} : vector<512x512xbf16>, vector<512x128xbf16>, vector<512x128xf32> -> vector<512x128xf32>
    %c0_3 = arith.constant 0 : index
    %c0_4 = arith.constant 0 : index
    %3 = vector.load %arg3[%c0_3, %c0_4] : memref<1x128xf32, #tpu.memory_space<vmem>>, vector<1x128xf32>
    %4 = vector.broadcast %3 : vector<1x128xf32> to vector<512x128xf32>
    %5 = arith.addf %2, %4 : vector<512x128xf32>
    %cst_5 = arith.constant 0.000000e+00 : f32
    %6 = vector.broadcast %cst_5 : f32 to vector<512x128xf32>
    %7 = arith.maximumf %5, %6 : vector<512x128xf32>
    %8 = arith.truncf %7 : vector<512x128xf32> to vector<512x128xbf16>
    %c0_6 = arith.constant 0 : index
    %c0_7 = arith.constant 0 : index
    %9 = vector.load %arg4[%c0_6, %c0_7] : memref<128x128xbf16, #tpu.memory_space<vmem>>, vector<128x128xbf16>
    %cst_8 = arith.constant dense<0.000000e+00> : vector<512x128xf32>
    %10 = tpu.matmul %8, %9, %cst_8 {dimension_numbers = #tpu.dot_dimension_numbers<[1], [0], [0], [1], [0, 0, 1, 1], [], []>} : vector<512x128xbf16>, vector<128x128xbf16>, vector<512x128xf32> -> vector<512x128xf32>
    %11 = arith.truncf %10 : vector<512x128xf32> to vector<512x128xbf16>
    %cst_9 = arith.constant dense<0.000000e+00> : vector<512x128xf32>
    %12 = tpu.matmul %0, %11, %cst_9 {dimension_numbers = #tpu.dot_dimension_numbers<[1], [0], [0], [1], [0, 0, 1, 1], [], []>} : vector<512x512xbf16>, vector<512x128xbf16>, vector<512x128xf32> -> vector<512x128xf32>
    %c0_10 = arith.constant 0 : index
    %c0_11 = arith.constant 0 : index
    %13 = vector.load %arg5[%c0_10, %c0_11] : memref<1x128xf32, #tpu.memory_space<vmem>>, vector<1x128xf32>
    %14 = vector.broadcast %13 : vector<1x128xf32> to vector<512x128xf32>
    %15 = arith.addf %12, %14 : vector<512x128xf32>
    %16 = tpu.iota {dimensions = array<i32: 1>} : vector<512x128xi32>
    %c4_i32 = arith.constant 4 : i32
    %17 = vector.broadcast %c4_i32 : i32 to vector<512x128xi32>
    %18 = arith.cmpi slt, %16, %17 : vector<512x128xi32>
    %cst_12 = arith.constant -1.000000e+30 : f32
    %19 = vector.broadcast %cst_12 : f32 to vector<512x128xf32>
    %20 = arith.select %18, %15, %19 : vector<512x128xi1>, vector<512x128xf32>
    %cst_13 = arith.constant dense<0xFF800000> : vector<512xf32>
    %21 = vector.multi_reduction <maximumf>, %20, %cst_13 [1] : vector<512x128xf32> to vector<512xf32>
    %22 = vector.shape_cast %21 : vector<512xf32> to vector<512x1xf32>
    %23 = vector.broadcast %22 : vector<512x1xf32> to vector<512x128xf32>
    %24 = arith.subf %20, %23 : vector<512x128xf32>
    %25 = math.exp %24 : vector<512x128xf32>
    %cst_14 = arith.constant 0.000000e+00 : f32
    %26 = vector.broadcast %cst_14 : f32 to vector<512x128xf32>
    %27 = arith.select %18, %25, %26 : vector<512x128xi1>, vector<512x128xf32>
    %cst_15 = arith.constant dense<0.000000e+00> : vector<512xf32>
    %28 = vector.multi_reduction <add>, %27, %cst_15 [1] : vector<512x128xf32> to vector<512xf32>
    %29 = vector.shape_cast %28 : vector<512xf32> to vector<512x1xf32>
    %30 = math.log %29 : vector<512x1xf32>
    %31 = vector.broadcast %30 : vector<512x1xf32> to vector<512x128xf32>
    %32 = arith.subf %24, %31 : vector<512x128xf32>
    %c0_16 = arith.constant 0 : index
    %c0_17 = arith.constant 0 : index
    %33 = vector.load %arg6[%c0_16, %c0_17] : memref<512x128xf32, #tpu.memory_space<vmem>>, vector<512x128xf32>
    tpu.vector_store %arg6[%c0_16, %c0_17], %32 {strides = array<i32>} : memref<512x128xf32, #tpu.memory_space<vmem>>, vector<512x128xf32>,
    return
  }
  func.func @transform_0(%arg0: i32) -> (i32, i32) {
    %c0_i32 = arith.constant 0 : i32
    %c0_i32_0 = arith.constant 0 : i32
    %c0_i32_1 = arith.constant 0 : i32
    return %c0_i32, %c0_i32_0 : i32, i32
  }
  func.func @transform_1(%arg0: i32) -> (i32, i32) {
    %c0_i32 = arith.constant 0 : i32
    %c0_i32_0 = arith.constant 0 : i32
    %c0_i32_1 = arith.constant 0 : i32
    return %c0_i32, %c0_i32_0 : i32, i32
  }
  func.func @transform_2(%arg0: i32) -> (i32, i32) {
    %c0_i32 = arith.constant 0 : i32
    %c0_i32_0 = arith.constant 0 : i32
    %c0_i32_1 = arith.constant 0 : i32
    return %c0_i32, %c0_i32_0 : i32, i32
  }
  func.func @transform_3(%arg0: i32) -> (i32, i32) {
    %c0_i32 = arith.constant 0 : i32
    %c0_i32_0 = arith.constant 0 : i32
    %c0_i32_1 = arith.constant 0 : i32
    return %c0_i32, %c0_i32_0 : i32, i32
  }
  func.func @transform_4(%arg0: i32) -> (i32, i32) {
    %c0_i32 = arith.constant 0 : i32
    %c0_i32_0 = arith.constant 0 : i32
    %c0_i32_1 = arith.constant 0 : i32
    return %c0_i32, %c0_i32_0 : i32, i32
  }
  func.func @transform_5(%arg0: i32) -> (i32, i32) {
    %c0_i32 = arith.constant 0 : i32
    %c0_i32_0 = arith.constant 0 : i32
    %c0_i32_1 = arith.constant 0 : i32
    return %c0_i32, %c0_i32_0 : i32, i32
  }
}

</mosaic_0001>

<bundles_post_ra>
// kernel: gcn_forward.1
= control target key start
LH: loop header
LB: loop body
LE: loop exit
PB: predicated region body
PF: predicated region fallthrough
CT: control target
= control target key end

     0   :  { %v4842_v0 = vmov 0   ;;  %s6926_s1 = inlined_call_operand.vmem [shape: bf16[512,128], index: 1, kind: input, shape index: {}]   ;;  %s6927_s0 = inlined_call_operand.vmem [shape: bf16[512,512], index: 0, kind: input, shape index: {}]   ;;  %s6928_s3 = inlined_call_operand.vmem [shape: bf16[128,128], index: 3, kind: input, shape index: {}]   ;;  %s6929_s2 = inlined_call_operand.vmem [shape: f32[1,128], index: 2, kind: input, shape index: {}]   ;;  %s6930_s4 = inlined_call_operand.vmem [shape: f32[1,128], index: 4, kind: input, shape index: {}]   ;;  %s6931_s5 = inlined_call_operand.vmem [shape: f32[512,128], index: 5, kind: output, shape index: {}]  }
   0x1   :  { %1052 = vmatprep.subr.bf16.mxu0 %v4842_v0  ;;  %v4226_v1 = vld [vmem:[%s6926_s1] sm:$0xff]   ;;  %v4227_v2 = vld [vmem:[%s6926_s1 + $0x8] sm:$0xff]   ;;  %v4228_v3 = vld [vmem:[%s6926_s1 + $0x10] sm:$0xff]  }
   0x2   :  { %1053 = vmatpush1.bf16.msra.mxu0 %v4226_v1  ;;  %v4229_v4 = vld [vmem:[%s6926_s1 + $0x18] sm:$0xff]   ;;  %v4230_v5 = vld [vmem:[%s6926_s1 + $0x20] sm:$0xff]   ;;  %v4231_v7 = vld [vmem:[%s6926_s1 + $0x28] sm:$0xff]  }
   0x3   :  { %1054 = vmatprep.subr.bf16.mxu0 %v4842_v0  ;;  %v4244_v6 = vld [vmem:[%s6927_s0 + $0x4] ss:$16 sps:$4 sm:$0xff]   ;;  %v4233_v9 = vld [vmem:[%s6926_s1 + $0x38] sm:$0xff]   ;;  %v4235_v11 = vld [vmem:[%s6926_s1 + $0x48] sm:$0xff]  }
   0x4   :  { %1084 = vmatprep.mubr.bf16.mxu0 %v4244_v6  ;;  %v4232_v8 = vld [vmem:[%s6926_s1 + $0x30] sm:$0xff]   ;;  %v4234_v10 = vld [vmem:[%s6926_s1 + $0x40] sm:$0xff]   ;;  %v4237_v13 = vld [vmem:[%s6926_s1 + $0x58] sm:$0xff]  }
   0x5   :  { %v4236_v12 = vld [vmem:[%s6926_s1 + $0x50] sm:$0xff]   ;;  %v4238_v14 = vld [vmem:[%s6926_s1 + $0x60] sm:$0xff]   ;;  %v4239_v15 = vld [vmem:[%s6926_s1 + $0x68] sm:$0xff]  }
   0x6   :  { %1055 = vmatpush1.bf16.msra.mxu0 %v4227_v2  ;;  %v4240_v16 = vld [vmem:[%s6926_s1 + $0x70] sm:$0xff]   ;;  %v4241_v17 = vld [vmem:[%s6926_s1 + $0x78] sm:$0xff]   ;;  %v4248_v20 = vld [vmem:[%s6926_s1 + $0x80] sm:$0xff]  }
   0x7   :  { %1056 = vmatprep.subr.bf16.mxu0 %v4842_v0  ;;  %v4242_v18 = vld [vmem:[%s6927_s0] ss:$16 sps:$4 sm:$0xff]   ;;  %v4245_v19 = vld [vmem:[%s6927_s0 + $0x24] ss:$16 sps:$4 sm:$0xff]   ;;  %v4255_v21 = vld [vmem:[%s6926_s1 + $0x88] sm:$0xff]  }
   0x8   :  { %v4247_v22 = vld [vmem:[%s6927_s0 + $0x20] ss:$16 sps:$4 sm:$0xff]   ;;  %v4249_v23 = vld [vmem:[%s6927_s0 + $0x44] ss:$16 sps:$4 sm:$0xff]   ;;  %v4269_v25 = vld [vmem:[%s6926_s1 + $0x98] sm:$0xff]  }
   0x9   :  { %v4262_v24 = vld [vmem:[%s6926_s1 + $0x90] sm:$0xff]   ;;  %v4276_v28 = vld [vmem:[%s6926_s1 + $0xa0] sm:$0xff]   ;;  %v4283_v29 = vld [vmem:[%s6926_s1 + $0xa8] sm:$0xff]  }
   0xa   :  { %1057 = vmatpush1.bf16.msra.mxu0 %v4228_v3  ;;  %v4251_v26 = vld [vmem:[%s6927_s0 + $0x40] ss:$16 sps:$4 sm:$0xff]   ;;  %v4252_v27 = vld [vmem:[%s6927_s0 + $0x64] ss:$16 sps:$4 sm:$0xff]   ;;  %v4297_v33 = vld [vmem:[%s6926_s1 + $0xb8] sm:$0xff]  }
   0xb   :  { %1058 = vmatprep.subr.bf16.mxu0 %v4842_v0  ;;  %v4254_v30 = vld [vmem:[%s6927_s0 + $0x60] ss:$16 sps:$4 sm:$0xff]   ;;  %v4256_v31 = vld [vmem:[%s6927_s0 + $0x84] ss:$16 sps:$4 sm:$0xff]   ;;  %v4311_v37 = vld [vmem:[%s6926_s1 + $0xc8] sm:$0xff]  }
   0xc   :  { %v4290_v32 = vld [vmem:[%s6926_s1 + $0xb0] sm:$0xff]   ;;  %v4304_v36 = vld [vmem:[%s6926_s1 + $0xc0] sm:$0xff]   ;;  %v4325_v45 = vld [vmem:[%s6926_s1 + $0xd8] sm:$0xff]  }
   0xd   :  { %v4258_v34 = vld [vmem:[%s6927_s0 + $0x80] ss:$16 sps:$4 sm:$0xff]   ;;  %v4259_v35 = vld [vmem:[%s6927_s0 + $0xa4] ss:$16 sps:$4 sm:$0xff]   ;;  %v4339_v55 = vld [vmem:[%s6926_s1 + $0xe8] sm:$0xff]  }
   0xe   :  { %1059 = vmatpush1.bf16.msra.mxu0 %v4229_v4  ;;  %v4261_v38 = vld [vmem:[%s6927_s0 + $0xa0] ss:$16 sps:$4 sm:$0xff]   ;;  %v4263_v39 = vld [vmem:[%s6927_s0 + $0xc4] ss:$16 sps:$4 sm:$0xff]   ;;  %v4353_v2 = vld [vmem:[%s6926_s1 + $0xf8] sm:$0xff]  }
   0xf   :  { %1060 = vmatprep.subr.bf16.mxu0 %v4842_v0  ;;  %v4318_v40 = vld [vmem:[%s6926_s1 + $0xd0] sm:$0xff]   ;;  %v4332_v50 = vld [vmem:[%s6926_s1 + $0xe0] sm:$0xff]  }
  0x10   :  { %v4265_v41 = vld [vmem:[%s6927_s0 + $0xc0] ss:$16 sps:$4 sm:$0xff]   ;;  %v4266_v42 = vld [vmem:[%s6927_s0 + $0xe4] ss:$16 sps:$4 sm:$0xff]  }
  0x11   :  { %v4268_v43 = vld [vmem:[%s6927_s0 + $0xe0] ss:$16 sps:$4 sm:$0xff]   ;;  %v4270_v44 = vld [vmem:[%s6927_s0 + $0x104] ss:$16 sps:$4 sm:$0xff]  }
  0x12   :  { %1061 = vmatpush1.bf16.msra.mxu0 %v4230_v5  ;;  %v4272_v46 = vld [vmem:[%s6927_s0 + $0x100] ss:$16 sps:$4 sm:$0xff]   ;;  %v4273_v47 = vld [vmem:[%s6927_s0 + $0x124] ss:$16 sps:$4 sm:$0xff]  }
  0x13   :  { %1062 = vmatprep.subr.bf16.mxu0 %v4842_v0  ;;  %v4275_v48 = vld [vmem:[%s6927_s0 + $0x120] ss:$16 sps:$4 sm:$0xff]   ;;  %v4277_v49 = vld [vmem:[%s6927_s0 + $0x144] ss:$16 sps:$4 sm:$0xff]  }
  0x14   :  { %v4279_v51 = vld [vmem:[%s6927_s0 + $0x140] ss:$16 sps:$4 sm:$0xff]   ;;  %v4280_v52 = vld [vmem:[%s6927_s0 + $0x164] ss:$16 sps:$4 sm:$0xff]  }
  0x15   :  { %v4282_v53 = vld [vmem:[%s6927_s0 + $0x160] ss:$16 sps:$4 sm:$0xff]   ;;  %v4284_v54 = vld [vmem:[%s6927_s0 + $0x184] ss:$16 sps:$4 sm:$0xff]  }
  0x16   :  { %1063 = vmatpush1.bf16.msra.mxu0 %v4231_v7  ;;  %v4286_v56 = vld [vmem:[%s6927_s0 + $0x180] ss:$16 sps:$4 sm:$0xff]   ;;  %v4287_v57 = vld [vmem:[%s6927_s0 + $0x1a4] ss:$16 sps:$4 sm:$0xff]  }
  0x17   :  { %1064 = vmatprep.subr.bf16.mxu0 %v4842_v0  ;;  %v4289_v58 = vld [vmem:[%s6927_s0 + $0x1a0] ss:$16 sps:$4 sm:$0xff]   ;;  %v4291_v59 = vld [vmem:[%s6927_s0 + $0x1c4] ss:$16 sps:$4 sm:$0xff]  }
  0x18   :  { %v4346_v60 = vld [vmem:[%s6926_s1 + $0xf0] sm:$0xff]  }
  0x19   :  { %v4293_v61 = vld [vmem:[%s6927_s0 + $0x1c0] ss:$16 sps:$4 sm:$0xff]   ;;  %v4294_v62 = vld [vmem:[%s6927_s0 + $0x1e4] ss:$16 sps:$4 sm:$0xff]  }
  0x1a   :  { %1065 = vmatpush1.bf16.msra.mxu0 %v4232_v8  ;;  %v4296_v63 = vld [vmem:[%s6927_s0 + $0x1e0] ss:$16 sps:$4 sm:$0xff]   ;;  %v4298_v1 = vld [vmem:[%s6927_s0 + $0x204] ss:$16 sps:$4 sm:$0xff]  }
  0x1b   :  { %1066 = vmatprep.subr.bf16.mxu0 %v4842_v0  ;;  %v4300_v3 = vld [vmem:[%s6927_s0 + $0x200] ss:$16 sps:$4 sm:$0xff]   ;;  %v4301_v4 = vld [vmem:[%s6927_s0 + $0x224] ss:$16 sps:$4 sm:$0xff]  }
  0x1c   :  { %v4303_v5 = vld [vmem:[%s6927_s0 + $0x220] ss:$16 sps:$4 sm:$0xff]   ;;  %v4305_v6 = vld [vmem:[%s6927_s0 + $0x244] ss:$16 sps:$4 sm:$0xff]  }
  0x1d   :  { %v4307_v7 = vld [vmem:[%s6927_s0 + $0x240] ss:$16 sps:$4 sm:$0xff]   ;;  %v4308_v8 = vld [vmem:[%s6927_s0 + $0x264] ss:$16 sps:$4 sm:$0xff]  }
  0x1e   :  { %1067 = vmatpush1.bf16.msra.mxu0 %v4233_v9  ;;  %v4310_v9 = vld [vmem:[%s6927_s0 + $0x260] ss:$16 sps:$4 sm:$0xff]  }
  0x1f   :  { %1068 = vmatprep.subr.bf16.mxu0 %v4842_v0 }
  0x22   :  { %1069 = vmatpush1.bf16.msra.mxu0 %v4234_v10  ;;  %v4312_v10 = vld [vmem:[%s6927_s0 + $0x284] ss:$16 sps:$4 sm:$0xff]  }
  0x23   :  { %1070 = vmatprep.subr.bf16.mxu0 %v4842_v0 }
  0x26   :  { %1071 = vmatpush1.bf16.msra.mxu0 %v4235_v11  ;;  %v4314_v11 = vld [vmem:[%s6927_s0 + $0x280] ss:$16 sps:$4 sm:$0xff]  }
  0x27   :  { %1072 = vmatprep.subr.bf16.mxu0 %v4842_v0 }
  0x2a   :  { %1073 = vmatpush1.bf16.msra.mxu0 %v4236_v12  ;;  %v4315_v12 = vld [vmem:[%s6927_s0 + $0x2a4] ss:$16 sps:$4 sm:$0xff]  }
  0x2b   :  { %1074 = vmatprep.subr.bf16.mxu0 %v4842_v0 }
  0x2e   :  { %1075 = vmatpush1.bf16.msra.mxu0 %v4237_v13  ;;  %v4369_v13 = vld [vmem:[%s6928_s3] sm:$0xff]  }
  0x2f   :  { %1076 = vmatprep.subr.bf16.mxu0 %v4842_v0  ;;  %3825 = vmatprep.subr.bf16.mxu1 %v4369_v13 }
  0x30   :  { %3833 = vmatpush3.bf16.msra.mxu1 %v4369_v13 }
  0x32   :  { %1077 = vmatpush1.bf16.msra.mxu0 %v4238_v14  ;;  %v4317_v14 = vld [vmem:[%s6927_s0 + $0x2a0] ss:$16 sps:$4 sm:$0xff]  }
  0x33   :  { %1078 = vmatprep.subr.bf16.mxu0 %v4842_v0 }
  0x36   :  { %1079 = vmatpush1.bf16.msra.mxu0 %v4239_v15  ;;  %v4319_v15 = vld [vmem:[%s6927_s0 + $0x2c4] ss:$16 sps:$4 sm:$0xff]  }
  0x37   :  { %1080 = vmatprep.subr.bf16.mxu0 %v4842_v0 }
  0x3a   :  { %1081 = vmatpush1.bf16.msra.mxu0 %v4240_v16  ;;  %v4321_v16 = vld [vmem:[%s6927_s0 + $0x2c0] ss:$16 sps:$4 sm:$0xff]  }
  0x3b   :  { %1082 = vmatprep.subr.bf16.mxu0 %v4842_v0 }
  0x3e   :  { %1083 = vmatpush1.bf16.msra.mxu0 %v4241_v17  ;;  %v4322_v17 = vld [vmem:[%s6927_s0 + $0x2e4] ss:$16 sps:$4 sm:$0xff]  }
  0x3f   :  { %1341 = vmatprep.subr.bf16.mxu0 %v4842_v0 }
  0x41   :  { %1085 = vmatmul.mubr.bf16.vlgmr.msra.gmra.mrb[0].mxu0 %v4242_v18  ;;  %v4324_v18 = vld [vmem:[%s6927_s0 + $0x2e0] ss:$16 sps:$4 sm:$0xff]  }
  0x42   :  { %1092 = vmatprep.mubr.bf16.mxu0 %v4245_v19  ;;  %1342 = vmatpush1.bf16.msra.mxu0 %v4248_v20  ;;  %v4326_v19 = vld [vmem:[%s6927_s0 + $0x304] ss:$16 sps:$4 sm:$0xff]   ;;  %v4328_v20 = vld [vmem:[%s6927_s0 + $0x300] ss:$16 sps:$4 sm:$0xff]  }
  0x43   :  { %1343 = vmatprep.subr.bf16.mxu0 %v4842_v0 }
  0x46   :  { %1344 = vmatpush1.bf16.msra.mxu0 %v4255_v21  ;;  %v4329_v21 = vld [vmem:[%s6927_s0 + $0x324] ss:$16 sps:$4 sm:$0xff]  }
  0x47   :  { %1345 = vmatprep.subr.bf16.mxu0 %v4842_v0 }
  0x49   :  { %1093 = vmatmul.mubr.bf16.gmra.mrb[4].mxu0 %v4247_v22  ;;  %v4382_v22 = vld [vmem:[%s6928_s3 + $0x8] sm:$0xff]  }
  0x4a   :  { %1100 = vmatprep.mubr.bf16.mxu0 %v4249_v23  ;;  %1346 = vmatpush1.bf16.msra.mxu0 %v4262_v24  ;;  %v4331_v23 = vld [vmem:[%s6927_s0 + $0x320] ss:$16 sps:$4 sm:$0xff]   ;;  %v4333_v24 = vld [vmem:[%s6927_s0 + $0x344] ss:$16 sps:$4 sm:$0xff]  }
  0x4b   :  { %1347 = vmatprep.subr.bf16.mxu0 %v4842_v0  ;;  %3826 = vmatprep.subr.bf16.mxu1 %v4382_v22 }
  0x4c   :  { %3834 = vmatpush3.bf16.msra.mxu1 %v4382_v22 }
  0x4e   :  { %1348 = vmatpush1.bf16.msra.mxu0 %v4269_v25  ;;  %v4335_v25 = vld [vmem:[%s6927_s0 + $0x340] ss:$16 sps:$4 sm:$0xff]  }
  0x4f   :  { %1349 = vmatprep.subr.bf16.mxu0 %v4842_v0 }
  0x51   :  { %1101 = vmatmul.mubr.bf16.gmra.mrb[8].mxu0 %v4251_v26  ;;  %v4336_v26 = vld [vmem:[%s6927_s0 + $0x364] ss:$16 sps:$4 sm:$0xff]  }
  0x52   :  { %1108 = vmatprep.mubr.bf16.mxu0 %v4252_v27  ;;  %1350 = vmatpush1.bf16.msra.mxu0 %v4276_v28  ;;  %v4338_v27 = vld [vmem:[%s6927_s0 + $0x360] ss:$16 sps:$4 sm:$0xff]   ;;  %v4340_v28 = vld [vmem:[%s6927_s0 + $0x384] ss:$16 sps:$4 sm:$0xff]  }
  0x53   :  { %1351 = vmatprep.subr.bf16.mxu0 %v4842_v0 }
  0x56   :  { %1352 = vmatpush1.bf16.msra.mxu0 %v4283_v29  ;;  %v4342_v29 = vld [vmem:[%s6927_s0 + $0x380] ss:$16 sps:$4 sm:$0xff]  }
  0x57   :  { %1353 = vmatprep.subr.bf16.mxu0 %v4842_v0 }
  0x59   :  { %1109 = vmatmul.mubr.bf16.gmra.mrb[12].mxu0 %v4254_v30  ;;  %v4343_v30 = vld [vmem:[%s6927_s0 + $0x3a4] ss:$16 sps:$4 sm:$0xff]  }
  0x5a   :  { %1116 = vmatprep.mubr.bf16.mxu0 %v4256_v31  ;;  %1354 = vmatpush1.bf16.msra.mxu0 %v4290_v32  ;;  %v4395_v31 = vld [vmem:[%s6928_s3 + $0x10] sm:$0xff]  }
  0x5b   :  { %1355 = vmatprep.subr.bf16.mxu0 %v4842_v0  ;;  %3827 = vmatprep.subr.bf16.mxu1 %v4395_v31  ;;  %v4345_v32 = vld [vmem:[%s6927_s0 + $0x3a0] ss:$16 sps:$4 sm:$0xff]  }
  0x5c   :  { %3835 = vmatpush3.bf16.msra.mxu1 %v4395_v31 }
  0x5e   :  { %1356 = vmatpush1.bf16.msra.mxu0 %v4297_v33  ;;  %v4347_v33 = vld [vmem:[%s6927_s0 + $0x3c4] ss:$16 sps:$4 sm:$0xff]  }
  0x5f   :  { %1357 = vmatprep.subr.bf16.mxu0 %v4842_v0 }
  0x61   :  { %1117 = vmatmul.mubr.bf16.gmra.mrb[16].mxu0 %v4258_v34  ;;  %v4349_v34 = vld [vmem:[%s6927_s0 + $0x3c0] ss:$16 sps:$4 sm:$0xff]  }
  0x62   :  { %1124 = vmatprep.mubr.bf16.mxu0 %v4259_v35  ;;  %1358 = vmatpush1.bf16.msra.mxu0 %v4304_v36  ;;  %v4350_v35 = vld [vmem:[%s6927_s0 + $0x3e4] ss:$16 sps:$4 sm:$0xff]   ;;  %v4352_v36 = vld [vmem:[%s6927_s0 + $0x3e0] ss:$16 sps:$4 sm:$0xff]  }
  0x63   :  { %1359 = vmatprep.subr.bf16.mxu0 %v4842_v0 }
  0x66   :  { %1360 = vmatpush1.bf16.msra.mxu0 %v4311_v37  ;;  %v4356_v37 = vld [vmem:[%s6927_s0 + $0xc] ss:$16 sps:$4 sm:$0xff]  }
  0x67   :  { %1361 = vmatprep.subr.bf16.mxu0 %v4842_v0 }
  0x69   :  { %1125 = vmatmul.mubr.bf16.gmra.mrb[20].mxu0 %v4261_v38  ;;  %v4354_v38 = vld [vmem:[%s6927_s0 + $0x8] ss:$16 sps:$4 sm:$0xff]  }
  0x6a   :  { %1132 = vmatprep.mubr.bf16.mxu0 %v4263_v39  ;;  %1362 = vmatpush1.bf16.msra.mxu0 %v4318_v40  ;;  %v4357_v39 = vld [vmem:[%s6927_s0 + $0x2c] ss:$16 sps:$4 sm:$0xff]  }
  0x6b   :  { %1363 = vmatprep.subr.bf16.mxu0 %v4842_v0  ;;  %v4408_v40 = vld [vmem:[%s6928_s3 + $0x18] sm:$0xff]  }
  0x6c   :  { %3828 = vmatprep.subr.bf16.mxu1 %v4408_v40 }
  0x6d   :  { %3836 = vmatpush3.bf16.msra.mxu1 %v4408_v40 }
  0x6e   :  { %1364 = vmatpush1.bf16.msra.mxu0 %v4325_v45  ;;  %v4365_v45 = vld [vmem:[%s6927_s0 + $0x68] ss:$16 sps:$4 sm:$0xff]  }
  0x6f   :  { %1365 = vmatprep.subr.bf16.mxu0 %v4842_v0 }
  0x71   :  { %1133 = vmatmul.mubr.bf16.gmra.mrb[24].mxu0 %v4265_v41  ;;  %v4359_v41 = vld [vmem:[%s6927_s0 + $0x28] ss:$16 sps:$4 sm:$0xff]  }
  0x72   :  { %1140 = vmatprep.mubr.bf16.mxu0 %v4266_v42  ;;  %1366 = vmatpush1.bf16.msra.mxu0 %v4332_v50  ;;  %v4360_v42 = vld [vmem:[%s6927_s0 + $0x4c] ss:$16 sps:$4 sm:$0xff]   ;;  %v4372_v50 = vld [vmem:[%s6927_s0 + $0xa8] ss:$16 sps:$4 sm:$0xff]  }
  0x73   :  { %1367 = vmatprep.subr.bf16.mxu0 %v4842_v0 }
  0x76   :  { %1368 = vmatpush1.bf16.msra.mxu0 %v4339_v55  ;;  %v4379_v55 = vld [vmem:[%s6927_s0 + $0x10c] ss:$16 sps:$4 sm:$0xff]  }
  0x77   :  { %1369 = vmatprep.subr.bf16.mxu0 %v4842_v0 }
  0x79   :  { %1141 = vmatmul.mubr.bf16.gmra.mrb[28].mxu0 %v4268_v43  ;;  %v4362_v43 = vld [vmem:[%s6927_s0 + $0x48] ss:$16 sps:$4 sm:$0xff]  }
  0x7a   :  { %1148 = vmatprep.mubr.bf16.mxu0 %v4270_v44  ;;  %1370 = vmatpush1.bf16.msra.mxu0 %v4346_v60  ;;  %v4363_v44 = vld [vmem:[%s6927_s0 + $0x6c] ss:$16 sps:$4 sm:$0xff]  }
  0x7b   :  { %1371 = vmatprep.subr.bf16.mxu0 %v4842_v0  ;;  %v4386_v60 = vld [vmem:[%s6927_s0 + $0x14c] ss:$16 sps:$4 sm:$0xff]  }
  0x7e   :  { %1372 = vmatpush1.bf16.msra.mxu0 %v4353_v2  ;;  %v4394_v2 = vld [vmem:[%s6927_s0 + $0x188] ss:$16 sps:$4 sm:$0xff]  }
  0x7f   :  { %3745 = vmatprep.subr.bf16.mxu0 %v4369_v13 }
  0x81   :  { %1149 = vmatmul.mubr.bf16.gmra.mrb[32].mxu0 %v4272_v46  ;;  %v4366_v46 = vld [vmem:[%s6927_s0 + $0x8c] ss:$16 sps:$4 sm:$0xff]  }
  0x82   :  { %1156 = vmatprep.mubr.bf16.mxu0 %v4273_v47  ;;  %v4368_v47 = vld [vmem:[%s6927_s0 + $0x88] ss:$16 sps:$4 sm:$0xff]  }
  0x89   :  { %1157 = vmatmul.mubr.bf16.gmra.mrb[36].mxu0 %v4275_v48  ;;  %v4370_v48 = vld [vmem:[%s6927_s0 + $0xac] ss:$16 sps:$4 sm:$0xff]  }
  0x8a   :  { %1164 = vmatprep.mubr.bf16.mxu0 %v4277_v49  ;;  %v4421_v49 = vld [vmem:[%s6928_s3 + $0x20] sm:$0xff]  }
  0x8b   :  { %3829 = vmatprep.subr.bf16.mxu1 %v4421_v49 }
  0x8c   :  { %3837 = vmatpush3.bf16.msra.mxu1 %v4421_v49 }
  0x91   :  { %1165 = vmatmul.mubr.bf16.gmra.mrb[40].mxu0 %v4279_v51  ;;  %v4373_v51 = vld [vmem:[%s6927_s0 + $0xcc] ss:$16 sps:$4 sm:$0xff]  }
  0x92   :  { %1172 = vmatprep.mubr.bf16.mxu0 %v4280_v52  ;;  %v4375_v52 = vld [vmem:[%s6927_s0 + $0xc8] ss:$16 sps:$4 sm:$0xff]  }
  0x99   :  { %1173 = vmatmul.mubr.bf16.gmra.mrb[44].mxu0 %v4282_v53  ;;  %v4376_v53 = vld [vmem:[%s6927_s0 + $0xec] ss:$16 sps:$4 sm:$0xff]  }
  0x9a   :  { %1180 = vmatprep.mubr.bf16.mxu0 %v4284_v54  ;;  %v4378_v54 = vld [vmem:[%s6927_s0 + $0xe8] ss:$16 sps:$4 sm:$0xff]  }
  0xa1   :  { %1181 = vmatmul.mubr.bf16.gmra.mrb[48].mxu0 %v4286_v56  ;;  %v4381_v56 = vld [vmem:[%s6927_s0 + $0x108] ss:$16 sps:$4 sm:$0xff]  }
  0xa2   :  { %1188 = vmatprep.mubr.bf16.mxu0 %v4287_v57  ;;  %v4383_v57 = vld [vmem:[%s6927_s0 + $0x12c] ss:$16 sps:$4 sm:$0xff]  }
  0xa9   :  { %1189 = vmatmul.mubr.bf16.gmra.mrb[52].mxu0 %v4289_v58  ;;  %v4434_v58 = vld [vmem:[%s6928_s3 + $0x28] sm:$0xff]  }
  0xaa   :  { %1196 = vmatprep.mubr.bf16.mxu0 %v4291_v59  ;;  %3830 = vmatprep.subr.bf16.mxu1 %v4434_v58  ;;  %v4385_v59 = vld [vmem:[%s6927_s0 + $0x128] ss:$16 sps:$4 sm:$0xff]  }
  0xab   :  { %3838 = vmatpush3.bf16.msra.mxu1 %v4434_v58 }
  0xb1   :  { %1197 = vmatmul.mubr.bf16.gmra.mrb[56].mxu0 %v4293_v61  ;;  %v4388_v61 = vld [vmem:[%s6927_s0 + $0x148] ss:$16 sps:$4 sm:$0xff]  }
  0xb2   :  { %1204 = vmatprep.mubr.bf16.mxu0 %v4294_v62  ;;  %v4389_v62 = vld [vmem:[%s6927_s0 + $0x16c] ss:$16 sps:$4 sm:$0xff]  }
  0xb9   :  { %1205 = vmatmul.mubr.bf16.gmra.mrb[60].mxu0 %v4296_v63  ;;  %v4391_v63 = vld [vmem:[%s6927_s0 + $0x168] ss:$16 sps:$4 sm:$0xff]  }
  0xba   :  { %1212 = vmatprep.mubr.bf16.mxu0 %v4298_v1  ;;  %v4392_v1 = vld [vmem:[%s6927_s0 + $0x18c] ss:$16 sps:$4 sm:$0xff]  }
  0xc1   :  { %1213 = vmatmul.mubr.bf16.gmra.mrb[64].mxu0 %v4300_v3  ;;  %v4396_v3 = vld [vmem:[%s6927_s0 + $0x1ac] ss:$16 sps:$4 sm:$0xff]  }
  0xc2   :  { %1220 = vmatprep.mubr.bf16.mxu0 %v4301_v4  ;;  %v4398_v4 = vld [vmem:[%s6927_s0 + $0x1a8] ss:$16 sps:$4 sm:$0xff]  }
  0xc9   :  { %1221 = vmatmul.mubr.bf16.gmra.mrb[68].mxu0 %v4303_v5  ;;  %v4399_v5 = vld [vmem:[%s6927_s0 + $0x1cc] ss:$16 sps:$4 sm:$0xff]  }
  0xca   :  { %1228 = vmatprep.mubr.bf16.mxu0 %v4305_v6  ;;  %v4447_v6 = vld [vmem:[%s6928_s3 + $0x30] sm:$0xff]  }
  0xcb   :  { %3831 = vmatprep.subr.bf16.mxu1 %v4447_v6 }
  0xcc   :  { %3839 = vmatpush3.bf16.msra.mxu1 %v4447_v6 }
  0xd1   :  { %1229 = vmatmul.mubr.bf16.gmra.mrb[72].mxu0 %v4307_v7  ;;  %v4401_v7 = vld [vmem:[%s6927_s0 + $0x1c8] ss:$16 sps:$4 sm:$0xff]  }
  0xd2   :  { %1236 = vmatprep.mubr.bf16.mxu0 %v4308_v8  ;;  %v4402_v8 = vld [vmem:[%s6927_s0 + $0x1ec] ss:$16 sps:$4 sm:$0xff]  }
  0xd9   :  { %1237 = vmatmul.mubr.bf16.gmra.mrb[76].mxu0 %v4310_v9  ;;  %v4404_v9 = vld [vmem:[%s6927_s0 + $0x1e8] ss:$16 sps:$4 sm:$0xff]  }
  0xda   :  { %1244 = vmatprep.mubr.bf16.mxu0 %v4312_v10  ;;  %v4405_v10 = vld [vmem:[%s6927_s0 + $0x20c] ss:$16 sps:$4 sm:$0xff]  }
  0xe1   :  { %1245 = vmatmul.mubr.bf16.gmra.mrb[80].mxu0 %v4314_v11  ;;  %v4457_v11 = vld [vmem:[%s6928_s3 + $0x38] sm:$0xff]  }
  0xe2   :  { %1252 = vmatprep.mubr.bf16.mxu0 %v4315_v12  ;;  %v4407_v12 = vld [vmem:[%s6927_s0 + $0x208] ss:$16 sps:$4 sm:$0xff]   ;;  %3832 = vmatprep.subr.bf16.mxu1 %v4457_v11 }
  0xe3   :  { %3840 = vmatpush3.bf16.msra.mxu1 %v4457_v11 }
  0xe4   :  { %2118 = vmatprep.subr.bf16.mxu1 %v4842_v0 }
  0xe9   :  { %1253 = vmatmul.mubr.bf16.gmra.mrb[84].mxu0 %v4317_v14  ;;  %v4411_v14 = vld [vmem:[%s6927_s0 + $0x228] ss:$16 sps:$4 sm:$0xff]  }
  0xea   :  { %1260 = vmatprep.mubr.bf16.mxu0 %v4319_v15  ;;  %v4412_v15 = vld [vmem:[%s6927_s0 + $0x24c] ss:$16 sps:$4 sm:$0xff]  }
  0xf1   :  { %1261 = vmatmul.mubr.bf16.gmra.mrb[88].mxu0 %v4321_v16  ;;  %v4414_v16 = vld [vmem:[%s6927_s0 + $0x248] ss:$16 sps:$4 sm:$0xff]  }
  0xf2   :  { %1268 = vmatprep.mubr.bf16.mxu0 %v4322_v17  ;;  %v4415_v17 = vld [vmem:[%s6927_s0 + $0x26c] ss:$16 sps:$4 sm:$0xff]  }
  0xf9   :  { %1269 = vmatmul.mubr.bf16.gmra.mrb[92].mxu0 %v4324_v18  ;;  %v4417_v18 = vld [vmem:[%s6927_s0 + $0x268] ss:$16 sps:$4 sm:$0xff]  }
  0xfa   :  { %1276 = vmatprep.mubr.bf16.mxu0 %v4326_v19  ;;  %v4418_v19 = vld [vmem:[%s6927_s0 + $0x28c] ss:$16 sps:$4 sm:$0xff]  }
 0x101   :  { %1277 = vmatmul.mubr.bf16.gmra.mrb[96].mxu0 %v4328_v20  ;;  %v4420_v20 = vld [vmem:[%s6927_s0 + $0x288] ss:$16 sps:$4 sm:$0xff]  }
 0x102   :  { %1284 = vmatprep.mubr.bf16.mxu0 %v4329_v21  ;;  %v4422_v21 = vld [vmem:[%s6927_s0 + $0x2ac] ss:$16 sps:$4 sm:$0xff]  }
 0x109   :  { %1285 = vmatmul.mubr.bf16.gmra.mrb[100].mxu0 %v4331_v23  ;;  %v4425_v23 = vld [vmem:[%s6927_s0 + $0x2cc] ss:$16 sps:$4 sm:$0xff]  }
 0x10a   :  { %1292 = vmatprep.mubr.bf16.mxu0 %v4333_v24  ;;  %v4427_v24 = vld [vmem:[%s6927_s0 + $0x2c8] ss:$16 sps:$4 sm:$0xff]  }
 0x111   :  { %1293 = vmatmul.mubr.bf16.gmra.mrb[104].mxu0 %v4335_v25  ;;  %v4428_v25 = vld [vmem:[%s6927_s0 + $0x2ec] ss:$16 sps:$4 sm:$0xff]  }
 0x112   :  { %1300 = vmatprep.mubr.bf16.mxu0 %v4336_v26  ;;  %v4430_v26 = vld [vmem:[%s6927_s0 + $0x2e8] ss:$16 sps:$4 sm:$0xff]  }
 0x119   :  { %1301 = vmatmul.mubr.bf16.gmra.mrb[108].mxu0 %v4338_v27  ;;  %v4431_v27 = vld [vmem:[%s6927_s0 + $0x30c] ss:$16 sps:$4 sm:$0xff]  }
 0x11a   :  { %1308 = vmatprep.mubr.bf16.mxu0 %v4340_v28  ;;  %v4433_v28 = vld [vmem:[%s6927_s0 + $0x308] ss:$16 sps:$4 sm:$0xff]  }
 0x121   :  { %1309 = vmatmul.mubr.bf16.gmra.mrb[112].mxu0 %v4342_v29  ;;  %v4435_v29 = vld [vmem:[%s6927_s0 + $0x32c] ss:$16 sps:$4 sm:$0xff]  }
 0x122   :  { %1316 = vmatprep.mubr.bf16.mxu0 %v4343_v30  ;;  %v4437_v30 = vld [vmem:[%s6927_s0 + $0x328] ss:$16 sps:$4 sm:$0xff]  }
 0x129   :  { %1317 = vmatmul.mubr.bf16.gmra.mrb[116].mxu0 %v4345_v32  ;;  %v4440_v32 = vld [vmem:[%s6927_s0 + $0x348] ss:$16 sps:$4 sm:$0xff]  }
 0x12a   :  { %1324 = vmatprep.mubr.bf16.mxu0 %v4347_v33  ;;  %v4441_v33 = vld [vmem:[%s6927_s0 + $0x36c] ss:$16 sps:$4 sm:$0xff]  }
 0x131   :  { %1325 = vmatmul.mubr.bf16.gmra.mrb[120].mxu0 %v4349_v34  ;;  %v5386_v34 = vld [vmem:[%s6929_s2] ss:$0 sm:$0xff] }
 0x132   :  { %1332 = vmatprep.mubr.bf16.mxu0 %v4350_v35 }
 0x139   :  { %1333 = vmatmul.mubr.bf16.gmra.mrb[124].mxu0 %v4352_v36 }
 0x13a   :  { %1373 = vmatprep.mubr.bf16.mxu0 %v4356_v37 }
 0x141   :  { %1374 = vmatmul.mubr.bf16.vlgmr.msra.gmra.mrb[0].mxu0 %v4354_v38  ;;  %v4443_v38 = vld [vmem:[%s6927_s0 + $0x368] ss:$16 sps:$4 sm:$0xff]  }
 0x142   :  { %1381 = vmatprep.mubr.bf16.mxu0 %v4357_v39  ;;  %3746 = vmatpush3.bf16.msra.mxu0 %v4369_v13  ;;  %v4409_v13 = vld [vmem:[%s6927_s0 + $0x22c] ss:$16 sps:$4 sm:$0xff]  }
 0x143   :  { %3747 = vmatprep.subr.bf16.mxu0 %v4382_v22 }
 0x146   :  { %3748 = vmatpush3.bf16.msra.mxu0 %v4382_v22  ;;  %v4424_v22 = vld [vmem:[%s6927_s0 + $0x2a8] ss:$16 sps:$4 sm:$0xff]  }
 0x147   :  { %3749 = vmatprep.subr.bf16.mxu0 %v4395_v31 }
 0x149   :  { %1382 = vmatmul.mubr.bf16.gmra.mrb[4].mxu0 %v4359_v41 }
 0x14a   :  { %1389 = vmatprep.mubr.bf16.mxu0 %v4360_v42  ;;  %3750 = vmatpush3.bf16.msra.mxu0 %v4395_v31  ;;  %v4438_v31 = vld [vmem:[%s6927_s0 + $0x34c] ss:$16 sps:$4 sm:$0xff]  }
 0x14b   :  { %3751 = vmatprep.subr.bf16.mxu0 %v4408_v40 }
 0x14e   :  { %3752 = vmatpush3.bf16.msra.mxu0 %v4408_v40  ;;  %v4444_v40 = vld [vmem:[%s6927_s0 + $0x38c] ss:$16 sps:$4 sm:$0xff]  }
 0x14f   :  { %3753 = vmatprep.subr.bf16.mxu0 %v4421_v49 }
 0x151   :  { %1390 = vmatmul.mubr.bf16.gmra.mrb[8].mxu0 %v4362_v43 }
 0x152   :  { %1397 = vmatprep.mubr.bf16.mxu0 %v4363_v44  ;;  %3754 = vmatpush3.bf16.msra.mxu0 %v4421_v49  ;;  %v4446_v49 = vld [vmem:[%s6927_s0 + $0x388] ss:$16 sps:$4 sm:$0xff]  }
 0x153   :  { %3755 = vmatprep.subr.bf16.mxu0 %v4434_v58 }
 0x156   :  { %3756 = vmatpush3.bf16.msra.mxu0 %v4434_v58 }
 0x157   :  { %3757 = vmatprep.subr.bf16.mxu0 %v4447_v6 }
 0x159   :  { %1398 = vmatmul.mubr.bf16.gmra.mrb[12].mxu0 %v4365_v45 }
 0x15a   :  { %1405 = vmatprep.mubr.bf16.mxu0 %v4366_v46  ;;  %3758 = vmatpush3.bf16.msra.mxu0 %v4447_v6 }
 0x15b   :  { %3759 = vmatprep.subr.bf16.mxu0 %v4457_v11 }
 0x15e   :  { %3760 = vmatpush3.bf16.msra.mxu0 %v4457_v11 }
 0x161   :  { %1406 = vmatmul.mubr.bf16.gmra.mrb[16].mxu0 %v4368_v47 }
 0x162   :  { %1413 = vmatprep.mubr.bf16.mxu0 %v4370_v48 }
 0x169   :  { %1414 = vmatmul.mubr.bf16.gmra.mrb[20].mxu0 %v4372_v50 }
 0x16a   :  { %1421 = vmatprep.mubr.bf16.mxu0 %v4373_v51  ;;  %v4448_v51 = vld [vmem:[%s6927_s0 + $0x3ac] ss:$16 sps:$4 sm:$0xff]  }
 0x171   :  { %1422 = vmatmul.mubr.bf16.gmra.mrb[24].mxu0 %v4375_v52 }
 0x172   :  { %1429 = vmatprep.mubr.bf16.mxu0 %v4376_v53 }
 0x179   :  { %1430 = vmatmul.mubr.bf16.gmra.mrb[28].mxu0 %v4378_v54 }
 0x17a   :  { %1437 = vmatprep.mubr.bf16.mxu0 %v4379_v55 }
 0x181   :  { %1438 = vmatmul.mubr.bf16.gmra.mrb[32].mxu0 %v4381_v56 }
 0x182   :  { %1445 = vmatprep.mubr.bf16.mxu0 %v4383_v57 }
 0x189   :  { %1446 = vmatmul.mubr.bf16.gmra.mrb[36].mxu0 %v4385_v59 }
 0x18a   :  { %1453 = vmatprep.mubr.bf16.mxu0 %v4386_v60  ;;  %v4450_v60 = vld [vmem:[%s6927_s0 + $0x3a8] ss:$16 sps:$4 sm:$0xff]  }
 0x191   :  { %1454 = vmatmul.mubr.bf16.gmra.mrb[40].mxu0 %v4388_v61 }
 0x192   :  { %1461 = vmatprep.mubr.bf16.mxu0 %v4389_v62  ;;  %v4451_v62 = vld [vmem:[%s6927_s0 + $0x3cc] ss:$16 sps:$4 sm:$0xff]  }
 0x199   :  { %1462 = vmatmul.mubr.bf16.gmra.mrb[44].mxu0 %v4391_v63 }
 0x19a   :  { %1469 = vmatprep.mubr.bf16.mxu0 %v4392_v1 }
 0x1a1   :  { %1470 = vmatmul.mubr.bf16.gmra.mrb[48].mxu0 %v4394_v2 }
 0x1a2   :  { %1477 = vmatprep.mubr.bf16.mxu0 %v4396_v3 }
 0x1a9   :  { %1478 = vmatmul.mubr.bf16.gmra.mrb[52].mxu0 %v4398_v4 }
 0x1aa   :  { %1485 = vmatprep.mubr.bf16.mxu0 %v4399_v5 }
 0x1b1   :  { %1486 = vmatmul.mubr.bf16.gmra.mrb[56].mxu0 %v4401_v7 }
 0x1b2   :  { %1493 = vmatprep.mubr.bf16.mxu0 %v4402_v8  ;;  %v4453_v8 = vld [vmem:[%s6927_s0 + $0x3c8] ss:$16 sps:$4 sm:$0xff]  }
 0x1b9   :  { %1494 = vmatmul.mubr.bf16.gmra.mrb[60].mxu0 %v4404_v9 }
 0x1ba   :  { %1501 = vmatprep.mubr.bf16.mxu0 %v4405_v10  ;;  %v4454_v10 = vld [vmem:[%s6927_s0 + $0x3ec] ss:$16 sps:$4 sm:$0xff]  }
 0x1c1   :  { %1502 = vmatmul.mubr.bf16.gmra.mrb[64].mxu0 %v4407_v12 }
 0x1c2   :  { %1509 = vmatprep.mubr.bf16.mxu0 %v4409_v13 }
 0x1c9   :  { %1510 = vmatmul.mubr.bf16.gmra.mrb[68].mxu0 %v4411_v14 }
 0x1ca   :  { %1517 = vmatprep.mubr.bf16.mxu0 %v4412_v15 }
 0x1d1   :  { %1518 = vmatmul.mubr.bf16.gmra.mrb[72].mxu0 %v4414_v16 }
 0x1d2   :  { %1525 = vmatprep.mubr.bf16.mxu0 %v4415_v17 }
 0x1d9   :  { %1526 = vmatmul.mubr.bf16.gmra.mrb[76].mxu0 %v4417_v18 }
 0x1da   :  { %1533 = vmatprep.mubr.bf16.mxu0 %v4418_v19  ;;  %v4456_v19 = vld [vmem:[%s6927_s0 + $0x3e8] ss:$16 sps:$4 sm:$0xff]  }
 0x1e1   :  { %1534 = vmatmul.mubr.bf16.gmra.mrb[80].mxu0 %v4420_v20 }
 0x1e2   :  { %1541 = vmatprep.mubr.bf16.mxu0 %v4422_v21 }
 0x1e9   :  { %1542 = vmatmul.mubr.bf16.gmra.mrb[84].mxu0 %v4424_v22 }
 0x1ea   :  { %1549 = vmatprep.mubr.bf16.mxu0 %v4425_v23 }
 0x1f1   :  { %1550 = vmatmul.mubr.bf16.gmra.mrb[88].mxu0 %v4427_v24 }
 0x1f2   :  { %1557 = vmatprep.mubr.bf16.mxu0 %v4428_v25 }
 0x1f9   :  { %1558 = vmatmul.mubr.bf16.gmra.mrb[92].mxu0 %v4430_v26 }
 0x1fa   :  { %1565 = vmatprep.mubr.bf16.mxu0 %v4431_v27 }
 0x201   :  { %1566 = vmatmul.mubr.bf16.gmra.mrb[96].mxu0 %v4433_v28 }
 0x202   :  { %1573 = vmatprep.mubr.bf16.mxu0 %v4435_v29 }
 0x209   :  { %1574 = vmatmul.mubr.bf16.gmra.mrb[100].mxu0 %v4437_v30 }
 0x20a   :  { %1581 = vmatprep.mubr.bf16.mxu0 %v4438_v31 }
 0x211   :  { %1582 = vmatmul.mubr.bf16.gmra.mrb[104].mxu0 %v4440_v32 }
 0x212   :  { %1589 = vmatprep.mubr.bf16.mxu0 %v4441_v33 }
 0x214   :  { %v1375_v35 = vpop.f32.mrb[0].mxu0 }
 0x215   :  { %v3841_v36 = vadd.f32 %v5386_v34, %v1375_v35  ;;  %v1377_v37 = vpop.f32.mrb[1].mxu0 }
 0x216   :  { %v1378_v39 = vpop.f32.mrb[2].mxu0 }
 0x217   :  { %v3842_v41 = vadd.f32 %v5386_v34, %v1378_v39  ;;  %v1380_v42 = vpop.f32.mrb[3].mxu0  ;;  %v1630_v43 = vmax.f32 %v3841_v36, 0.0 }
 0x219   :  { %v1631_v44 = vmax.f32 %v3842_v41, 0.0  ;;  %1590 = vmatmul.mubr.bf16.gmra.mrb[108].mxu0 %v4443_v38 }
 0x21a   :  { %1597 = vmatprep.mubr.bf16.mxu0 %v4444_v40 }
 0x21b   :  { %v1694_v45 = vpack.c.bf16 %v1631_v44, %v1630_v43 }
 0x21c   :  { %v1383_v46 = vpop.f32.mrb[4].mxu0 }
 0x21d   :  { %v3843_v47 = vadd.f32 %v5386_v34, %v1383_v46  ;;  %v1385_v48 = vpop.f32.mrb[5].mxu0 }
 0x21e   :  { %v1386_v50 = vpop.f32.mrb[6].mxu0 }
 0x21f   :  { %v3844_v52 = vadd.f32 %v5386_v34, %v1386_v50  ;;  %v1388_v53 = vpop.f32.mrb[7].mxu0  ;;  %v1632_v54 = vmax.f32 %v3843_v47, 0.0 }
 0x221   :  { %v1633_v55 = vmax.f32 %v3844_v52, 0.0  ;;  %1598 = vmatmul.mubr.bf16.gmra.mrb[112].mxu0 %v4446_v49 }
 0x222   :  { %1605 = vmatprep.mubr.bf16.mxu0 %v4448_v51 }
 0x223   :  { %v1695_v56 = vpack.c.bf16 %v1633_v55, %v1632_v54 }
 0x224   :  { %v1391_v57 = vpop.f32.mrb[8].mxu0 }
 0x225   :  { %v3845_v58 = vadd.f32 %v5386_v34, %v1391_v57  ;;  %v1393_v59 = vpop.f32.mrb[9].mxu0 }
 0x226   :  { %v1394_v61 = vpop.f32.mrb[10].mxu0 }
 0x227   :  { %v3846_v63 = vadd.f32 %v5386_v34, %v1394_v61  ;;  %v1396_v1 = vpop.f32.mrb[11].mxu0  ;;  %v1634_v2 = vmax.f32 %v3845_v58, 0.0 }
 0x229   :  { %v1635_v3 = vmax.f32 %v3846_v63, 0.0  ;;  %1606 = vmatmul.mubr.bf16.gmra.mrb[116].mxu0 %v4450_v60 }
 0x22a   :  { %1613 = vmatprep.mubr.bf16.mxu0 %v4451_v62 }
 0x22b   :  { %v1696_v4 = vpack.c.bf16 %v1635_v3, %v1634_v2 }
 0x22c   :  { %v1399_v5 = vpop.f32.mrb[12].mxu0 }
 0x22d   :  { %v3847_v6 = vadd.f32 %v5386_v34, %v1399_v5  ;;  %v1401_v7 = vpop.f32.mrb[13].mxu0 }
 0x22e   :  { %v1402_v9 = vpop.f32.mrb[14].mxu0 }
 0x22f   :  { %v3848_v11 = vadd.f32 %v5386_v34, %v1402_v9  ;;  %v1404_v12 = vpop.f32.mrb[15].mxu0  ;;  %v1636_v13 = vmax.f32 %v3847_v6, 0.0 }
 0x231   :  { %v1637_v14 = vmax.f32 %v3848_v11, 0.0  ;;  %1614 = vmatmul.mubr.bf16.gmra.mrb[120].mxu0 %v4453_v8 }
 0x232   :  { %1621 = vmatprep.mubr.bf16.mxu0 %v4454_v10 }
 0x233   :  { %v1697_v15 = vpack.c.bf16 %v1637_v14, %v1636_v13 }
 0x234   :  { %v1407_v16 = vpop.f32.mrb[16].mxu0 }
 0x235   :  { %v3849_v17 = vadd.f32 %v5386_v34, %v1407_v16  ;;  %v1409_v18 = vpop.f32.mrb[17].mxu0 }
 0x236   :  { %v1410_v20 = vpop.f32.mrb[18].mxu0 }
 0x237   :  { %v3850_v21 = vadd.f32 %v5386_v34, %v1410_v20  ;;  %v1412_v22 = vpop.f32.mrb[19].mxu0  ;;  %v1638_v23 = vmax.f32 %v3849_v17, 0.0 }
 0x239   :  { %v1639_v24 = vmax.f32 %v3850_v21, 0.0  ;;  %1622 = vmatmul.mubr.bf16.gmra.mrb[124].mxu0 %v4456_v19 }
 0x23a   :  { %3761 = vmatprep.mubr.bf16.mxu0 %v1694_v45 }
 0x23b   :  { %v1698_v25 = vpack.c.bf16 %v1639_v24, %v1638_v23 }
 0x23c   :  { %v1415_v26 = vpop.f32.mrb[20].mxu0 }
 0x23d   :  { %v3851_v27 = vadd.f32 %v5386_v34, %v1415_v26  ;;  %v1417_v28 = vpop.f32.mrb[21].mxu0 }
 0x23e   :  { %v1418_v29 = vpop.f32.mrb[22].mxu0 }
 0x23f   :  { %v3852_v30 = vadd.f32 %v5386_v34, %v1418_v29  ;;  %v1420_v31 = vpop.f32.mrb[23].mxu0  ;;  %v1640_v32 = vmax.f32 %v3851_v27, 0.0 }
 0x241   :  { %v1641_v33 = vmax.f32 %v3852_v30, 0.0  ;;  %3762 = vmatmul.mubr.bf16.vlgmr.msra.gmra.mrb[128].mxu0 %v1695_v56 }
 0x242   :  { %3765 = vmatprep.mubr.bf16.mxu0 %v1696_v4 }
 0x243   :  { %v1699_v35 = vpack.c.bf16 %v1641_v33, %v1640_v32 }
 0x244   :  { %v1423_v36 = vpop.f32.mrb[24].mxu0 }
 0x245   :  { %v3853_v37 = vadd.f32 %v5386_v34, %v1423_v36  ;;  %v1425_v38 = vpop.f32.mrb[25].mxu0 }
 0x246   :  { %v1426_v39 = vpop.f32.mrb[26].mxu0 }
 0x247   :  { %v3854_v40 = vadd.f32 %v5386_v34, %v1426_v39  ;;  %v1428_v41 = vpop.f32.mrb[27].mxu0  ;;  %v1642_v42 = vmax.f32 %v3853_v37, 0.0 }
 0x249   :  { %v1643_v43 = vmax.f32 %v3854_v40, 0.0  ;;  %3766 = vmatmul.mubr.bf16.gmra.mrb[132].mxu0 %v1697_v15 }
 0x24a   :  { %3769 = vmatprep.mubr.bf16.mxu0 %v1698_v25 }
 0x24b   :  { %v1700_v44 = vpack.c.bf16 %v1643_v43, %v1642_v42 }
 0x24c   :  { %v1431_v45 = vpop.f32.mrb[28].mxu0 }
 0x24d   :  { %v3855_v46 = vadd.f32 %v5386_v34, %v1431_v45  ;;  %v1433_v47 = vpop.f32.mrb[29].mxu0 }
 0x24e   :  { %v1434_v48 = vpop.f32.mrb[30].mxu0 }
 0x24f   :  { %v3856_v49 = vadd.f32 %v5386_v34, %v1434_v48  ;;  %v1436_v50 = vpop.f32.mrb[31].mxu0  ;;  %v1644_v51 = vmax.f32 %v3855_v46, 0.0 }
 0x251   :  { %v1645_v52 = vmax.f32 %v3856_v49, 0.0  ;;  %3770 = vmatmul.mubr.bf16.gmra.mrb[136].mxu0 %v1699_v35 }
 0x252   :  { %3773 = vmatprep.mubr.bf16.mxu0 %v1700_v44 }
 0x253   :  { %v1701_v53 = vpack.c.bf16 %v1645_v52, %v1644_v51 }
 0x254   :  { %v1439_v54 = vpop.f32.mrb[32].mxu0 }
 0x255   :  { %v3857_v55 = vadd.f32 %v5386_v34, %v1439_v54  ;;  %v1441_v56 = vpop.f32.mrb[33].mxu0 }
 0x256   :  { %v1442_v57 = vpop.f32.mrb[34].mxu0 }
 0x257   :  { %v3858_v58 = vadd.f32 %v5386_v34, %v1442_v57  ;;  %v1444_v59 = vpop.f32.mrb[35].mxu0  ;;  %v1646_v60 = vmax.f32 %v3857_v55, 0.0 }
 0x259   :  { %v1647_v61 = vmax.f32 %v3858_v58, 0.0  ;;  %3774 = vmatmul.mubr.bf16.gmra.mrb[140].mxu0 %v1701_v53 }
 0x25b   :  { %v1702_v62 = vpack.c.bf16 %v1647_v61, %v1646_v60 }
 0x25c   :  { %v1447_v63 = vpop.f32.mrb[36].mxu0 }
 0x25d   :  { %v3859_v1 = vadd.f32 %v5386_v34, %v1447_v63  ;;  %v1449_v2 = vpop.f32.mrb[37].mxu0  ;;  %3777 = vmatprep.mubr.bf16.mxu0 %v1702_v62 }
 0x25e   :  { %v1450_v3 = vpop.f32.mrb[38].mxu0 }
 0x25f   :  { %v3860_v4 = vadd.f32 %v5386_v34, %v1450_v3  ;;  %v1452_v5 = vpop.f32.mrb[39].mxu0  ;;  %v1648_v6 = vmax.f32 %v3859_v1, 0.0 }
 0x261   :  { %v1649_v7 = vmax.f32 %v3860_v4, 0.0 }
 0x263   :  { %v1703_v8 = vpack.c.bf16 %v1649_v7, %v1648_v6 }
 0x264   :  { %v1455_v9 = vpop.f32.mrb[40].mxu0 }
 0x265   :  { %v3861_v10 = vadd.f32 %v5386_v34, %v1455_v9  ;;  %v1457_v11 = vpop.f32.mrb[41].mxu0  ;;  %3778 = vmatmul.mubr.bf16.gmra.mrb[144].mxu0 %v1703_v8 }
 0x266   :  { %v1458_v12 = vpop.f32.mrb[42].mxu0 }
 0x267   :  { %v3862_v13 = vadd.f32 %v5386_v34, %v1458_v12  ;;  %v1460_v14 = vpop.f32.mrb[43].mxu0  ;;  %v1650_v15 = vmax.f32 %v3861_v10, 0.0 }
 0x269   :  { %v1651_v16 = vmax.f32 %v3862_v13, 0.0 }
 0x26b   :  { %v1704_v17 = vpack.c.bf16 %v1651_v16, %v1650_v15 }
 0x26c   :  { %v1463_v18 = vpop.f32.mrb[44].mxu0 }
 0x26d   :  { %v3863_v19 = vadd.f32 %v5386_v34, %v1463_v18  ;;  %v1465_v20 = vpop.f32.mrb[45].mxu0  ;;  %3781 = vmatprep.mubr.bf16.mxu0 %v1704_v17 }
 0x26e   :  { %v1466_v21 = vpop.f32.mrb[46].mxu0 }
 0x26f   :  { %v3864_v22 = vadd.f32 %v5386_v34, %v1466_v21  ;;  %v1468_v23 = vpop.f32.mrb[47].mxu0  ;;  %v1652_v24 = vmax.f32 %v3863_v19, 0.0 }
 0x271   :  { %v1653_v25 = vmax.f32 %v3864_v22, 0.0 }
 0x273   :  { %v1705_v26 = vpack.c.bf16 %v1653_v25, %v1652_v24 }
 0x274   :  { %v1471_v27 = vpop.f32.mrb[48].mxu0 }
 0x275   :  { %v3865_v28 = vadd.f32 %v5386_v34, %v1471_v27  ;;  %v1473_v29 = vpop.f32.mrb[49].mxu0  ;;  %3782 = vmatmul.mubr.bf16.gmra.mrb[148].mxu0 %v1705_v26 }
 0x276   :  { %v1474_v30 = vpop.f32.mrb[50].mxu0 }
 0x277   :  { %v3866_v31 = vadd.f32 %v5386_v34, %v1474_v30  ;;  %v1476_v32 = vpop.f32.mrb[51].mxu0  ;;  %v1654_v33 = vmax.f32 %v3865_v28, 0.0 }
 0x279   :  { %v1655_v35 = vmax.f32 %v3866_v31, 0.0 }
 0x27b   :  { %v1706_v36 = vpack.c.bf16 %v1655_v35, %v1654_v33 }
 0x27c   :  { %v1479_v37 = vpop.f32.mrb[52].mxu0 }
 0x27d   :  { %v3867_v38 = vadd.f32 %v5386_v34, %v1479_v37  ;;  %v1481_v39 = vpop.f32.mrb[53].mxu0  ;;  %3785 = vmatprep.mubr.bf16.mxu1 %v1706_v36 }
 0x27e   :  { %v1482_v40 = vpop.f32.mrb[54].mxu0 }
 0x27f   :  { %v3868_v41 = vadd.f32 %v5386_v34, %v1482_v40  ;;  %v1484_v42 = vpop.f32.mrb[55].mxu0  ;;  %v1656_v43 = vmax.f32 %v3867_v38, 0.0 }
 0x281   :  { %v1657_v44 = vmax.f32 %v3868_v41, 0.0 }
 0x283   :  { %v1707_v45 = vpack.c.bf16 %v1657_v44, %v1656_v43 }
 0x284   :  { %v1487_v46 = vpop.f32.mrb[56].mxu0 }
 0x285   :  { %v3869_v47 = vadd.f32 %v5386_v34, %v1487_v46  ;;  %v1489_v48 = vpop.f32.mrb[57].mxu0  ;;  %3786 = vmatmul.mubr.bf16.vlgmr.msra.gmra.mrb[0].mxu1 %v1707_v45 }
 0x286   :  { %v1490_v49 = vpop.f32.mrb[58].mxu0 }
 0x287   :  { %v3870_v50 = vadd.f32 %v5386_v34, %v1490_v49  ;;  %v1492_v51 = vpop.f32.mrb[59].mxu0  ;;  %v1658_v52 = vmax.f32 %v3869_v47, 0.0 }
 0x289   :  { %v1659_v53 = vmax.f32 %v3870_v50, 0.0 }
 0x28b   :  { %v1708_v54 = vpack.c.bf16 %v1659_v53, %v1658_v52 }
 0x28c   :  { %v1495_v55 = vpop.f32.mrb[60].mxu0 }
 0x28d   :  { %v3871_v56 = vadd.f32 %v5386_v34, %v1495_v55  ;;  %v1497_v57 = vpop.f32.mrb[61].mxu0  ;;  %3789 = vmatprep.mubr.bf16.mxu1 %v1708_v54 }
 0x28e   :  { %v1498_v58 = vpop.f32.mrb[62].mxu0 }
 0x28f   :  { %v3872_v59 = vadd.f32 %v5386_v34, %v1498_v58  ;;  %v1500_v60 = vpop.f32.mrb[63].mxu0  ;;  %v1660_v61 = vmax.f32 %v3871_v56, 0.0 }
 0x291   :  { %v1661_v62 = vmax.f32 %v3872_v59, 0.0 }
 0x293   :  { %v1709_v63 = vpack.c.bf16 %v1661_v62, %v1660_v61 }
 0x294   :  { %v1503_v1 = vpop.f32.mrb[64].mxu0 }
 0x295   :  { %v3873_v2 = vadd.f32 %v5386_v34, %v1503_v1  ;;  %v1505_v3 = vpop.f32.mrb[65].mxu0  ;;  %3790 = vmatmul.mubr.bf16.gmra.mrb[4].mxu1 %v1709_v63 }
 0x296   :  { %v1506_v4 = vpop.f32.mrb[66].mxu0 }
 0x297   :  { %v3874_v5 = vadd.f32 %v5386_v34, %v1506_v4  ;;  %v1508_v6 = vpop.f32.mrb[67].mxu0  ;;  %v1662_v7 = vmax.f32 %v3873_v2, 0.0 }
 0x299   :  { %v1663_v8 = vmax.f32 %v3874_v5, 0.0 }
 0x29b   :  { %v1710_v9 = vpack.c.bf16 %v1663_v8, %v1662_v7 }
 0x29c   :  { %v1511_v10 = vpop.f32.mrb[68].mxu0 }
 0x29d   :  { %v3875_v11 = vadd.f32 %v5386_v34, %v1511_v10  ;;  %v1513_v12 = vpop.f32.mrb[69].mxu0  ;;  %3793 = vmatprep.mubr.bf16.mxu1 %v1710_v9 }
 0x29e   :  { %v1514_v13 = vpop.f32.mrb[70].mxu0 }
 0x29f   :  { %v3876_v14 = vadd.f32 %v5386_v34, %v1514_v13  ;;  %v1516_v15 = vpop.f32.mrb[71].mxu0  ;;  %v1664_v16 = vmax.f32 %v3875_v11, 0.0 }
 0x2a1   :  { %v1665_v17 = vmax.f32 %v3876_v14, 0.0 }
 0x2a3   :  { %v1711_v18 = vpack.c.bf16 %v1665_v17, %v1664_v16 }
 0x2a4   :  { %v1519_v19 = vpop.f32.mrb[72].mxu0 }
 0x2a5   :  { %v3877_v20 = vadd.f32 %v5386_v34, %v1519_v19  ;;  %v1521_v21 = vpop.f32.mrb[73].mxu0  ;;  %3794 = vmatmul.mubr.bf16.gmra.mrb[8].mxu1 %v1711_v18 }
 0x2a6   :  { %v1522_v22 = vpop.f32.mrb[74].mxu0 }
 0x2a7   :  { %v3878_v23 = vadd.f32 %v5386_v34, %v1522_v22  ;;  %v1524_v24 = vpop.f32.mrb[75].mxu0  ;;  %v1666_v25 = vmax.f32 %v3877_v20, 0.0 }
 0x2a9   :  { %v1667_v26 = vmax.f32 %v3878_v23, 0.0 }
 0x2ab   :  { %v1712_v27 = vpack.c.bf16 %v1667_v26, %v1666_v25 }
 0x2ac   :  { %v1527_v28 = vpop.f32.mrb[76].mxu0 }
 0x2ad   :  { %v3879_v29 = vadd.f32 %v5386_v34, %v1527_v28  ;;  %v1529_v30 = vpop.f32.mrb[77].mxu0  ;;  %3797 = vmatprep.mubr.bf16.mxu1 %v1712_v27 }
 0x2ae   :  { %v1530_v31 = vpop.f32.mrb[78].mxu0 }
 0x2af   :  { %v3880_v32 = vadd.f32 %v5386_v34, %v1530_v31  ;;  %v1532_v33 = vpop.f32.mrb[79].mxu0  ;;  %v1668_v35 = vmax.f32 %v3879_v29, 0.0 }
 0x2b1   :  { %v1669_v36 = vmax.f32 %v3880_v32, 0.0 }
 0x2b3   :  { %v1713_v37 = vpack.c.bf16 %v1669_v36, %v1668_v35 }
 0x2b4   :  { %v1535_v38 = vpop.f32.mrb[80].mxu0 }
 0x2b5   :  { %v3881_v39 = vadd.f32 %v5386_v34, %v1535_v38  ;;  %v1537_v40 = vpop.f32.mrb[81].mxu0  ;;  %3798 = vmatmul.mubr.bf16.gmra.mrb[12].mxu1 %v1713_v37 }
 0x2b6   :  { %v1538_v41 = vpop.f32.mrb[82].mxu0 }
 0x2b7   :  { %v3882_v42 = vadd.f32 %v5386_v34, %v1538_v41  ;;  %v1540_v43 = vpop.f32.mrb[83].mxu0  ;;  %v1670_v44 = vmax.f32 %v3881_v39, 0.0 }
 0x2b9   :  { %v1671_v45 = vmax.f32 %v3882_v42, 0.0 }
 0x2bb   :  { %v1714_v46 = vpack.c.bf16 %v1671_v45, %v1670_v44 }
 0x2bc   :  { %v1543_v47 = vpop.f32.mrb[84].mxu0 }
 0x2bd   :  { %v3883_v48 = vadd.f32 %v5386_v34, %v1543_v47  ;;  %v1545_v49 = vpop.f32.mrb[85].mxu0  ;;  %3801 = vmatprep.mubr.bf16.mxu1 %v1714_v46 }
 0x2be   :  { %v1546_v50 = vpop.f32.mrb[86].mxu0 }
 0x2bf   :  { %v3884_v51 = vadd.f32 %v5386_v34, %v1546_v50  ;;  %v1548_v52 = vpop.f32.mrb[87].mxu0  ;;  %v1672_v53 = vmax.f32 %v3883_v48, 0.0 }
 0x2c1   :  { %v1673_v54 = vmax.f32 %v3884_v51, 0.0 }
 0x2c3   :  { %v1715_v55 = vpack.c.bf16 %v1673_v54, %v1672_v53 }
 0x2c4   :  { %v1551_v56 = vpop.f32.mrb[88].mxu0 }
 0x2c5   :  { %v3885_v57 = vadd.f32 %v5386_v34, %v1551_v56  ;;  %v1553_v58 = vpop.f32.mrb[89].mxu0  ;;  %3802 = vmatmul.mubr.bf16.gmra.mrb[16].mxu1 %v1715_v55 }
 0x2c6   :  { %v1554_v59 = vpop.f32.mrb[90].mxu0 }
 0x2c7   :  { %v3886_v60 = vadd.f32 %v5386_v34, %v1554_v59  ;;  %v1556_v61 = vpop.f32.mrb[91].mxu0  ;;  %v1674_v62 = vmax.f32 %v3885_v57, 0.0 }
 0x2c9   :  { %v1675_v63 = vmax.f32 %v3886_v60, 0.0 }
 0x2cb   :  { %v1716_v1 = vpack.c.bf16 %v1675_v63, %v1674_v62 }
 0x2cc   :  { %v1559_v2 = vpop.f32.mrb[92].mxu0 }
 0x2cd   :  { %v3887_v3 = vadd.f32 %v5386_v34, %v1559_v2  ;;  %v1561_v4 = vpop.f32.mrb[93].mxu0  ;;  %3805 = vmatprep.mubr.bf16.mxu1 %v1716_v1 }
 0x2ce   :  { %v1562_v5 = vpop.f32.mrb[94].mxu0 }
 0x2cf   :  { %v3888_v6 = vadd.f32 %v5386_v34, %v1562_v5  ;;  %v1564_v7 = vpop.f32.mrb[95].mxu0  ;;  %v1676_v8 = vmax.f32 %v3887_v3, 0.0 }
 0x2d1   :  { %v1677_v9 = vmax.f32 %v3888_v6, 0.0 }
 0x2d3   :  { %v1717_v10 = vpack.c.bf16 %v1677_v9, %v1676_v8 }
 0x2d4   :  { %v1567_v11 = vpop.f32.mrb[96].mxu0 }
 0x2d5   :  { %v3889_v12 = vadd.f32 %v5386_v34, %v1567_v11  ;;  %v1569_v13 = vpop.f32.mrb[97].mxu0  ;;  %3806 = vmatmul.mubr.bf16.gmra.mrb[20].mxu1 %v1717_v10 }
 0x2d6   :  { %v1570_v14 = vpop.f32.mrb[98].mxu0 }
 0x2d7   :  { %v3890_v15 = vadd.f32 %v5386_v34, %v1570_v14  ;;  %v1572_v16 = vpop.f32.mrb[99].mxu0  ;;  %v1678_v17 = vmax.f32 %v3889_v12, 0.0 }
 0x2d9   :  { %v1679_v18 = vmax.f32 %v3890_v15, 0.0 }
 0x2db   :  { %v1718_v19 = vpack.c.bf16 %v1679_v18, %v1678_v17 }
 0x2dc   :  { %v1575_v20 = vpop.f32.mrb[100].mxu0 }
 0x2dd   :  { %v3891_v21 = vadd.f32 %v5386_v34, %v1575_v20  ;;  %v1577_v22 = vpop.f32.mrb[101].mxu0  ;;  %3809 = vmatprep.mubr.bf16.mxu1 %v1718_v19 }
 0x2de   :  { %v1578_v23 = vpop.f32.mrb[102].mxu0 }
 0x2df   :  { %v3892_v24 = vadd.f32 %v5386_v34, %v1578_v23  ;;  %v1580_v25 = vpop.f32.mrb[103].mxu0  ;;  %v1680_v26 = vmax.f32 %v3891_v21, 0.0 }
 0x2e1   :  { %v1681_v27 = vmax.f32 %v3892_v24, 0.0  ;;  %v4714_v24 = vld [vmem:[%s6927_s0 + $0x4] ss:$16 sps:$4 sm:$0xff]  }
 0x2e3   :  { %v1719_v28 = vpack.c.bf16 %v1681_v27, %v1680_v26 }
 0x2e4   :  { %v1583_v29 = vpop.f32.mrb[104].mxu0 }
 0x2e5   :  { %v3893_v30 = vadd.f32 %v5386_v34, %v1583_v29  ;;  %v1585_v31 = vpop.f32.mrb[105].mxu0  ;;  %3810 = vmatmul.mubr.bf16.gmra.mrb[24].mxu1 %v1719_v28 }
 0x2e6   :  { %v1586_v32 = vpop.f32.mrb[106].mxu0 }
 0x2e7   :  { %v3894_v33 = vadd.f32 %v5386_v34, %v1586_v32  ;;  %v1588_v35 = vpop.f32.mrb[107].mxu0  ;;  %v1682_v36 = vmax.f32 %v3893_v30, 0.0 }
 0x2e9   :  { %v1683_v37 = vmax.f32 %v3894_v33, 0.0 }
 0x2eb   :  { %v1720_v38 = vpack.c.bf16 %v1683_v37, %v1682_v36 }
 0x2ec   :  { %v1591_v39 = vpop.f32.mrb[108].mxu0 }
 0x2ed   :  { %v3895_v40 = vadd.f32 %v5386_v34, %v1591_v39  ;;  %v1593_v41 = vpop.f32.mrb[109].mxu0  ;;  %3813 = vmatprep.mubr.bf16.mxu1 %v1720_v38 }
 0x2ee   :  { %v1594_v42 = vpop.f32.mrb[110].mxu0 }
 0x2ef   :  { %v3896_v43 = vadd.f32 %v5386_v34, %v1594_v42  ;;  %v1596_v44 = vpop.f32.mrb[111].mxu0  ;;  %v1684_v45 = vmax.f32 %v3895_v40, 0.0 }
 0x2f1   :  { %v1685_v46 = vmax.f32 %v3896_v43, 0.0 }
 0x2f3   :  { %v1721_v47 = vpack.c.bf16 %v1685_v46, %v1684_v45 }
 0x2f4   :  { %v1599_v48 = vpop.f32.mrb[112].mxu0 }
 0x2f5   :  { %v3897_v49 = vadd.f32 %v5386_v34, %v1599_v48  ;;  %v1601_v50 = vpop.f32.mrb[113].mxu0  ;;  %3814 = vmatmul.mubr.bf16.gmra.mrb[28].mxu1 %v1721_v47 }
 0x2f6   :  { %v1602_v51 = vpop.f32.mrb[114].mxu0 }
 0x2f7   :  { %v3898_v52 = vadd.f32 %v5386_v34, %v1602_v51  ;;  %v1604_v53 = vpop.f32.mrb[115].mxu0  ;;  %v1686_v54 = vmax.f32 %v3897_v49, 0.0 }
 0x2f9   :  { %v1687_v55 = vmax.f32 %v3898_v52, 0.0 }
 0x2fb   :  { %v1722_v56 = vpack.c.bf16 %v1687_v55, %v1686_v54 }
 0x2fc   :  { %v1607_v57 = vpop.f32.mrb[116].mxu0 }
 0x2fd   :  { %v3899_v58 = vadd.f32 %v5386_v34, %v1607_v57  ;;  %v1609_v59 = vpop.f32.mrb[117].mxu0  ;;  %3817 = vmatprep.mubr.bf16.mxu1 %v1722_v56 }
 0x2fe   :  { %v1610_v60 = vpop.f32.mrb[118].mxu0 }
 0x2ff   :  { %v3900_v61 = vadd.f32 %v5386_v34, %v1610_v60  ;;  %v1612_v62 = vpop.f32.mrb[119].mxu0  ;;  %v1688_v63 = vmax.f32 %v3899_v58, 0.0 }
 0x301   :  { %v1689_v1 = vmax.f32 %v3900_v61, 0.0 }
 0x303   :  { %v1723_v2 = vpack.c.bf16 %v1689_v1, %v1688_v63 }
 0x304   :  { %v1615_v3 = vpop.f32.mrb[120].mxu0 }
 0x305   :  { %v3901_v4 = vadd.f32 %v5386_v34, %v1615_v3  ;;  %v1617_v5 = vpop.f32.mrb[121].mxu0  ;;  %3818 = vmatmul.mubr.bf16.gmra.mrb[32].mxu1 %v1723_v2 }
 0x306   :  { %v1618_v6 = vpop.f32.mrb[122].mxu0 }
 0x307   :  { %v3902_v7 = vadd.f32 %v5386_v34, %v1618_v6  ;;  %v1620_v8 = vpop.f32.mrb[123].mxu0  ;;  %v1690_v9 = vmax.f32 %v3901_v4, 0.0 }
 0x308   :  { %v4716_v8 = vld [vmem:[%s6927_s0 + $0x24] ss:$16 sps:$4 sm:$0xff]  }
 0x309   :  { %v1691_v10 = vmax.f32 %v3902_v7, 0.0  ;;  %v4715_v7 = vld [vmem:[%s6927_s0] ss:$16 sps:$4 sm:$0xff]  }
 0x30b   :  { %v1724_v11 = vpack.c.bf16 %v1691_v10, %v1690_v9 }
 0x30c   :  { %v1623_v12 = vpop.f32.mrb[124].mxu0 }
 0x30d   :  { %v3903_v13 = vadd.f32 %v5386_v34, %v1623_v12  ;;  %v1625_v14 = vpop.f32.mrb[125].mxu0  ;;  %3821 = vmatprep.mubr.bf16.mxu1 %v1724_v11 }
 0x30e   :  { %v1626_v15 = vpop.f32.mrb[126].mxu0 }
 0x30f   :  { %v3904_v16 = vadd.f32 %v5386_v34, %v1626_v15  ;;  %v1628_v17 = vpop.f32.mrb[127].mxu0  ;;  %v1692_v18 = vmax.f32 %v3903_v13, 0.0  ;;  %v4717_v15 = vld [vmem:[%s6927_s0 + $0x20] ss:$16 sps:$4 sm:$0xff]  }
 0x310   :  { %v4719_v17 = vld [vmem:[%s6927_s0 + $0x40] ss:$16 sps:$4 sm:$0xff]  }
 0x311   :  { %v1693_v19 = vmax.f32 %v3904_v16, 0.0  ;;  %v4718_v16 = vld [vmem:[%s6927_s0 + $0x44] ss:$16 sps:$4 sm:$0xff]  }
 0x313   :  { %v1725_v20 = vpack.c.bf16 %v1693_v19, %v1692_v18  ;;  %v4720_v18 = vld [vmem:[%s6927_s0 + $0x64] ss:$16 sps:$4 sm:$0xff]  }
 0x314   :  { %v3763_v21 = vpop.f32.mrb[128].mxu0 }
 0x315   :  { %v1824_v22 = vpop.f32.mrb[129].mxu0  ;;  %3822 = vmatmul.mubr.bf16.gmra.mrb[36].mxu1 %v1725_v20 }
 0x316   :  { %v3764_v23 = vpop.f32.mrb[130].mxu0  ;;  %2150 = vmatprep.mubr.bf16.mxu1 %v4714_v24 }
 0x317   :  { %v2080_v25 = vpack.c.bf16 %v3764_v23, %v3763_v21  ;;  %v1827_v26 = vpop.f32.mrb[131].mxu0 }
 0x318   :  { %v2079_v27 = vpack.c.bf16 %v1827_v26, %v1824_v22  ;;  %v4722_v26 = vld [vmem:[%s6927_s0 + $0x84] ss:$16 sps:$4 sm:$0xff]  }
 0x31a   :  { %2119 = vmatpush1.bf16.msra.mxu1 %v2079_v27  ;;  %v4723_v27 = vld [vmem:[%s6927_s0 + $0x80] ss:$16 sps:$4 sm:$0xff]  }
 0x31b   :  { %2120 = vmatprep.subr.bf16.mxu1 %v4842_v0 }
 0x31c   :  { %v3767_v34 = vpop.f32.mrb[132].mxu0 }
 0x31d   :  { %v1840_v28 = vpop.f32.mrb[133].mxu0 }
 0x31e   :  { %v3768_v29 = vpop.f32.mrb[134].mxu0  ;;  %2121 = vmatpush1.bf16.msra.mxu1 %v2080_v25  ;;  %v4721_v25 = vld [vmem:[%s6927_s0 + $0x60] ss:$16 sps:$4 sm:$0xff]  }
 0x31f   :  { %v2082_v30 = vpack.c.bf16 %v3768_v29, %v3767_v34  ;;  %v1843_v31 = vpop.f32.mrb[135].mxu0  ;;  %2122 = vmatprep.subr.bf16.mxu1 %v4842_v0  ;;  %v4724_v34 = vld [vmem:[%s6927_s0 + $0xa4] ss:$16 sps:$4 sm:$0xff]  }
 0x320   :  { %v2081_v32 = vpack.c.bf16 %v1843_v31, %v1840_v28 }
 0x322   :  { %2123 = vmatpush1.bf16.msra.mxu1 %v2081_v32 }
 0x323   :  { %2124 = vmatprep.subr.bf16.mxu1 %v4842_v0 }
 0x324   :  { %v3771_v33 = vpop.f32.mrb[136].mxu0 }
 0x325   :  { %v1856_v35 = vpop.f32.mrb[137].mxu0 }
 0x326   :  { %v3772_v36 = vpop.f32.mrb[138].mxu0  ;;  %2125 = vmatpush1.bf16.msra.mxu1 %v2082_v30 }
 0x327   :  { %v2084_v37 = vpack.c.bf16 %v3772_v36, %v3771_v33  ;;  %v1859_v38 = vpop.f32.mrb[139].mxu0  ;;  %2126 = vmatprep.subr.bf16.mxu1 %v4842_v0  ;;  %v4726_v36 = vld [vmem:[%s6927_s0 + $0xc4] ss:$16 sps:$4 sm:$0xff]  }
 0x328   :  { %v2083_v39 = vpack.c.bf16 %v1859_v38, %v1856_v35  ;;  %v4725_v35 = vld [vmem:[%s6927_s0 + $0xa0] ss:$16 sps:$4 sm:$0xff]   ;;  %v4728_v38 = vld [vmem:[%s6927_s0 + $0xe4] ss:$16 sps:$4 sm:$0xff]  }
 0x32a   :  { %2127 = vmatpush1.bf16.msra.mxu1 %v2083_v39 }
 0x32b   :  { %2128 = vmatprep.subr.bf16.mxu1 %v4842_v0 }
 0x32c   :  { %v3775_v40 = vpop.f32.mrb[140].mxu0 }
 0x32d   :  { %v1872_v41 = vpop.f32.mrb[141].mxu0 }
 0x32e   :  { %v3776_v42 = vpop.f32.mrb[142].mxu0  ;;  %2129 = vmatpush1.bf16.msra.mxu1 %v2084_v37  ;;  %v4727_v37 = vld [vmem:[%s6927_s0 + $0xc0] ss:$16 sps:$4 sm:$0xff]  }
 0x32f   :  { %v2086_v43 = vpack.c.bf16 %v3776_v42, %v3775_v40  ;;  %v1875_v44 = vpop.f32.mrb[143].mxu0  ;;  %2130 = vmatprep.subr.bf16.mxu1 %v4842_v0 }
 0x330   :  { %v2085_v45 = vpack.c.bf16 %v1875_v44, %v1872_v41 }
 0x332   :  { %2131 = vmatpush1.bf16.msra.mxu1 %v2085_v45  ;;  %v4729_v45 = vld [vmem:[%s6927_s0 + $0xe0] ss:$16 sps:$4 sm:$0xff]  }
 0x333   :  { %2132 = vmatprep.subr.bf16.mxu1 %v4842_v0 }
 0x336   :  { %2133 = vmatpush1.bf16.msra.mxu1 %v2086_v43 }
 0x337   :  { %2134 = vmatprep.subr.bf16.mxu1 %v4842_v0 }
 0x338   :  { %v3779_v46 = vpop.f32.mrb[144].mxu0 }
 0x339   :  { %v1888_v47 = vpop.f32.mrb[145].mxu0 }
 0x33a   :  { %v3780_v48 = vpop.f32.mrb[146].mxu0 }
 0x33b   :  { %v2088_v49 = vpack.c.bf16 %v3780_v48, %v3779_v46  ;;  %v1891_v50 = vpop.f32.mrb[147].mxu0  ;;  %v4730_v46 = vld [vmem:[%s6927_s0 + $0x104] ss:$16 sps:$4 sm:$0xff]  }
 0x33c   :  { %v2087_v51 = vpack.c.bf16 %v1891_v50, %v1888_v47  ;;  %v4731_v47 = vld [vmem:[%s6927_s0 + $0x100] ss:$16 sps:$4 sm:$0xff]   ;;  %v4732_v48 = vld [vmem:[%s6927_s0 + $0x124] ss:$16 sps:$4 sm:$0xff]  }
 0x33e   :  { %2135 = vmatpush1.bf16.msra.mxu1 %v2087_v51 }
 0x33f   :  { %2136 = vmatprep.subr.bf16.mxu1 %v4842_v0 }
 0x342   :  { %2137 = vmatpush1.bf16.msra.mxu1 %v2088_v49 }
 0x343   :  { %2138 = vmatprep.subr.bf16.mxu1 %v4842_v0 }
 0x348   :  { %v3783_v52 = vpop.f32.mrb[148].mxu0 }
 0x349   :  { %v1904_v53 = vpop.f32.mrb[149].mxu0 }
 0x34a   :  { %v3784_v54 = vpop.f32.mrb[150].mxu0 }
 0x34b   :  { %v2090_v55 = vpack.c.bf16 %v3784_v54, %v3783_v52  ;;  %v1907_v56 = vpop.f32.mrb[151].mxu0 }
 0x34c   :  { %v2089_v57 = vpack.c.bf16 %v1907_v56, %v1904_v53  ;;  %v4734_v56 = vld [vmem:[%s6927_s0 + $0x144] ss:$16 sps:$4 sm:$0xff]  }
 0x34e   :  { %2139 = vmatpush1.bf16.msra.mxu1 %v2089_v57  ;;  %v4735_v57 = vld [vmem:[%s6927_s0 + $0x140] ss:$16 sps:$4 sm:$0xff]  }
 0x34f   :  { %2140 = vmatprep.subr.bf16.mxu1 %v4842_v0 }
 0x352   :  { %2141 = vmatpush1.bf16.msra.mxu1 %v2090_v55  ;;  %v4733_v55 = vld [vmem:[%s6927_s0 + $0x120] ss:$16 sps:$4 sm:$0xff]  }
 0x353   :  { %2142 = vmatprep.subr.bf16.mxu1 %v4842_v0 }
 0x358   :  { %v3787_v58 = vpop.f32.mrb[0].mxu1 }
 0x359   :  { %v1920_v59 = vpop.f32.mrb[1].mxu1 }
 0x35a   :  { %v3788_v60 = vpop.f32.mrb[2].mxu1 }
 0x35b   :  { %v2092_v61 = vpack.c.bf16 %v3788_v60, %v3787_v58  ;;  %v1923_v62 = vpop.f32.mrb[3].mxu1  ;;  %v4736_v58 = vld [vmem:[%s6927_s0 + $0x164] ss:$16 sps:$4 sm:$0xff]  }
 0x35c   :  { %v2091_v63 = vpack.c.bf16 %v1923_v62, %v1920_v59 }
 0x35e   :  { %2143 = vmatpush1.bf16.msra.mxu1 %v2091_v63 }
 0x35f   :  { %2144 = vmatprep.subr.bf16.mxu1 %v4842_v0 }
 0x362   :  { %2145 = vmatpush1.bf16.msra.mxu1 %v2092_v61 }
 0x363   :  { %2146 = vmatprep.subr.bf16.mxu1 %v4842_v0 }
 0x368   :  { %v3791_v1 = vpop.f32.mrb[4].mxu1 }
 0x369   :  { %v1936_v2 = vpop.f32.mrb[5].mxu1 }
 0x36a   :  { %v3792_v3 = vpop.f32.mrb[6].mxu1 }
 0x36b   :  { %v2094_v4 = vpack.c.bf16 %v3792_v3, %v3791_v1  ;;  %v1939_v5 = vpop.f32.mrb[7].mxu1  ;;  %v4738_v3 = vld [vmem:[%s6927_s0 + $0x184] ss:$16 sps:$4 sm:$0xff]  }
 0x36c   :  { %v2093_v6 = vpack.c.bf16 %v1939_v5, %v1936_v2  ;;  %v4737_v2 = vld [vmem:[%s6927_s0 + $0x160] ss:$16 sps:$4 sm:$0xff]   ;;  %v4740_v5 = vld [vmem:[%s6927_s0 + $0x1a4] ss:$16 sps:$4 sm:$0xff]  }
 0x36e   :  { %2147 = vmatpush1.bf16.msra.mxu1 %v2093_v6 }
 0x36f   :  { %2148 = vmatprep.subr.bf16.mxu1 %v4842_v0 }
 0x372   :  { %2149 = vmatpush1.bf16.msra.mxu1 %v2094_v4  ;;  %v4739_v4 = vld [vmem:[%s6927_s0 + $0x180] ss:$16 sps:$4 sm:$0xff]  }
 0x373   :  { %2407 = vmatprep.subr.bf16.mxu1 %v4842_v0 }
 0x375   :  { %2151 = vmatmul.mubr.bf16.vlgmr.msra.gmra.mrb[40].mxu1 %v4715_v7 }
 0x376   :  { %2158 = vmatprep.mubr.bf16.mxu1 %v4716_v8 }
 0x378   :  { %v3795_v9 = vpop.f32.mrb[8].mxu1 }
 0x379   :  { %v1952_v10 = vpop.f32.mrb[9].mxu1 }
 0x37a   :  { %v3796_v11 = vpop.f32.mrb[10].mxu1 }
 0x37b   :  { %v2096_v12 = vpack.c.bf16 %v3796_v11, %v3795_v9  ;;  %v1955_v13 = vpop.f32.mrb[11].mxu1 }
 0x37c   :  { %v2095_v14 = vpack.c.bf16 %v1955_v13, %v1952_v10  ;;  %v4742_v13 = vld [vmem:[%s6927_s0 + $0x1c4] ss:$16 sps:$4 sm:$0xff]  }
 0x37d   :  { %2159 = vmatmul.mubr.bf16.gmra.mrb[44].mxu1 %v4717_v15  ;;  %v4744_v15 = vld [vmem:[%s6927_s0 + $0x1e4] ss:$16 sps:$4 sm:$0xff]  }
 0x37e   :  { %2408 = vmatpush1.bf16.msra.mxu1 %v2095_v14  ;;  %2166 = vmatprep.mubr.bf16.mxu1 %v4718_v16  ;;  %v4743_v14 = vld [vmem:[%s6927_s0 + $0x1c0] ss:$16 sps:$4 sm:$0xff]  }
 0x37f   :  { %2409 = vmatprep.subr.bf16.mxu1 %v4842_v0 }
 0x382   :  { %2410 = vmatpush1.bf16.msra.mxu1 %v2096_v12  ;;  %v4741_v12 = vld [vmem:[%s6927_s0 + $0x1a0] ss:$16 sps:$4 sm:$0xff]  }
 0x383   :  { %2411 = vmatprep.subr.bf16.mxu1 %v4842_v0 }
 0x385   :  { %2167 = vmatmul.mubr.bf16.gmra.mrb[48].mxu1 %v4719_v17 }
 0x386   :  { %2174 = vmatprep.mubr.bf16.mxu1 %v4720_v18 }
 0x388   :  { %v3799_v19 = vpop.f32.mrb[12].mxu1 }
 0x389   :  { %v1968_v20 = vpop.f32.mrb[13].mxu1 }
 0x38a   :  { %v3800_v21 = vpop.f32.mrb[14].mxu1 }
 0x38b   :  { %v2098_v22 = vpack.c.bf16 %v3800_v21, %v3799_v19  ;;  %v1971_v23 = vpop.f32.mrb[15].mxu1 }
 0x38c   :  { %v2097_v24 = vpack.c.bf16 %v1971_v23, %v1968_v20  ;;  %v4746_v23 = vld [vmem:[%s6927_s0 + $0x204] ss:$16 sps:$4 sm:$0xff]  }
 0x38d   :  { %2175 = vmatmul.mubr.bf16.gmra.mrb[52].mxu1 %v4721_v25  ;;  %v4748_v25 = vld [vmem:[%s6927_s0 + $0x224] ss:$16 sps:$4 sm:$0xff]  }
 0x38e   :  { %2412 = vmatpush1.bf16.msra.mxu1 %v2097_v24  ;;  %2182 = vmatprep.mubr.bf16.mxu1 %v4722_v26  ;;  %v4747_v24 = vld [vmem:[%s6927_s0 + $0x200] ss:$16 sps:$4 sm:$0xff]  }
 0x38f   :  { %2413 = vmatprep.subr.bf16.mxu1 %v4842_v0  ;;  %v4749_v26 = vld [vmem:[%s6927_s0 + $0x220] ss:$16 sps:$4 sm:$0xff]  }
 0x392   :  { %2414 = vmatpush1.bf16.msra.mxu1 %v2098_v22  ;;  %v4745_v22 = vld [vmem:[%s6927_s0 + $0x1e0] ss:$16 sps:$4 sm:$0xff]  }
 0x393   :  { %2415 = vmatprep.subr.bf16.mxu1 %v4842_v0 }
 0x395   :  { %2183 = vmatmul.mubr.bf16.gmra.mrb[56].mxu1 %v4723_v27  ;;  %v4751_v27 = vld [vmem:[%s6927_s0 + $0x240] ss:$16 sps:$4 sm:$0xff]  }
 0x396   :  { %2190 = vmatprep.mubr.bf16.mxu1 %v4724_v34  ;;  %v4752_v34 = vld [vmem:[%s6927_s0 + $0x264] ss:$16 sps:$4 sm:$0xff]  }
 0x398   :  { %v3803_v28 = vpop.f32.mrb[16].mxu1 }
 0x399   :  { %v1984_v29 = vpop.f32.mrb[17].mxu1 }
 0x39a   :  { %v3804_v30 = vpop.f32.mrb[18].mxu1 }
 0x39b   :  { %v2100_v31 = vpack.c.bf16 %v3804_v30, %v3803_v28  ;;  %v1987_v32 = vpop.f32.mrb[19].mxu1  ;;  %v4753_v28 = vld [vmem:[%s6927_s0 + $0x260] ss:$16 sps:$4 sm:$0xff]  }
 0x39c   :  { %v2099_v33 = vpack.c.bf16 %v1987_v32, %v1984_v29  ;;  %v4754_v29 = vld [vmem:[%s6927_s0 + $0x284] ss:$16 sps:$4 sm:$0xff]   ;;  %v4755_v30 = vld [vmem:[%s6927_s0 + $0x280] ss:$16 sps:$4 sm:$0xff]  }
 0x39d   :  { %2191 = vmatmul.mubr.bf16.gmra.mrb[60].mxu1 %v4725_v35  ;;  %v4757_v32 = vld [vmem:[%s6927_s0 + $0x2a0] ss:$16 sps:$4 sm:$0xff]  }
 0x39e   :  { %2416 = vmatpush1.bf16.msra.mxu1 %v2099_v33  ;;  %2198 = vmatprep.mubr.bf16.mxu1 %v4726_v36  ;;  %v4758_v33 = vld [vmem:[%s6927_s0 + $0x2c4] ss:$16 sps:$4 sm:$0xff]   ;;  %v4759_v35 = vld [vmem:[%s6927_s0 + $0x2c0] ss:$16 sps:$4 sm:$0xff]  }
 0x39f   :  { %2417 = vmatprep.subr.bf16.mxu1 %v4842_v0  ;;  %v4760_v36 = vld [vmem:[%s6927_s0 + $0x2e4] ss:$16 sps:$4 sm:$0xff]  }
 0x3a2   :  { %2418 = vmatpush1.bf16.msra.mxu1 %v2100_v31  ;;  %v4756_v31 = vld [vmem:[%s6927_s0 + $0x2a4] ss:$16 sps:$4 sm:$0xff]  }
 0x3a3   :  { %2419 = vmatprep.subr.bf16.mxu1 %v4842_v0 }
 0x3a5   :  { %2199 = vmatmul.mubr.bf16.gmra.mrb[64].mxu1 %v4727_v37  ;;  %v4761_v37 = vld [vmem:[%s6927_s0 + $0x2e0] ss:$16 sps:$4 sm:$0xff]  }
 0x3a6   :  { %2206 = vmatprep.mubr.bf16.mxu1 %v4728_v38  ;;  %v4762_v38 = vld [vmem:[%s6927_s0 + $0x304] ss:$16 sps:$4 sm:$0xff]  }
 0x3a8   :  { %v3807_v39 = vpop.f32.mrb[20].mxu1 }
 0x3a9   :  { %v2000_v40 = vpop.f32.mrb[21].mxu1 }
 0x3aa   :  { %v3808_v41 = vpop.f32.mrb[22].mxu1 }
 0x3ab   :  { %v2102_v42 = vpack.c.bf16 %v3808_v41, %v3807_v39  ;;  %v2003_v43 = vpop.f32.mrb[23].mxu1  ;;  %v4763_v39 = vld [vmem:[%s6927_s0 + $0x300] ss:$16 sps:$4 sm:$0xff]  }
 0x3ac   :  { %v2101_v44 = vpack.c.bf16 %v2003_v43, %v2000_v40  ;;  %v4764_v40 = vld [vmem:[%s6927_s0 + $0x324] ss:$16 sps:$4 sm:$0xff]   ;;  %v4765_v41 = vld [vmem:[%s6927_s0 + $0x320] ss:$16 sps:$4 sm:$0xff]  }
 0x3ad   :  { %2207 = vmatmul.mubr.bf16.gmra.mrb[68].mxu1 %v4729_v45  ;;  %v4767_v43 = vld [vmem:[%s6927_s0 + $0x340] ss:$16 sps:$4 sm:$0xff]  }
 0x3ae   :  { %2420 = vmatpush1.bf16.msra.mxu1 %v2101_v44  ;;  %2214 = vmatprep.mubr.bf16.mxu1 %v4730_v46  ;;  %v4768_v44 = vld [vmem:[%s6927_s0 + $0x364] ss:$16 sps:$4 sm:$0xff]   ;;  %v4769_v45 = vld [vmem:[%s6927_s0 + $0x360] ss:$16 sps:$4 sm:$0xff]  }
 0x3af   :  { %2421 = vmatprep.subr.bf16.mxu1 %v4842_v0  ;;  %v4770_v46 = vld [vmem:[%s6927_s0 + $0x384] ss:$16 sps:$4 sm:$0xff]  }
 0x3b2   :  { %2422 = vmatpush1.bf16.msra.mxu1 %v2102_v42  ;;  %v4766_v42 = vld [vmem:[%s6927_s0 + $0x344] ss:$16 sps:$4 sm:$0xff]  }
 0x3b3   :  { %2423 = vmatprep.subr.bf16.mxu1 %v4842_v0 }
 0x3b5   :  { %2215 = vmatmul.mubr.bf16.gmra.mrb[72].mxu1 %v4731_v47  ;;  %v4771_v47 = vld [vmem:[%s6927_s0 + $0x380] ss:$16 sps:$4 sm:$0xff]  }
 0x3b6   :  { %2222 = vmatprep.mubr.bf16.mxu1 %v4732_v48  ;;  %v4772_v48 = vld [vmem:[%s6927_s0 + $0x3a4] ss:$16 sps:$4 sm:$0xff]  }
 0x3b8   :  { %v3811_v49 = vpop.f32.mrb[24].mxu1 }
 0x3b9   :  { %v2016_v50 = vpop.f32.mrb[25].mxu1 }
 0x3ba   :  { %v3812_v51 = vpop.f32.mrb[26].mxu1 }
 0x3bb   :  { %v2104_v52 = vpack.c.bf16 %v3812_v51, %v3811_v49  ;;  %v2019_v53 = vpop.f32.mrb[27].mxu1  ;;  %v4773_v49 = vld [vmem:[%s6927_s0 + $0x3a0] ss:$16 sps:$4 sm:$0xff]  }
 0x3bc   :  { %v2103_v54 = vpack.c.bf16 %v2019_v53, %v2016_v50  ;;  %v4774_v50 = vld [vmem:[%s6927_s0 + $0x3c4] ss:$16 sps:$4 sm:$0xff]   ;;  %v4775_v51 = vld [vmem:[%s6927_s0 + $0x3c0] ss:$16 sps:$4 sm:$0xff]  }
 0x3bd   :  { %2223 = vmatmul.mubr.bf16.gmra.mrb[76].mxu1 %v4733_v55  ;;  %v4777_v53 = vld [vmem:[%s6927_s0 + $0x3e0] ss:$16 sps:$4 sm:$0xff]   ;;  %v4779_v55 = vld [vmem:[%s6927_s0 + $0x8] ss:$16 sps:$4 sm:$0xff]  }
 0x3be   :  { %2424 = vmatpush1.bf16.msra.mxu1 %v2103_v54  ;;  %2230 = vmatprep.mubr.bf16.mxu1 %v4734_v56  ;;  %v4778_v54 = vld [vmem:[%s6927_s0 + $0xc] ss:$16 sps:$4 sm:$0xff]  }
 0x3bf   :  { %2425 = vmatprep.subr.bf16.mxu1 %v4842_v0  ;;  %v4780_v56 = vld [vmem:[%s6927_s0 + $0x2c] ss:$16 sps:$4 sm:$0xff]  }
 0x3c2   :  { %2426 = vmatpush1.bf16.msra.mxu1 %v2104_v52  ;;  %v4776_v52 = vld [vmem:[%s6927_s0 + $0x3e4] ss:$16 sps:$4 sm:$0xff]  }
 0x3c3   :  { %2427 = vmatprep.subr.bf16.mxu1 %v4842_v0 }
 0x3c5   :  { %2231 = vmatmul.mubr.bf16.gmra.mrb[80].mxu1 %v4735_v57  ;;  %v4781_v57 = vld [vmem:[%s6927_s0 + $0x28] ss:$16 sps:$4 sm:$0xff]  }
 0x3c6   :  { %2238 = vmatprep.mubr.bf16.mxu1 %v4736_v58  ;;  %v4782_v58 = vld [vmem:[%s6927_s0 + $0x4c] ss:$16 sps:$4 sm:$0xff]  }
 0x3c8   :  { %v3815_v59 = vpop.f32.mrb[28].mxu1 }
 0x3c9   :  { %v2032_v60 = vpop.f32.mrb[29].mxu1 }
 0x3ca   :  { %v3816_v61 = vpop.f32.mrb[30].mxu1 }
 0x3cb   :  { %v2106_v62 = vpack.c.bf16 %v3816_v61, %v3815_v59  ;;  %v2035_v63 = vpop.f32.mrb[31].mxu1  ;;  %v4783_v59 = vld [vmem:[%s6927_s0 + $0x48] ss:$16 sps:$4 sm:$0xff]  }
 0x3cc   :  { %v2105_v1 = vpack.c.bf16 %v2035_v63, %v2032_v60  ;;  %v4784_v60 = vld [vmem:[%s6927_s0 + $0x6c] ss:$16 sps:$4 sm:$0xff]   ;;  %v4785_v61 = vld [vmem:[%s6927_s0 + $0x68] ss:$16 sps:$4 sm:$0xff]  }
 0x3cd   :  { %2239 = vmatmul.mubr.bf16.gmra.mrb[84].mxu1 %v4737_v2  ;;  %v4787_v63 = vld [vmem:[%s6927_s0 + $0x88] ss:$16 sps:$4 sm:$0xff]  }
 0x3ce   :  { %2428 = vmatpush1.bf16.msra.mxu1 %v2105_v1  ;;  %2246 = vmatprep.mubr.bf16.mxu1 %v4738_v3  ;;  %v4788_v1 = vld [vmem:[%s6927_s0 + $0xac] ss:$16 sps:$4 sm:$0xff]   ;;  %v4789_v2 = vld [vmem:[%s6927_s0 + $0xa8] ss:$16 sps:$4 sm:$0xff]  }
 0x3cf   :  { %2429 = vmatprep.subr.bf16.mxu1 %v4842_v0  ;;  %v4790_v3 = vld [vmem:[%s6927_s0 + $0xcc] ss:$16 sps:$4 sm:$0xff]  }
 0x3d2   :  { %2430 = vmatpush1.bf16.msra.mxu1 %v2106_v62  ;;  %v4786_v62 = vld [vmem:[%s6927_s0 + $0x8c] ss:$16 sps:$4 sm:$0xff]  }
 0x3d3   :  { %2431 = vmatprep.subr.bf16.mxu1 %v4842_v0 }
 0x3d5   :  { %2247 = vmatmul.mubr.bf16.gmra.mrb[88].mxu1 %v4739_v4  ;;  %v4791_v4 = vld [vmem:[%s6927_s0 + $0xc8] ss:$16 sps:$4 sm:$0xff]  }
 0x3d6   :  { %2254 = vmatprep.mubr.bf16.mxu1 %v4740_v5  ;;  %v4792_v5 = vld [vmem:[%s6927_s0 + $0xec] ss:$16 sps:$4 sm:$0xff]  }
 0x3d8   :  { %v3819_v6 = vpop.f32.mrb[32].mxu1 }
 0x3d9   :  { %v2048_v7 = vpop.f32.mrb[33].mxu1 }
 0x3da   :  { %v3820_v8 = vpop.f32.mrb[34].mxu1 }
 0x3db   :  { %v2108_v9 = vpack.c.bf16 %v3820_v8, %v3819_v6  ;;  %v2051_v10 = vpop.f32.mrb[35].mxu1  ;;  %v4793_v6 = vld [vmem:[%s6927_s0 + $0xe8] ss:$16 sps:$4 sm:$0xff]  }
 0x3dc   :  { %v2107_v11 = vpack.c.bf16 %v2051_v10, %v2048_v7  ;;  %v4794_v7 = vld [vmem:[%s6927_s0 + $0x10c] ss:$16 sps:$4 sm:$0xff]   ;;  %v4795_v8 = vld [vmem:[%s6927_s0 + $0x108] ss:$16 sps:$4 sm:$0xff]  }
 0x3dd   :  { %2255 = vmatmul.mubr.bf16.gmra.mrb[92].mxu1 %v4741_v12  ;;  %v4797_v10 = vld [vmem:[%s6927_s0 + $0x128] ss:$16 sps:$4 sm:$0xff]  }
 0x3de   :  { %2432 = vmatpush1.bf16.msra.mxu1 %v2107_v11  ;;  %2262 = vmatprep.mubr.bf16.mxu1 %v4742_v13  ;;  %v4798_v11 = vld [vmem:[%s6927_s0 + $0x14c] ss:$16 sps:$4 sm:$0xff]   ;;  %v4799_v12 = vld [vmem:[%s6927_s0 + $0x148] ss:$16 sps:$4 sm:$0xff]  }
 0x3df   :  { %2433 = vmatprep.subr.bf16.mxu1 %v4842_v0  ;;  %v4800_v13 = vld [vmem:[%s6927_s0 + $0x16c] ss:$16 sps:$4 sm:$0xff]  }
 0x3e2   :  { %2434 = vmatpush1.bf16.msra.mxu1 %v2108_v9  ;;  %v4796_v9 = vld [vmem:[%s6927_s0 + $0x12c] ss:$16 sps:$4 sm:$0xff]  }
 0x3e3   :  { %2435 = vmatprep.subr.bf16.mxu1 %v4842_v0 }
 0x3e5   :  { %2263 = vmatmul.mubr.bf16.gmra.mrb[96].mxu1 %v4743_v14  ;;  %v4801_v14 = vld [vmem:[%s6927_s0 + $0x168] ss:$16 sps:$4 sm:$0xff]  }
 0x3e6   :  { %2270 = vmatprep.mubr.bf16.mxu1 %v4744_v15  ;;  %v4802_v15 = vld [vmem:[%s6927_s0 + $0x18c] ss:$16 sps:$4 sm:$0xff]  }
 0x3e8   :  { %v3823_v16 = vpop.f32.mrb[36].mxu1 }
 0x3e9   :  { %v2064_v17 = vpop.f32.mrb[37].mxu1 }
 0x3ea   :  { %v3824_v18 = vpop.f32.mrb[38].mxu1 }
 0x3eb   :  { %v2110_v19 = vpack.c.bf16 %v3824_v18, %v3823_v16  ;;  %v2067_v20 = vpop.f32.mrb[39].mxu1  ;;  %v4803_v16 = vld [vmem:[%s6927_s0 + $0x188] ss:$16 sps:$4 sm:$0xff]  }
 0x3ec   :  { %v2109_v21 = vpack.c.bf16 %v2067_v20, %v2064_v17  ;;  %v4804_v17 = vld [vmem:[%s6927_s0 + $0x1ac] ss:$16 sps:$4 sm:$0xff]   ;;  %v4805_v18 = vld [vmem:[%s6927_s0 + $0x1a8] ss:$16 sps:$4 sm:$0xff]  }
 0x3ed   :  { %2271 = vmatmul.mubr.bf16.gmra.mrb[100].mxu1 %v4745_v22  ;;  %v4807_v20 = vld [vmem:[%s6927_s0 + $0x1c8] ss:$16 sps:$4 sm:$0xff]  }
 0x3ee   :  { %2436 = vmatpush1.bf16.msra.mxu1 %v2109_v21  ;;  %2278 = vmatprep.mubr.bf16.mxu1 %v4746_v23  ;;  %v4808_v21 = vld [vmem:[%s6927_s0 + $0x1ec] ss:$16 sps:$4 sm:$0xff]   ;;  %v4809_v22 = vld [vmem:[%s6927_s0 + $0x1e8] ss:$16 sps:$4 sm:$0xff]  }
 0x3ef   :  { %2437 = vmatprep.subr.bf16.mxu1 %v4842_v0  ;;  %v4750_v0 = vld [vmem:[%s6927_s0 + $0x244] ss:$16 sps:$4 sm:$0xff]   ;;  %v4810_v23 = vld [vmem:[%s6927_s0 + $0x20c] ss:$16 sps:$4 sm:$0xff]  }
 0x3f2   :  { %2438 = vmatpush1.bf16.msra.mxu1 %v2110_v19  ;;  %v4806_v19 = vld [vmem:[%s6927_s0 + $0x1cc] ss:$16 sps:$4 sm:$0xff]  }
 0x3f5   :  { %2279 = vmatmul.mubr.bf16.gmra.mrb[104].mxu1 %v4747_v24  ;;  %v4811_v24 = vld [vmem:[%s6927_s0 + $0x208] ss:$16 sps:$4 sm:$0xff]  }
 0x3f6   :  { %2286 = vmatprep.mubr.bf16.mxu1 %v4748_v25  ;;  %v4812_v25 = vld [vmem:[%s6927_s0 + $0x22c] ss:$16 sps:$4 sm:$0xff]  }
 0x3fd   :  { %2287 = vmatmul.mubr.bf16.gmra.mrb[108].mxu1 %v4749_v26  ;;  %v4813_v26 = vld [vmem:[%s6927_s0 + $0x228] ss:$16 sps:$4 sm:$0xff]  }
 0x3fe   :  { %2294 = vmatprep.mubr.bf16.mxu1 %v4750_v0  ;;  %v4814_v0 = vld [vmem:[%s6927_s0 + $0x24c] ss:$16 sps:$4 sm:$0xff]  }
 0x405   :  { %2295 = vmatmul.mubr.bf16.gmra.mrb[112].mxu1 %v4751_v27  ;;  %v4815_v27 = vld [vmem:[%s6927_s0 + $0x248] ss:$16 sps:$4 sm:$0xff]  }
 0x406   :  { %2302 = vmatprep.mubr.bf16.mxu1 %v4752_v34  ;;  %v4816_v34 = vld [vmem:[%s6927_s0 + $0x26c] ss:$16 sps:$4 sm:$0xff]  }
 0x40d   :  { %2303 = vmatmul.mubr.bf16.gmra.mrb[116].mxu1 %v4753_v28  ;;  %v4817_v28 = vld [vmem:[%s6927_s0 + $0x268] ss:$16 sps:$4 sm:$0xff]  }
 0x40e   :  { %2310 = vmatprep.mubr.bf16.mxu1 %v4754_v29  ;;  %v4818_v29 = vld [vmem:[%s6927_s0 + $0x28c] ss:$16 sps:$4 sm:$0xff]  }
 0x415   :  { %2311 = vmatmul.mubr.bf16.gmra.mrb[120].mxu1 %v4755_v30  ;;  %v4819_v30 = vld [vmem:[%s6927_s0 + $0x288] ss:$16 sps:$4 sm:$0xff]  }
 0x416   :  { %2318 = vmatprep.mubr.bf16.mxu1 %v4756_v31  ;;  %v4820_v31 = vld [vmem:[%s6927_s0 + $0x2ac] ss:$16 sps:$4 sm:$0xff]  }
 0x41d   :  { %2319 = vmatmul.mubr.bf16.gmra.mrb[124].mxu1 %v4757_v32  ;;  %v4821_v32 = vld [vmem:[%s6927_s0 + $0x2a8] ss:$16 sps:$4 sm:$0xff]  }
 0x41e   :  { %2326 = vmatprep.mubr.bf16.mxu1 %v4758_v33  ;;  %v4822_v33 = vld [vmem:[%s6927_s0 + $0x2cc] ss:$16 sps:$4 sm:$0xff]  }
 0x425   :  { %2327 = vmatmul.mubr.bf16.gmra.mrb[128].mxu1 %v4759_v35  ;;  %v4823_v35 = vld [vmem:[%s6927_s0 + $0x2c8] ss:$16 sps:$4 sm:$0xff]  }
 0x426   :  { %2334 = vmatprep.mubr.bf16.mxu1 %v4760_v36  ;;  %v4824_v36 = vld [vmem:[%s6927_s0 + $0x2ec] ss:$16 sps:$4 sm:$0xff]  }
 0x42d   :  { %2335 = vmatmul.mubr.bf16.gmra.mrb[132].mxu1 %v4761_v37  ;;  %v4825_v37 = vld [vmem:[%s6927_s0 + $0x2e8] ss:$16 sps:$4 sm:$0xff]  }
 0x42e   :  { %2342 = vmatprep.mubr.bf16.mxu1 %v4762_v38  ;;  %v4826_v38 = vld [vmem:[%s6927_s0 + $0x30c] ss:$16 sps:$4 sm:$0xff]  }
 0x435   :  { %2343 = vmatmul.mubr.bf16.gmra.mrb[136].mxu1 %v4763_v39  ;;  %v4827_v39 = vld [vmem:[%s6927_s0 + $0x308] ss:$16 sps:$4 sm:$0xff]  }
 0x436   :  { %2350 = vmatprep.mubr.bf16.mxu1 %v4764_v40  ;;  %v4828_v40 = vld [vmem:[%s6927_s0 + $0x32c] ss:$16 sps:$4 sm:$0xff]  }
 0x43d   :  { %2351 = vmatmul.mubr.bf16.gmra.mrb[140].mxu1 %v4765_v41  ;;  %v4829_v41 = vld [vmem:[%s6927_s0 + $0x328] ss:$16 sps:$4 sm:$0xff]  }
 0x43e   :  { %2358 = vmatprep.mubr.bf16.mxu1 %v4766_v42  ;;  %v4830_v42 = vld [vmem:[%s6927_s0 + $0x34c] ss:$16 sps:$4 sm:$0xff]  }
 0x445   :  { %2359 = vmatmul.mubr.bf16.gmra.mrb[144].mxu1 %v4767_v43  ;;  %v2696_v43 = vlaneseq }
 0x446   :  { %2366 = vmatprep.mubr.bf16.mxu1 %v4768_v44 }
 0x447   :  { %v5861_v44 = vand.u32 127, %v2696_v43 }
 0x449   :  { %vm2698_vm0 = vcmp.lt.s32.totalorder %v5861_v44, 4 }
 0x44d   :  { %2367 = vmatmul.mubr.bf16.gmra.mrb[148].mxu1 %v4769_v45  ;;  %v4831_v45 = vld [vmem:[%s6927_s0 + $0x348] ss:$16 sps:$4 sm:$0xff]  }
 0x44e   :  { %2374 = vmatprep.mubr.bf16.mxu1 %v4770_v46  ;;  %v5869_v46 = vld [vmem:[%s6930_s4] ss:$0 sm:$0xff] }
 0x455   :  { %2375 = vmatmul.mubr.bf16.gmra.mrb[152].mxu1 %v4771_v47  ;;  %v4832_v47 = vld [vmem:[%s6927_s0 + $0x36c] ss:$16 sps:$4 sm:$0xff]  }
 0x456   :  { %2382 = vmatprep.mubr.bf16.mxu1 %v4772_v48 }
 0x45d   :  { %2383 = vmatmul.mubr.bf16.gmra.mrb[156].mxu1 %v4773_v49 }
 0x45e   :  { %2390 = vmatprep.mubr.bf16.mxu1 %v4774_v50 }
 0x465   :  { %2391 = vmatmul.mubr.bf16.gmra.mrb[160].mxu1 %v4775_v51 }
 0x466   :  { %2398 = vmatprep.mubr.bf16.mxu1 %v4776_v52 }
 0x46d   :  { %2399 = vmatmul.mubr.bf16.gmra.mrb[164].mxu1 %v4777_v53 }
 0x46e   :  { %2439 = vmatprep.mubr.bf16.mxu1 %v4778_v54 }
 0x475   :  { %2440 = vmatmul.mubr.bf16.vlgmr.msra.gmra.mrb[40].mxu1 %v4779_v55  ;;  %v4833_v55 = vld [vmem:[%s6927_s0 + $0x368] ss:$16 sps:$4 sm:$0xff]  }
 0x476   :  { %2447 = vmatprep.mubr.bf16.mxu1 %v4780_v56  ;;  %v4834_v56 = vld [vmem:[%s6927_s0 + $0x38c] ss:$16 sps:$4 sm:$0xff]  }
 0x47d   :  { %2448 = vmatmul.mubr.bf16.gmra.mrb[44].mxu1 %v4781_v57 }
 0x47e   :  { %2455 = vmatprep.mubr.bf16.mxu1 %v4782_v58 }
 0x485   :  { %2456 = vmatmul.mubr.bf16.gmra.mrb[48].mxu1 %v4783_v59 }
 0x486   :  { %2463 = vmatprep.mubr.bf16.mxu1 %v4784_v60 }
 0x48d   :  { %2464 = vmatmul.mubr.bf16.gmra.mrb[52].mxu1 %v4785_v61 }
 0x48e   :  { %2471 = vmatprep.mubr.bf16.mxu1 %v4786_v62 }
 0x495   :  { %2472 = vmatmul.mubr.bf16.gmra.mrb[56].mxu1 %v4787_v63 }
 0x496   :  { %2479 = vmatprep.mubr.bf16.mxu1 %v4788_v1 }
 0x49d   :  { %2480 = vmatmul.mubr.bf16.gmra.mrb[60].mxu1 %v4789_v2  ;;  %v4835_v2 = vld [vmem:[%s6927_s0 + $0x388] ss:$16 sps:$4 sm:$0xff]  }
 0x49e   :  { %2487 = vmatprep.mubr.bf16.mxu1 %v4790_v3  ;;  %v4836_v3 = vld [vmem:[%s6927_s0 + $0x3ac] ss:$16 sps:$4 sm:$0xff]  }
 0x4a5   :  { %2488 = vmatmul.mubr.bf16.gmra.mrb[64].mxu1 %v4791_v4 }
 0x4a6   :  { %2495 = vmatprep.mubr.bf16.mxu1 %v4792_v5 }
 0x4ad   :  { %2496 = vmatmul.mubr.bf16.gmra.mrb[68].mxu1 %v4793_v6 }
 0x4ae   :  { %2503 = vmatprep.mubr.bf16.mxu1 %v4794_v7 }
 0x4b5   :  { %2504 = vmatmul.mubr.bf16.gmra.mrb[72].mxu1 %v4795_v8 }
 0x4b6   :  { %2511 = vmatprep.mubr.bf16.mxu1 %v4796_v9 }
 0x4bd   :  { %2512 = vmatmul.mubr.bf16.gmra.mrb[76].mxu1 %v4797_v10 }
 0x4be   :  { %2519 = vmatprep.mubr.bf16.mxu1 %v4798_v11 }
 0x4c5   :  { %2520 = vmatmul.mubr.bf16.gmra.mrb[80].mxu1 %v4799_v12  ;;  %v4837_v12 = vld [vmem:[%s6927_s0 + $0x3a8] ss:$16 sps:$4 sm:$0xff]  }
 0x4c6   :  { %2527 = vmatprep.mubr.bf16.mxu1 %v4800_v13 }
 0x4cd   :  { %2528 = vmatmul.mubr.bf16.gmra.mrb[84].mxu1 %v4801_v14  ;;  %v4838_v14 = vld [vmem:[%s6927_s0 + $0x3cc] ss:$16 sps:$4 sm:$0xff]  }
 0x4ce   :  { %2535 = vmatprep.mubr.bf16.mxu1 %v4802_v15 }
 0x4d5   :  { %2536 = vmatmul.mubr.bf16.gmra.mrb[88].mxu1 %v4803_v16 }
 0x4d6   :  { %2543 = vmatprep.mubr.bf16.mxu1 %v4804_v17 }
 0x4dd   :  { %2544 = vmatmul.mubr.bf16.gmra.mrb[92].mxu1 %v4805_v18 }
 0x4de   :  { %2551 = vmatprep.mubr.bf16.mxu1 %v4806_v19 }
 0x4e5   :  { %2552 = vmatmul.mubr.bf16.gmra.mrb[96].mxu1 %v4807_v20 }
 0x4e6   :  { %2559 = vmatprep.mubr.bf16.mxu1 %v4808_v21 }
 0x4ed   :  { %2560 = vmatmul.mubr.bf16.gmra.mrb[100].mxu1 %v4809_v22  ;;  %v4839_v22 = vld [vmem:[%s6927_s0 + $0x3c8] ss:$16 sps:$4 sm:$0xff]  }
 0x4ee   :  { %2567 = vmatprep.mubr.bf16.mxu1 %v4810_v23 }
 0x4f5   :  { %2568 = vmatmul.mubr.bf16.gmra.mrb[104].mxu1 %v4811_v24  ;;  %v4840_v24 = vld [vmem:[%s6927_s0 + $0x3ec] ss:$16 sps:$4 sm:$0xff]  }
 0x4f6   :  { %2575 = vmatprep.mubr.bf16.mxu1 %v4812_v25 }
 0x4fd   :  { %2576 = vmatmul.mubr.bf16.gmra.mrb[108].mxu1 %v4813_v26 }
 0x4fe   :  { %2583 = vmatprep.mubr.bf16.mxu1 %v4814_v0 }
 0x505   :  { %2584 = vmatmul.mubr.bf16.gmra.mrb[112].mxu1 %v4815_v27 }
 0x506   :  { %2591 = vmatprep.mubr.bf16.mxu1 %v4816_v34 }
 0x50d   :  { %2592 = vmatmul.mubr.bf16.gmra.mrb[116].mxu1 %v4817_v28 }
 0x50e   :  { %2599 = vmatprep.mubr.bf16.mxu1 %v4818_v29 }
 0x515   :  { %2600 = vmatmul.mubr.bf16.gmra.mrb[120].mxu1 %v4819_v30  ;;  %v4841_v30 = vld [vmem:[%s6927_s0 + $0x3e8] ss:$16 sps:$4 sm:$0xff]  }
 0x516   :  { %2607 = vmatprep.mubr.bf16.mxu1 %v4820_v31 }
 0x51d   :  { %2608 = vmatmul.mubr.bf16.gmra.mrb[124].mxu1 %v4821_v32 }
 0x51e   :  { %2615 = vmatprep.mubr.bf16.mxu1 %v4822_v33 }
 0x525   :  { %2616 = vmatmul.mubr.bf16.gmra.mrb[128].mxu1 %v4823_v35 }
 0x526   :  { %2623 = vmatprep.mubr.bf16.mxu1 %v4824_v36 }
 0x52d   :  { %2624 = vmatmul.mubr.bf16.gmra.mrb[132].mxu1 %v4825_v37 }
 0x52e   :  { %2631 = vmatprep.mubr.bf16.mxu1 %v4826_v38 }
 0x535   :  { %2632 = vmatmul.mubr.bf16.gmra.mrb[136].mxu1 %v4827_v39 }
 0x536   :  { %2639 = vmatprep.mubr.bf16.mxu1 %v4828_v40 }
 0x53d   :  { %2640 = vmatmul.mubr.bf16.gmra.mrb[140].mxu1 %v4829_v41 }
 0x53e   :  { %2647 = vmatprep.mubr.bf16.mxu1 %v4830_v42 }
 0x545   :  { %2648 = vmatmul.mubr.bf16.gmra.mrb[144].mxu1 %v4831_v45 }
 0x546   :  { %2655 = vmatprep.mubr.bf16.mxu1 %v4832_v47 }
 0x548   :  { %v2441_v48 = vpop.f32.mrb[40].mxu1 }
 0x549   :  { %v3905_v49 = vadd.f32 %v5869_v46, %v2441_v48  ;;  %v2443_v50 = vpop.f32.mrb[41].mxu1 }
 0x54a   :  { %v2444_v51 = vpop.f32.mrb[42].mxu1 }
 0x54b   :  { %v3906_v52 = vadd.f32 %v5869_v46, %v2444_v51  ;;  %v2446_v53 = vpop.f32.mrb[43].mxu1  ;;  %v5879_v54 = vsel %vm2698_vm0, %v3905_v49, -1e+30 }
 0x54c   :  { %2763 = vmax.xlane.f32.xlu0 %v5879_v54 }
 0x54d   :  { %2656 = vmatmul.mubr.bf16.gmra.mrb[148].mxu1 %v4833_v55  ;;  %v5890_v57 = vsel %vm2698_vm0, %v3906_v52, -1e+30 }
 0x54e   :  { %2663 = vmatprep.mubr.bf16.mxu1 %v4834_v56 }
 0x550   :  { %v2449_v58 = vpop.f32.mrb[44].mxu1  ;;  %2765 = vmax.xlane.f32.xlu0 %v5890_v57 }
 0x551   :  { %v3907_v59 = vadd.f32 %v5869_v46, %v2449_v58  ;;  %v2451_v60 = vpop.f32.mrb[45].mxu1 }
 0x552   :  { %v2452_v61 = vpop.f32.mrb[46].mxu1 }
 0x553   :  { %v3908_v62 = vadd.f32 %v5869_v46, %v2452_v61  ;;  %v2454_v63 = vpop.f32.mrb[47].mxu1  ;;  %v5897_v1 = vsel %vm2698_vm0, %v3907_v59, -1e+30 }
 0x554   :  { %2767 = vmax.xlane.f32.xlu1 %v5897_v1 }
 0x555   :  { %2664 = vmatmul.mubr.bf16.gmra.mrb[152].mxu1 %v4835_v2  ;;  %v5908_v4 = vsel %vm2698_vm0, %v3908_v62, -1e+30 }
 0x556   :  { %2671 = vmatprep.mubr.bf16.mxu1 %v4836_v3 }
 0x558   :  { %v2457_v5 = vpop.f32.mrb[48].mxu1  ;;  %2769 = vmax.xlane.f32.xlu1 %v5908_v4 }
 0x559   :  { %v3909_v6 = vadd.f32 %v5869_v46, %v2457_v5  ;;  %v2459_v7 = vpop.f32.mrb[49].mxu1 }
 0x55a   :  { %v2460_v8 = vpop.f32.mrb[50].mxu1 }
 0x55b   :  { %v3910_v9 = vadd.f32 %v5869_v46, %v2460_v8  ;;  %v2462_v10 = vpop.f32.mrb[51].mxu1  ;;  %v5915_v11 = vsel %vm2698_vm0, %v3909_v6, -1e+30 }
 0x55c   :  { %2771 = vmax.xlane.f32.xlu0 %v5915_v11 }
 0x55d   :  { %2672 = vmatmul.mubr.bf16.gmra.mrb[156].mxu1 %v4837_v12  ;;  %v5923_v13 = vsel %vm2698_vm0, %v3910_v9, -1e+30 }
 0x55e   :  { %2773 = vmax.xlane.f32.xlu1 %v5923_v13  ;;  %2679 = vmatprep.mubr.bf16.mxu1 %v4838_v14 }
 0x560   :  { %v2465_v15 = vpop.f32.mrb[52].mxu1 }
 0x561   :  { %v3911_v16 = vadd.f32 %v5869_v46, %v2465_v15  ;;  %v2467_v17 = vpop.f32.mrb[53].mxu1 }
 0x562   :  { %v2468_v18 = vpop.f32.mrb[54].mxu1 }
 0x563   :  { %v3912_v19 = vadd.f32 %v5869_v46, %v2468_v18  ;;  %v2470_v20 = vpop.f32.mrb[55].mxu1  ;;  %v5933_v21 = vsel %vm2698_vm0, %v3911_v16, -1e+30 }
 0x564   :  { %2775 = vmax.xlane.f32.xlu0 %v5933_v21 }
 0x565   :  { %2680 = vmatmul.mubr.bf16.gmra.mrb[160].mxu1 %v4839_v22  ;;  %v5941_v23 = vsel %vm2698_vm0, %v3912_v19, -1e+30 }
 0x566   :  { %2777 = vmax.xlane.f32.xlu1 %v5941_v23  ;;  %2687 = vmatprep.mubr.bf16.mxu1 %v4840_v24 }
 0x568   :  { %v2473_v25 = vpop.f32.mrb[56].mxu1 }
 0x569   :  { %v3913_v26 = vadd.f32 %v5869_v46, %v2473_v25  ;;  %v2475_v0 = vpop.f32.mrb[57].mxu1 }
 0x56a   :  { %v2476_v27 = vpop.f32.mrb[58].mxu1 }
 0x56b   :  { %v3914_v34 = vadd.f32 %v5869_v46, %v2476_v27  ;;  %v2478_v28 = vpop.f32.mrb[59].mxu1  ;;  %v5951_v29 = vsel %vm2698_vm0, %v3913_v26, -1e+30 }
 0x56c   :  { %2779 = vmax.xlane.f32.xlu0 %v5951_v29 }
 0x56d   :  { %2688 = vmatmul.mubr.bf16.gmra.mrb[164].mxu1 %v4841_v30  ;;  %v5959_v31 = vsel %vm2698_vm0, %v3914_v34, -1e+30 }
 0x56e   :  { %2781 = vmax.xlane.f32.xlu1 %v5959_v31 }
 0x570   :  { %v2481_v32 = vpop.f32.mrb[60].mxu1 }
 0x571   :  { %v3915_v33 = vadd.f32 %v5869_v46, %v2481_v32  ;;  %v2483_v35 = vpop.f32.mrb[61].mxu1 }
 0x572   :  { %v2484_v36 = vpop.f32.mrb[62].mxu1 }
 0x573   :  { %v3916_v37 = vadd.f32 %v5869_v46, %v2484_v36  ;;  %v2486_v38 = vpop.f32.mrb[63].mxu1  ;;  %v5966_v39 = vsel %vm2698_vm0, %v3915_v33, -1e+30 }
 0x574   :  { %2783 = vmax.xlane.f32.xlu0 %v5966_v39 }
 0x575   :  { %v5971_v40 = vsel %vm2698_vm0, %v3916_v37, -1e+30 }
 0x576   :  { %2785 = vmax.xlane.f32.xlu1 %v5971_v40 }
 0x578   :  { %v2489_v41 = vpop.f32.mrb[64].mxu1 }
 0x579   :  { %v3917_v42 = vadd.f32 %v5869_v46, %v2489_v41  ;;  %v2491_v43 = vpop.f32.mrb[65].mxu1 }
 0x57a   :  { %v2492_v45 = vpop.f32.mrb[66].mxu1 }
 0x57b   :  { %v3918_v47 = vadd.f32 %v5869_v46, %v2492_v45  ;;  %v2494_v48 = vpop.f32.mrb[67].mxu1  ;;  %v5978_v49 = vsel %vm2698_vm0, %v3917_v42, -1e+30 }
 0x57c   :  { %2787 = vmax.xlane.f32.xlu0 %v5978_v49 }
 0x57d   :  { %v5983_v50 = vsel %vm2698_vm0, %v3918_v47, -1e+30 }
 0x57e   :  { %2789 = vmax.xlane.f32.xlu1 %v5983_v50 }
 0x580   :  { %v2497_v51 = vpop.f32.mrb[68].mxu1 }
 0x581   :  { %v3919_v52 = vadd.f32 %v5869_v46, %v2497_v51  ;;  %v2499_v53 = vpop.f32.mrb[69].mxu1 }
 0x582   :  { %v2500_v55 = vpop.f32.mrb[70].mxu1 }
 0x583   :  { %v3920_v56 = vadd.f32 %v5869_v46, %v2500_v55  ;;  %v2502_v58 = vpop.f32.mrb[71].mxu1  ;;  %v5990_v59 = vsel %vm2698_vm0, %v3919_v52, -1e+30 }
 0x584   :  { %2791 = vmax.xlane.f32.xlu0 %v5990_v59 }
 0x585   :  { %v5995_v60 = vsel %vm2698_vm0, %v3920_v56, -1e+30 }
 0x586   :  { %2793 = vmax.xlane.f32.xlu1 %v5995_v60 }
 0x588   :  { %v2505_v61 = vpop.f32.mrb[72].mxu1 }
 0x589   :  { %v3921_v62 = vadd.f32 %v5869_v46, %v2505_v61  ;;  %v2507_v63 = vpop.f32.mrb[73].mxu1 }
 0x58a   :  { %v2508_v2 = vpop.f32.mrb[74].mxu1 }
 0x58b   :  { %v3922_v3 = vadd.f32 %v5869_v46, %v2508_v2  ;;  %v2510_v5 = vpop.f32.mrb[75].mxu1  ;;  %v6002_v6 = vsel %vm2698_vm0, %v3921_v62, -1e+30 }
 0x58c   :  { %2795 = vmax.xlane.f32.xlu0 %v6002_v6 }
 0x58d   :  { %v6007_v7 = vsel %vm2698_vm0, %v3922_v3, -1e+30 }
 0x58e   :  { %2797 = vmax.xlane.f32.xlu1 %v6007_v7 }
 0x590   :  { %v2513_v8 = vpop.f32.mrb[76].mxu1 }
 0x591   :  { %v3923_v9 = vadd.f32 %v5869_v46, %v2513_v8  ;;  %v2515_v10 = vpop.f32.mrb[77].mxu1 }
 0x592   :  { %v2516_v12 = vpop.f32.mrb[78].mxu1 }
 0x593   :  { %v3924_v14 = vadd.f32 %v5869_v46, %v2516_v12  ;;  %v2518_v15 = vpop.f32.mrb[79].mxu1  ;;  %v6014_v16 = vsel %vm2698_vm0, %v3923_v9, -1e+30 }
 0x594   :  { %2799 = vmax.xlane.f32.xlu0 %v6014_v16 }
 0x595   :  { %v6019_v17 = vsel %vm2698_vm0, %v3924_v14, -1e+30 }
 0x596   :  { %2801 = vmax.xlane.f32.xlu1 %v6019_v17 }
 0x598   :  { %v2521_v18 = vpop.f32.mrb[80].mxu1 }
 0x599   :  { %v3925_v19 = vadd.f32 %v5869_v46, %v2521_v18  ;;  %v2523_v20 = vpop.f32.mrb[81].mxu1 }
 0x59a   :  { %v2524_v22 = vpop.f32.mrb[82].mxu1 }
 0x59b   :  { %v3926_v24 = vadd.f32 %v5869_v46, %v2524_v22  ;;  %v2526_v25 = vpop.f32.mrb[83].mxu1  ;;  %v6026_v26 = vsel %vm2698_vm0, %v3925_v19, -1e+30 }
 0x59c   :  { %2803 = vmax.xlane.f32.xlu0 %v6026_v26 }
 0x59d   :  { %v6031_v0 = vsel %vm2698_vm0, %v3926_v24, -1e+30 }
 0x59e   :  { %2805 = vmax.xlane.f32.xlu1 %v6031_v0 }
 0x5a0   :  { %v2529_v27 = vpop.f32.mrb[84].mxu1 }
 0x5a1   :  { %v3927_v34 = vadd.f32 %v5869_v46, %v2529_v27  ;;  %v2531_v28 = vpop.f32.mrb[85].mxu1 }
 0x5a2   :  { %v2532_v30 = vpop.f32.mrb[86].mxu1 }
 0x5a3   :  { %v3928_v32 = vadd.f32 %v5869_v46, %v2532_v30  ;;  %v2534_v33 = vpop.f32.mrb[87].mxu1  ;;  %v6038_v35 = vsel %vm2698_vm0, %v3927_v34, -1e+30 }
 0x5a4   :  { %2807 = vmax.xlane.f32.xlu0 %v6038_v35 }
 0x5a5   :  { %v6043_v36 = vsel %vm2698_vm0, %v3928_v32, -1e+30 }
 0x5a6   :  { %2809 = vmax.xlane.f32.xlu1 %v6043_v36 }
 0x5a8   :  { %v2537_v37 = vpop.f32.mrb[88].mxu1 }
 0x5a9   :  { %v3929_v38 = vadd.f32 %v5869_v46, %v2537_v37  ;;  %v2539_v41 = vpop.f32.mrb[89].mxu1 }
 0x5aa   :  { %v2540_v42 = vpop.f32.mrb[90].mxu1 }
 0x5ab   :  { %v3930_v43 = vadd.f32 %v5869_v46, %v2540_v42  ;;  %v2542_v45 = vpop.f32.mrb[91].mxu1  ;;  %v6050_v47 = vsel %vm2698_vm0, %v3929_v38, -1e+30 }
 0x5ac   :  { %2811 = vmax.xlane.f32.xlu0 %v6050_v47 }
 0x5ad   :  { %v6055_v48 = vsel %vm2698_vm0, %v3930_v43, -1e+30 }
 0x5ae   :  { %2813 = vmax.xlane.f32.xlu1 %v6055_v48 }
 0x5b0   :  { %v2545_v51 = vpop.f32.mrb[92].mxu1 }
 0x5b1   :  { %v3931_v52 = vadd.f32 %v5869_v46, %v2545_v51  ;;  %v2547_v53 = vpop.f32.mrb[93].mxu1 }
 0x5b2   :  { %v2548_v55 = vpop.f32.mrb[94].mxu1 }
 0x5b3   :  { %v3932_v56 = vadd.f32 %v5869_v46, %v2548_v55  ;;  %v2550_v58 = vpop.f32.mrb[95].mxu1  ;;  %v6062_v61 = vsel %vm2698_vm0, %v3931_v52, -1e+30 }
 0x5b4   :  { %2815 = vmax.xlane.f32.xlu0 %v6062_v61 }
 0x5b5   :  { %v6067_v62 = vsel %vm2698_vm0, %v3932_v56, -1e+30 }
 0x5b6   :  { %2817 = vmax.xlane.f32.xlu1 %v6067_v62 }
 0x5b8   :  { %v2553_v63 = vpop.f32.mrb[96].mxu1 }
 0x5b9   :  { %v3933_v2 = vadd.f32 %v5869_v46, %v2553_v63  ;;  %v2555_v3 = vpop.f32.mrb[97].mxu1 }
 0x5ba   :  { %v2556_v5 = vpop.f32.mrb[98].mxu1 }
 0x5bb   :  { %v3934_v8 = vadd.f32 %v5869_v46, %v2556_v5  ;;  %v2558_v9 = vpop.f32.mrb[99].mxu1  ;;  %v6074_v10 = vsel %vm2698_vm0, %v3933_v2, -1e+30 }
 0x5bc   :  { %2819 = vmax.xlane.f32.xlu0 %v6074_v10 }
 0x5bd   :  { %v6079_v12 = vsel %vm2698_vm0, %v3934_v8, -1e+30 }
 0x5be   :  { %2821 = vmax.xlane.f32.xlu1 %v6079_v12 }
 0x5c0   :  { %v2561_v14 = vpop.f32.mrb[100].mxu1 }
 0x5c1   :  { %v3935_v15 = vadd.f32 %v5869_v46, %v2561_v14  ;;  %v2563_v18 = vpop.f32.mrb[101].mxu1 }
 0x5c2   :  { %v2564_v19 = vpop.f32.mrb[102].mxu1 }
 0x5c3   :  { %v3936_v20 = vadd.f32 %v5869_v46, %v2564_v19  ;;  %v2566_v22 = vpop.f32.mrb[103].mxu1  ;;  %v6086_v24 = vsel %vm2698_vm0, %v3935_v15, -1e+30 }
 0x5c4   :  { %2823 = vmax.xlane.f32.xlu0 %v6086_v24 }
 0x5c5   :  { %v6091_v25 = vsel %vm2698_vm0, %v3936_v20, -1e+30 }
 0x5c6   :  { %2825 = vmax.xlane.f32.xlu1 %v6091_v25 }
 0x5c8   :  { %v2569_v27 = vpop.f32.mrb[104].mxu1 }
 0x5c9   :  { %v3937_v34 = vadd.f32 %v5869_v46, %v2569_v27  ;;  %v2571_v28 = vpop.f32.mrb[105].mxu1 }
 0x5ca   :  { %v2572_v30 = vpop.f32.mrb[106].mxu1 }
 0x5cb   :  { %v3938_v32 = vadd.f32 %v5869_v46, %v2572_v30  ;;  %v2574_v33 = vpop.f32.mrb[107].mxu1  ;;  %v6098_v37 = vsel %vm2698_vm0, %v3937_v34, -1e+30 }
 0x5cc   :  { %2827 = vmax.xlane.f32.xlu0 %v6098_v37 }
 0x5cd   :  { %v6103_v38 = vsel %vm2698_vm0, %v3938_v32, -1e+30 }
 0x5ce   :  { %2829 = vmax.xlane.f32.xlu1 %v6103_v38 }
 0x5d0   :  { %v2577_v41 = vpop.f32.mrb[108].mxu1 }
 0x5d1   :  { %v3939_v42 = vadd.f32 %v5869_v46, %v2577_v41  ;;  %v2579_v43 = vpop.f32.mrb[109].mxu1 }
 0x5d2   :  { %v2580_v45 = vpop.f32.mrb[110].mxu1 }
 0x5d3   :  { %v3940_v51 = vadd.f32 %v5869_v46, %v2580_v45  ;;  %v2582_v52 = vpop.f32.mrb[111].mxu1  ;;  %v6110_v53 = vsel %vm2698_vm0, %v3939_v42, -1e+30 }
 0x5d4   :  { %2831 = vmax.xlane.f32.xlu0 %v6110_v53 }
 0x5d5   :  { %v6115_v55 = vsel %vm2698_vm0, %v3940_v51, -1e+30 }
 0x5d6   :  { %2833 = vmax.xlane.f32.xlu1 %v6115_v55 }
 0x5d8   :  { %v2585_v56 = vpop.f32.mrb[112].mxu1 }
 0x5d9   :  { %v3941_v58 = vadd.f32 %v5869_v46, %v2585_v56  ;;  %v2587_v63 = vpop.f32.mrb[113].mxu1  ;;  %v2764_v2 = vpop.xlane.xlu0 %2763 }
 0x5da   :  { %v6120_v3 = vsub.f32 %v5879_v54, %v2764_v2  ;;  %v2588_v5 = vpop.f32.mrb[114].mxu1 }
 0x5db   :  { %v3942_v8 = vadd.f32 %v5869_v46, %v2588_v5  ;;  %v2590_v9 = vpop.f32.mrb[115].mxu1  ;;  %v6125_v14 = vsel %vm2698_vm0, %v3941_v58, -1e+30 }
 0x5dc   :  { %v2955_v15 = vmul.f32 1.442695, %v6120_v3  ;;  %2835 = vmax.xlane.f32.xlu0 %v6125_v14 }
 0x5dd   :  { %v2766_v18 = vpop.xlane.xlu0 %2765  ;;  %v6131_v19 = vsel %vm2698_vm0, %v3942_v8, -1e+30 }
 0x5de   :  { %4458 = vpow2.f32 %v2955_v15  ;;  %v6134_v54 = vsub.f32 %v5890_v57, %v2766_v18  ;;  %2837 = vmax.xlane.f32.xlu1 %v6131_v19 }
 0x5e0   :  { %v2957_v20 = vmul.f32 1.442695, %v6134_v54  ;;  %v2593_v22 = vpop.f32.mrb[116].mxu1 }
 0x5e1   :  { %v3943_v27 = vadd.f32 %v5869_v46, %v2593_v22  ;;  %v2595_v34 = vpop.f32.mrb[117].mxu1  ;;  %v2768_v28 = vpop.xlane.xlu1 %2767 }
 0x5e2   :  { %4460 = vpow2.f32 %v2957_v20  ;;  %v6140_v30 = vsub.f32 %v5897_v1, %v2768_v28  ;;  %v2596_v32 = vpop.f32.mrb[118].mxu1 }
 0x5e3   :  { %v3944_v33 = vadd.f32 %v5869_v46, %v2596_v32  ;;  %v2598_v41 = vpop.f32.mrb[119].mxu1  ;;  %v6145_v57 = vsel %vm2698_vm0, %v3943_v27, -1e+30 }
 0x5e4   :  { %v2959_v42 = vmul.f32 1.442695, %v6140_v30  ;;  %2839 = vmax.xlane.f32.xlu0 %v6145_v57 }
 0x5e5   :  { %v2770_v43 = vpop.xlane.xlu1 %2769  ;;  %v6151_v45 = vsel %vm2698_vm0, %v3944_v33, -1e+30 }
 0x5e6   :  { %4462 = vpow2.f32 %v2959_v42  ;;  %v6154_v1 = vsub.f32 %v5908_v4, %v2770_v43  ;;  %2841 = vmax.xlane.f32.xlu1 %v6151_v45 }
 0x5e8   :  { %v4459_v51 = vpop.eup %4458  ;;  %v2961_v52 = vmul.f32 1.442695, %v6154_v1  ;;  %v2601_v56 = vpop.f32.mrb[120].mxu1 }
 0x5e9   :  { %v3945_v58 = vadd.f32 %v5869_v46, %v2601_v56  ;;  %v2603_v63 = vpop.f32.mrb[121].mxu1  ;;  %v2772_v2 = vpop.xlane.xlu0 %2771  ;;  %v3083_v5 = vsel %vm2698_vm0, %v4459_v51, 0.0 }
 0x5ea   :  { %4464 = vpow2.f32 %v2961_v52  ;;  %v6162_v8 = vsub.f32 %v5915_v11, %v2772_v2  ;;  %v2604_v9 = vpop.f32.mrb[122].mxu1  ;;  %3147 = vadd.xlane.f32.xlu0 %v3083_v5 }
 0x5eb   :  { %v2606_v4 = vpop.f32.mrb[123].mxu1  ;;  %v2774_v15 = vpop.xlane.xlu1 %2773  ;;  %v3946_v27 = vadd.f32 %v5869_v46, %v2604_v9  ;;  %v6171_v34 = vsel %vm2698_vm0, %v3945_v58, -1e+30 }
 0x5ec   :  { %v4461_v18 = vpop.eup %4460  ;;  %v2963_v20 = vmul.f32 1.442695, %v6162_v8  ;;  %v6166_v22 = vsub.f32 %v5923_v13, %v2774_v15 }
 0x5ed   :  { %v3084_v11 = vsel %vm2698_vm0, %v4461_v18, 0.0  ;;  %v6182_v51 = vsel %vm2698_vm0, %v3946_v27, -1e+30 }
 0x5ee   :  { %4466 = vpow2.f32 %v2963_v20  ;;  %v2965_v28 = vmul.f32 1.442695, %v6166_v22  ;;  %2843 = vmax.xlane.f32.xlu0 %v6171_v34  ;;  %3149 = vadd.xlane.f32.xlu1 %v3084_v11 }
 0x5f0   :  { %v4463_v32 = vpop.eup %4462  ;;  %4468 = vpow2.f32 %v2965_v28  ;;  %v2609_v33 = vpop.f32.mrb[124].mxu1 }
 0x5f1   :  { %v3947_v13 = vadd.f32 %v5869_v46, %v2609_v33  ;;  %v2611_v41 = vpop.f32.mrb[125].mxu1  ;;  %v2776_v42 = vpop.xlane.xlu0 %2775  ;;  %v3085_v43 = vsel %vm2698_vm0, %v4463_v32, 0.0 }
 0x5f2   :  { %v6185_v52 = vsub.f32 %v5933_v21, %v2776_v42  ;;  %v2612_v56 = vpop.f32.mrb[126].mxu1  ;;  %3151 = vadd.xlane.f32.xlu0 %v3085_v43  ;;  %2845 = vmax.xlane.f32.xlu1 %v6182_v51 }
 0x5f3   :  { %v2614_v58 = vpop.f32.mrb[127].mxu1  ;;  %v2778_v63 = vpop.xlane.xlu1 %2777  ;;  %v3948_v4 = vadd.f32 %v5869_v46, %v2612_v56  ;;  %v6195_v15 = vsel %vm2698_vm0, %v3947_v13, -1e+30 }
 0x5f4   :  { %v4465_v2 = vpop.eup %4464  ;;  %v2967_v5 = vmul.f32 1.442695, %v6185_v52  ;;  %v6190_v9 = vsub.f32 %v5941_v23, %v2778_v63 }
 0x5f5   :  { %v3086_v21 = vsel %vm2698_vm0, %v4465_v2, 0.0  ;;  %v6204_v32 = vsel %vm2698_vm0, %v3948_v4, -1e+30 }
 0x5f6   :  { %4470 = vpow2.f32 %v2967_v5  ;;  %v2969_v18 = vmul.f32 1.442695, %v6190_v9  ;;  %2847 = vmax.xlane.f32.xlu0 %v6195_v15  ;;  %3153 = vadd.xlane.f32.xlu1 %v3086_v21 }
 0x5f8   :  { %v4467_v20 = vpop.eup %4466  ;;  %4472 = vpow2.f32 %v2969_v18  ;;  %v2617_v27 = vpop.f32.mrb[128].mxu1 }
 0x5f9   :  { %v3949_v23 = vadd.f32 %v5869_v46, %v2617_v27  ;;  %v2619_v11 = vpop.f32.mrb[129].mxu1  ;;  %v2780_v28 = vpop.xlane.xlu0 %2779  ;;  %v3087_v33 = vsel %vm2698_vm0, %v4467_v20, 0.0 }
 0x5fa   :  { %v4469_v13 = vpop.eup %4468  ;;  %v6209_v41 = vsub.f32 %v5951_v29, %v2780_v28  ;;  %v2620_v42 = vpop.f32.mrb[130].mxu1  ;;  %2849 = vmax.xlane.f32.xlu1 %v6204_v32  ;;  %3155 = vadd.xlane.f32.xlu0 %v3087_v33 }
 0x5fb   :  { %v2622_v43 = vpop.f32.mrb[131].mxu1  ;;  %v2782_v56 = vpop.xlane.xlu1 %2781  ;;  %v3950_v2 = vadd.f32 %v5869_v46, %v2620_v42  ;;  %v3088_v5 = vsel %vm2698_vm0, %v4469_v13, 0.0  ;;  %v6221_v29 = vsel %vm2698_vm0, %v3949_v23, -1e+30 }
 0x5fc   :  { %v2971_v58 = vmul.f32 1.442695, %v6209_v41  ;;  %v6214_v63 = vsub.f32 %v5959_v31, %v2782_v56 }
 0x5fd   :  { %v6228_v11 = vsel %vm2698_vm0, %v3950_v2, -1e+30 }
 0x5fe   :  { %4474 = vpow2.f32 %v2971_v58  ;;  %v2973_v4 = vmul.f32 1.442695, %v6214_v63  ;;  %3157 = vadd.xlane.f32.xlu1 %v3088_v5  ;;  %2851 = vmax.xlane.f32.xlu0 %v6221_v29 }
 0x600   :  { %v4471_v21 = vpop.eup %4470  ;;  %4476 = vpow2.f32 %v2973_v4  ;;  %v2625_v18 = vpop.f32.mrb[132].mxu1 }
 0x601   :  { %v3951_v31 = vadd.f32 %v5869_v46, %v2625_v18  ;;  %v2627_v20 = vpop.f32.mrb[133].mxu1  ;;  %v2784_v27 = vpop.xlane.xlu0 %2783  ;;  %v3089_v23 = vsel %vm2698_vm0, %v4471_v21, 0.0 }
 0x602   :  { %v4473_v28 = vpop.eup %4472  ;;  %v6233_v33 = vsub.f32 %v5966_v39, %v2784_v27  ;;  %v2628_v13 = vpop.f32.mrb[134].mxu1  ;;  %2853 = vmax.xlane.f32.xlu1 %v6228_v11  ;;  %3159 = vadd.xlane.f32.xlu0 %v3089_v23 }
 0x603   :  { %v2630_v42 = vpop.f32.mrb[135].mxu1  ;;  %v2786_v43 = vpop.xlane.xlu1 %2785  ;;  %v3952_v2 = vadd.f32 %v5869_v46, %v2628_v13  ;;  %v3090_v5 = vsel %vm2698_vm0, %v4473_v28, 0.0  ;;  %v6245_v39 = vsel %vm2698_vm0, %v3951_v31, -1e+30 }
 0x604   :  { %v2975_v56 = vmul.f32 1.442695, %v6233_v33  ;;  %v6238_v58 = vsub.f32 %v5971_v40, %v2786_v43 }
 0x605   :  { %v6252_v23 = vsel %vm2698_vm0, %v3952_v2, -1e+30 }
 0x606   :  { %4478 = vpow2.f32 %v2975_v56  ;;  %v2977_v4 = vmul.f32 1.442695, %v6238_v58  ;;  %3161 = vadd.xlane.f32.xlu1 %v3090_v5  ;;  %2855 = vmax.xlane.f32.xlu0 %v6245_v39 }
 0x608   :  { %v4475_v21 = vpop.eup %4474  ;;  %4480 = vpow2.f32 %v2977_v4  ;;  %v2633_v18 = vpop.f32.mrb[136].mxu1 }
 0x609   :  { %v3953_v40 = vadd.f32 %v5869_v46, %v2633_v18  ;;  %v2635_v20 = vpop.f32.mrb[137].mxu1  ;;  %v2788_v27 = vpop.xlane.xlu0 %2787  ;;  %v3091_v31 = vsel %vm2698_vm0, %v4475_v21, 0.0 }
 0x60a   :  { %v4477_v28 = vpop.eup %4476  ;;  %v6257_v13 = vsub.f32 %v5978_v49, %v2788_v27  ;;  %v2636_v42 = vpop.f32.mrb[138].mxu1  ;;  %2857 = vmax.xlane.f32.xlu1 %v6252_v23  ;;  %3163 = vadd.xlane.f32.xlu0 %v3091_v31 }
 0x60b   :  { %v2638_v43 = vpop.f32.mrb[139].mxu1  ;;  %v2790_v56 = vpop.xlane.xlu1 %2789  ;;  %v3954_v2 = vadd.f32 %v5869_v46, %v2636_v42  ;;  %v3092_v21 = vsel %vm2698_vm0, %v4477_v28, 0.0  ;;  %v6269_v49 = vsel %vm2698_vm0, %v3953_v40, -1e+30 }
 0x60c   :  { %6947 = vst [vmem:[#allocation2_spill] sm:$0xff] %v6257_v13  ;;  %v2979_v5 = vmul.f32 1.442695, %v6257_v13  ;;  %v6262_v4 = vsub.f32 %v5983_v50, %v2790_v56 }
 0x60d   :  { %v6276_v28 = vsel %vm2698_vm0, %v3954_v2, -1e+30 }
 0x60e   :  { %6948 = vst [vmem:[#allocation3_spill] sm:$0xff] %v6262_v4  ;;  %4482 = vpow2.f32 %v2979_v5  ;;  %v2981_v18 = vmul.f32 1.442695, %v6262_v4  ;;  %3165 = vadd.xlane.f32.xlu1 %v3092_v21  ;;  %2859 = vmax.xlane.f32.xlu0 %v6269_v49 }
 0x610   :  { %v4479_v20 = vpop.eup %4478  ;;  %4484 = vpow2.f32 %v2981_v18  ;;  %v2641_v27 = vpop.f32.mrb[140].mxu1 }
 0x611   :  { %v3955_v50 = vadd.f32 %v5869_v46, %v2641_v27  ;;  %v2643_v31 = vpop.f32.mrb[141].mxu1  ;;  %v2792_v42 = vpop.xlane.xlu0 %2791  ;;  %v3093_v40 = vsel %vm2698_vm0, %v4479_v20, 0.0 }
 0x612   :  { %v4481_v43 = vpop.eup %4480  ;;  %v6281_v56 = vsub.f32 %v5990_v59, %v2792_v42  ;;  %v2644_v5 = vpop.f32.mrb[142].mxu1  ;;  %2861 = vmax.xlane.f32.xlu1 %v6276_v28  ;;  %3167 = vadd.xlane.f32.xlu0 %v3093_v40 }
 0x613   :  { %v2646_v21 = vpop.f32.mrb[143].mxu1  ;;  %v2794_v18 = vpop.xlane.xlu1 %2793  ;;  %v3956_v2 = vadd.f32 %v5869_v46, %v2644_v5  ;;  %v3094_v20 = vsel %vm2698_vm0, %v4481_v43, 0.0  ;;  %v6293_v59 = vsel %vm2698_vm0, %v3955_v50, -1e+30 }
 0x614   :  { %6949 = vst [vmem:[#allocation4_spill] sm:$0xff] %v6281_v56  ;;  %v2983_v27 = vmul.f32 1.442695, %v6281_v56  ;;  %v6286_v31 = vsub.f32 %v5995_v60, %v2794_v18 }
 0x615   :  { %v6300_v43 = vsel %vm2698_vm0, %v3956_v2, -1e+30 }
 0x616   :  { %6950 = vst [vmem:[#allocation5_spill] sm:$0xff] %v6286_v31  ;;  %4486 = vpow2.f32 %v2983_v27  ;;  %v2985_v42 = vmul.f32 1.442695, %v6286_v31  ;;  %3169 = vadd.xlane.f32.xlu1 %v3094_v20  ;;  %2863 = vmax.xlane.f32.xlu0 %v6293_v59 }
 0x618   :  { %v4483_v40 = vpop.eup %4482  ;;  %4488 = vpow2.f32 %v2985_v42  ;;  %v2649_v21 = vpop.f32.mrb[144].mxu1 }
 0x619   :  { %v3957_v60 = vadd.f32 %v5869_v46, %v2649_v21  ;;  %v2651_v18 = vpop.f32.mrb[145].mxu1  ;;  %v2796_v5 = vpop.xlane.xlu0 %2795  ;;  %v3095_v50 = vsel %vm2698_vm0, %v4483_v40, 0.0 }
 0x61a   :  { %v4485_v27 = vpop.eup %4484  ;;  %v6305_v31 = vsub.f32 %v6002_v6, %v2796_v5  ;;  %v2652_v20 = vpop.f32.mrb[146].mxu1  ;;  %2865 = vmax.xlane.f32.xlu1 %v6300_v43  ;;  %3171 = vadd.xlane.f32.xlu0 %v3095_v50 }
 0x61b   :  { %v2654_v42 = vpop.f32.mrb[147].mxu1  ;;  %v2798_v56 = vpop.xlane.xlu1 %2797  ;;  %v3958_v2 = vadd.f32 %v5869_v46, %v2652_v20  ;;  %v3096_v40 = vsel %vm2698_vm0, %v4485_v27, 0.0  ;;  %v6317_v6 = vsel %vm2698_vm0, %v3957_v60, -1e+30 }
 0x61c   :  { %6951 = vst [vmem:[#allocation6_spill] sm:$0xff] %v6305_v31  ;;  %v2987_v21 = vmul.f32 1.442695, %v6305_v31  ;;  %v6310_v18 = vsub.f32 %v6007_v7, %v2798_v56 }
 0x61d   :  { %v6324_v27 = vsel %vm2698_vm0, %v3958_v2, -1e+30 }
 0x61e   :  { %6952 = vst [vmem:[#allocation7_spill] sm:$0xff] %v6310_v18  ;;  %4490 = vpow2.f32 %v2987_v21  ;;  %v2989_v5 = vmul.f32 1.442695, %v6310_v18  ;;  %3173 = vadd.xlane.f32.xlu1 %v3096_v40  ;;  %2867 = vmax.xlane.f32.xlu0 %v6317_v6 }
 0x620   :  { %v4487_v50 = vpop.eup %4486  ;;  %4492 = vpow2.f32 %v2989_v5  ;;  %v2657_v42 = vpop.f32.mrb[148].mxu1 }
 0x621   :  { %v3959_v7 = vadd.f32 %v5869_v46, %v2657_v42  ;;  %v2659_v56 = vpop.f32.mrb[149].mxu1  ;;  %v2800_v20 = vpop.xlane.xlu0 %2799  ;;  %v3097_v60 = vsel %vm2698_vm0, %v4487_v50, 0.0 }
 0x622   :  { %v4489_v21 = vpop.eup %4488  ;;  %v6329_v18 = vsub.f32 %v6014_v16, %v2800_v20  ;;  %v2660_v40 = vpop.f32.mrb[150].mxu1  ;;  %2869 = vmax.xlane.f32.xlu1 %v6324_v27  ;;  %3175 = vadd.xlane.f32.xlu0 %v3097_v60 }
 0x623   :  { %v2662_v5 = vpop.f32.mrb[151].mxu1  ;;  %v2802_v31 = vpop.xlane.xlu1 %2801  ;;  %v3960_v2 = vadd.f32 %v5869_v46, %v2660_v40  ;;  %v3098_v50 = vsel %vm2698_vm0, %v4489_v21, 0.0  ;;  %v6341_v16 = vsel %vm2698_vm0, %v3959_v7, -1e+30 }
 0x624   :  { %6953 = vst [vmem:[#allocation8_spill] sm:$0xff] %v6329_v18  ;;  %v2991_v42 = vmul.f32 1.442695, %v6329_v18  ;;  %v6334_v56 = vsub.f32 %v6019_v17, %v2802_v31 }
 0x625   :  { %v6348_v40 = vsel %vm2698_vm0, %v3960_v2, -1e+30 }
 0x626   :  { %6954 = vst [vmem:[#allocation9_spill] sm:$0xff] %v6334_v56  ;;  %4494 = vpow2.f32 %v2991_v42  ;;  %v2993_v20 = vmul.f32 1.442695, %v6334_v56  ;;  %3177 = vadd.xlane.f32.xlu1 %v3098_v50  ;;  %2871 = vmax.xlane.f32.xlu0 %v6341_v16  ;;  %6955 = vst [vmem:[#allocation10_spill] sm:$0xff] %v6348_v40 }
 0x628   :  { %v4491_v60 = vpop.eup %4490  ;;  %4496 = vpow2.f32 %v2993_v20  ;;  %v2665_v5 = vpop.f32.mrb[152].mxu1 }
 0x629   :  { %v3961_v17 = vadd.f32 %v5869_v46, %v2665_v5  ;;  %v2667_v31 = vpop.f32.mrb[153].mxu1  ;;  %v3099_v7 = vsel %vm2698_vm0, %v4491_v60, 0.0  ;;  %v2804_v2 = vpop.xlane.xlu0 %2803 }
 0x62a   :  { %v4493_v21 = vpop.eup %4492  ;;  %v2668_v42 = vpop.f32.mrb[154].mxu1  ;;  %2873 = vmax.xlane.f32.xlu1 %v6348_v40  ;;  %3179 = vadd.xlane.f32.xlu0 %v3099_v7 }
 0x62b   :  { %v2670_v50 = vpop.f32.mrb[155].mxu1  ;;  %v3962_v56 = vadd.f32 %v5869_v46, %v2668_v42  ;;  %v3100_v20 = vsel %vm2698_vm0, %v4493_v21, 0.0  ;;  %v6358_v5 = vsel %vm2698_vm0, %v3961_v17, -1e+30  ;;  %v2806_v18 = vpop.xlane.xlu1 %2805  ;;  %v6369_v17 = vsub.f32 %v6026_v26, %v2804_v2 }
 0x62c   :  { %6956 = vst [vmem:[#allocation11_spill] sm:$0xff] %v6358_v5 }
 0x62d   :  { %v6364_v42 = vsel %vm2698_vm0, %v3962_v56, -1e+30  ;;  %v2995_v26 = vmul.f32 1.442695, %v6369_v17 }
 0x62e   :  { %3181 = vadd.xlane.f32.xlu1 %v3100_v20  ;;  %2875 = vmax.xlane.f32.xlu0 %v6358_v5 }
 0x62f   :  { %4498 = vpow2.f32 %v2995_v26 }
 0x630   :  { %v4495_v60 = vpop.eup %4494  ;;  %v2673_v31 = vpop.f32.mrb[156].mxu1 }
 0x631   :  { %v3963_v4 = vadd.f32 %v5869_v46, %v2673_v31  ;;  %v2675_v7 = vpop.f32.mrb[157].mxu1  ;;  %v3101_v21 = vsel %vm2698_vm0, %v4495_v60, 0.0  ;;  %v2808_v5 = vpop.xlane.xlu0 %2807  ;;  %v6373_v31 = vsub.f32 %v6031_v0, %v2806_v18 }
 0x632   :  { %v4497_v50 = vpop.eup %4496  ;;  %v2676_v20 = vpop.f32.mrb[158].mxu1  ;;  %2877 = vmax.xlane.f32.xlu1 %v6364_v42  ;;  %3183 = vadd.xlane.f32.xlu0 %v3101_v21  ;;  %v6384_v2 = vsub.f32 %v6038_v35, %v2808_v5 }
 0x633   :  { %v2678_v40 = vpop.f32.mrb[159].mxu1  ;;  %6957 = vst [vmem:[#allocation12_spill] sm:$0xff] %v6373_v31  ;;  %v3964_v7 = vadd.f32 %v5869_v46, %v2676_v20  ;;  %v2810_v56 = vpop.xlane.xlu1 %2809  ;;  %v3102_v13 = vsel %vm2698_vm0, %v4497_v50, 0.0  ;;  %v6380_v60 = vsel %vm2698_vm0, %v3963_v4, -1e+30 }
 0x634   :  { %v2997_v0 = vmul.f32 1.442695, %v6373_v31  ;;  %v6389_v18 = vsub.f32 %v6043_v36, %v2810_v56  ;;  %v2999_v35 = vmul.f32 1.442695, %v6384_v2 }
 0x635   :  { %v6394_v4 = vsel %vm2698_vm0, %v3964_v7, -1e+30 }
 0x636   :  { %3185 = vadd.xlane.f32.xlu1 %v3102_v13  ;;  %2879 = vmax.xlane.f32.xlu0 %v6380_v60  ;;  %6958 = vst [vmem:[#allocation13_spill] sm:$0xff] %v6389_v18  ;;  %4500 = vpow2.f32 %v2997_v0  ;;  %v3001_v7 = vmul.f32 1.442695, %v6389_v18 }
 0x637   :  { %4502 = vpow2.f32 %v2999_v35 }
 0x638   :  { %v2681_v40 = vpop.f32.mrb[160].mxu1  ;;  %4504 = vpow2.f32 %v3001_v7 }
 0x639   :  { %v3965_v21 = vadd.f32 %v5869_v46, %v2681_v40  ;;  %v2683_v50 = vpop.f32.mrb[161].mxu1  ;;  %v2812_v20 = vpop.xlane.xlu0 %2811 }
 0x63a   :  { %v6398_v13 = vsub.f32 %v6050_v47, %v2812_v20  ;;  %v2684_v5 = vpop.f32.mrb[162].mxu1  ;;  %2881 = vmax.xlane.f32.xlu1 %v6394_v4  ;;  %v4499_v7 = vpop.eup %4498 }
 0x63b   :  { %v3966_v36 = vadd.f32 %v5869_v46, %v2684_v5  ;;  %v2686_v56 = vpop.f32.mrb[163].mxu1  ;;  %v2814_v31 = vpop.xlane.xlu1 %2813  ;;  %v6404_v40 = vsel %vm2698_vm0, %v3965_v21, -1e+30 }
 0x63c   :  { %6959 = vst [vmem:[#allocation14_spill] sm:$0xff] %v6398_v13  ;;  %v6408_v26 = vsub.f32 %v6055_v48, %v2814_v31  ;;  %2883 = vmax.xlane.f32.xlu0 %v6404_v40  ;;  %v3003_v50 = vmul.f32 1.442695, %v6398_v13 }
 0x63d   :  { %v6413_v47 = vsel %vm2698_vm0, %v3966_v36, -1e+30 }
 0x63e   :  { %6960 = vst [vmem:[#allocation15_spill] sm:$0xff] %v6408_v26  ;;  %2885 = vmax.xlane.f32.xlu1 %v6413_v47  ;;  %v3005_v21 = vmul.f32 1.442695, %v6408_v26  ;;  %4506 = vpow2.f32 %v3003_v50 }
 0x640   :  { %v2689_v0 = vpop.f32.mrb[164].mxu1  ;;  %4508 = vpow2.f32 %v3005_v21  ;;  %v3103_v21 = vsel %vm2698_vm0, %v4499_v7, 0.0 }
 0x641   :  { %v3967_v20 = vadd.f32 %v5869_v46, %v2689_v0  ;;  %v2691_v5 = vpop.f32.mrb[165].mxu1  ;;  %v2816_v48 = vpop.xlane.xlu0 %2815 }
 0x642   :  { %v6420_v31 = vsub.f32 %v6062_v61, %v2816_v48  ;;  %v2692_v56 = vpop.f32.mrb[166].mxu1 }
 0x643   :  { %v3968_v36 = vadd.f32 %v5869_v46, %v2692_v56  ;;  %v2694_v35 = vpop.f32.mrb[167].mxu1  ;;  %v2818_v18 = vpop.xlane.xlu1 %2817  ;;  %v6425_v13 = vsel %vm2698_vm0, %v3967_v20, -1e+30 }
 0x644   :  { %v3007_v26 = vmul.f32 1.442695, %v6420_v31  ;;  %v6429_v0 = vsub.f32 %v6067_v62, %v2818_v18  ;;  %2887 = vmax.xlane.f32.xlu0 %v6425_v13  ;;  %v4501_v46 = vpop.eup %4500 }
 0x645   :  { %v6434_v61 = vsel %vm2698_vm0, %v3968_v36, -1e+30  ;;  %v4503_v20 = vpop.eup %4502  ;;  %v3104_v18 = vsel %vm2698_vm0, %v4501_v46, 0.0 }
 0x646   :  { %4510 = vpow2.f32 %v3007_v26  ;;  %v3009_v50 = vmul.f32 1.442695, %v6429_v0  ;;  %2889 = vmax.xlane.f32.xlu1 %v6434_v61  ;;  %v4505_v5 = vpop.eup %4504  ;;  %v3105_v56 = vsel %vm2698_vm0, %v4503_v20, 0.0 }
 0x648   :  { %4512 = vpow2.f32 %v3009_v50  ;;  %3187 = vadd.xlane.f32.xlu0 %v3103_v21  ;;  %v4507_v36 = vpop.eup %4506  ;;  %v3106_v50 = vsel %vm2698_vm0, %v4505_v5, 0.0 }
 0x649   :  { %v2820_v62 = vpop.xlane.xlu0 %2819  ;;  %v3107_v21 = vsel %vm2698_vm0, %v4507_v36, 0.0 }
 0x64a   :  { %v6443_v48 = vsub.f32 %v6074_v10, %v2820_v62  ;;  %3189 = vadd.xlane.f32.xlu1 %v3104_v18  ;;  %v4509_v46 = vpop.eup %4508 }
 0x64b   :  { %v2822_v26 = vpop.xlane.xlu1 %2821 }
 0x64c   :  { %v3011_v35 = vmul.f32 1.442695, %v6443_v48  ;;  %v6449_v7 = vsub.f32 %v6079_v12, %v2822_v26  ;;  %3191 = vadd.xlane.f32.xlu0 %v3105_v56  ;;  %v3108_v12 = vsel %vm2698_vm0, %v4509_v46, 0.0 }
 0x64e   :  { %4514 = vpow2.f32 %v3011_v35  ;;  %v3013_v10 = vmul.f32 1.442695, %v6449_v7  ;;  %3193 = vadd.xlane.f32.xlu1 %v3106_v50 }
 0x650   :  { %v4511_v62 = vpop.eup %4510  ;;  %4516 = vpow2.f32 %v3013_v10  ;;  %3195 = vadd.xlane.f32.xlu0 %v3107_v21 }
 0x651   :  { %v2824_v20 = vpop.xlane.xlu0 %2823  ;;  %v3109_v56 = vsel %vm2698_vm0, %v4511_v62, 0.0 }
 0x652   :  { %v4513_v18 = vpop.eup %4512  ;;  %v6459_v26 = vsub.f32 %v6086_v24, %v2824_v20  ;;  %3197 = vadd.xlane.f32.xlu1 %v3108_v12 }
 0x653   :  { %v2826_v5 = vpop.xlane.xlu1 %2825  ;;  %v3110_v50 = vsel %vm2698_vm0, %v4513_v18, 0.0 }
 0x654   :  { %v3015_v35 = vmul.f32 1.442695, %v6459_v26  ;;  %v6465_v36 = vsub.f32 %v6091_v25, %v2826_v5  ;;  %3199 = vadd.xlane.f32.xlu0 %v3109_v56 }
 0x656   :  { %4518 = vpow2.f32 %v3015_v35  ;;  %v3017_v46 = vmul.f32 1.442695, %v6465_v36  ;;  %3201 = vadd.xlane.f32.xlu1 %v3110_v50 }
 0x658   :  { %v4515_v24 = vpop.eup %4514  ;;  %4520 = vpow2.f32 %v3017_v46 }
 0x659   :  { %v2828_v10 = vpop.xlane.xlu0 %2827  ;;  %v3111_v21 = vsel %vm2698_vm0, %v4515_v24, 0.0 }
 0x65a   :  { %v4517_v62 = vpop.eup %4516  ;;  %v6473_v20 = vsub.f32 %v6098_v37, %v2828_v10  ;;  %3203 = vadd.xlane.f32.xlu0 %v3111_v21 }
 0x65b   :  { %v2830_v25 = vpop.xlane.xlu1 %2829  ;;  %v3112_v12 = vsel %vm2698_vm0, %v4517_v62, 0.0 }
 0x65c   :  { %v3019_v18 = vmul.f32 1.442695, %v6473_v20  ;;  %v6479_v5 = vsub.f32 %v6103_v38, %v2830_v25  ;;  %3205 = vadd.xlane.f32.xlu1 %v3112_v12 }
 0x65e   :  { %4522 = vpow2.f32 %v3019_v18  ;;  %v3021_v56 = vmul.f32 1.442695, %v6479_v5 }
 0x660   :  { %v4519_v35 = vpop.eup %4518  ;;  %4524 = vpow2.f32 %v3021_v56 }
 0x661   :  { %v2832_v50 = vpop.xlane.xlu0 %2831  ;;  %v3113_v37 = vsel %vm2698_vm0, %v4519_v35, 0.0 }
 0x662   :  { %v4521_v46 = vpop.eup %4520  ;;  %v6485_v24 = vsub.f32 %v6110_v53, %v2832_v50  ;;  %3207 = vadd.xlane.f32.xlu0 %v3113_v37 }
 0x663   :  { %v2834_v10 = vpop.xlane.xlu1 %2833  ;;  %v3114_v38 = vsel %vm2698_vm0, %v4521_v46, 0.0 }
 0x664   :  { %v3023_v21 = vmul.f32 1.442695, %v6485_v24  ;;  %v6491_v62 = vsub.f32 %v6115_v55, %v2834_v10  ;;  %3209 = vadd.xlane.f32.xlu1 %v3114_v38 }
 0x666   :  { %4526 = vpow2.f32 %v3023_v21  ;;  %v3025_v25 = vmul.f32 1.442695, %v6491_v62 }
 0x668   :  { %v4523_v12 = vpop.eup %4522  ;;  %4528 = vpow2.f32 %v3025_v25 }
 0x669   :  { %v2836_v18 = vpop.xlane.xlu0 %2835  ;;  %v3115_v53 = vsel %vm2698_vm0, %v4523_v12, 0.0 }
 0x66a   :  { %v4525_v56 = vpop.eup %4524  ;;  %v6497_v35 = vsub.f32 %v6125_v14, %v2836_v18  ;;  %3211 = vadd.xlane.f32.xlu0 %v3115_v53 }
 0x66b   :  { %v2838_v50 = vpop.xlane.xlu1 %2837  ;;  %v3116_v55 = vsel %vm2698_vm0, %v4525_v56, 0.0 }
 0x66c   :  { %v3027_v37 = vmul.f32 1.442695, %v6497_v35  ;;  %v6503_v46 = vsub.f32 %v6131_v19, %v2838_v50  ;;  %3213 = vadd.xlane.f32.xlu1 %v3116_v55 }
 0x66e   :  { %4530 = vpow2.f32 %v3027_v37  ;;  %v3029_v10 = vmul.f32 1.442695, %v6503_v46 }
 0x670   :  { %v4527_v38 = vpop.eup %4526  ;;  %4532 = vpow2.f32 %v3029_v10 }
 0x671   :  { %v2840_v21 = vpop.xlane.xlu0 %2839  ;;  %v3117_v14 = vsel %vm2698_vm0, %v4527_v38, 0.0 }
 0x672   :  { %v4529_v25 = vpop.eup %4528  ;;  %v6509_v12 = vsub.f32 %v6145_v57, %v2840_v21  ;;  %3215 = vadd.xlane.f32.xlu0 %v3117_v14 }
 0x673   :  { %v2842_v18 = vpop.xlane.xlu1 %2841  ;;  %v3118_v19 = vsel %vm2698_vm0, %v4529_v25, 0.0 }
 0x674   :  { %v3031_v53 = vmul.f32 1.442695, %v6509_v12  ;;  %v6515_v56 = vsub.f32 %v6151_v45, %v2842_v18  ;;  %3217 = vadd.xlane.f32.xlu1 %v3118_v19 }
 0x676   :  { %4534 = vpow2.f32 %v3031_v53  ;;  %v3033_v50 = vmul.f32 1.442695, %v6515_v56 }
 0x677   :  { %v3148_v55 = vpop.xlane.xlu0 %3147 }
 0x678   :  { %v4531_v37 = vpop.eup %4530  ;;  %4536 = vpow2.f32 %v3033_v50 }
 0x679   :  { %4538 = vlog2.f32 %v3148_v55  ;;  %v3119_v57 = vsel %vm2698_vm0, %v4531_v37, 0.0 }
 0x67a   :  { %v4533_v10 = vpop.eup %4532  ;;  %3219 = vadd.xlane.f32.xlu0 %v3119_v57 }
 0x67b   :  { %v3150_v38 = vpop.xlane.xlu1 %3149  ;;  %v2844_v21 = vpop.xlane.xlu0 %2843  ;;  %v3120_v14 = vsel %vm2698_vm0, %v4533_v10, 0.0 }
 0x67c   :  { %4540 = vlog2.f32 %v3150_v38  ;;  %v6523_v45 = vsub.f32 %v6171_v34, %v2844_v21  ;;  %3221 = vadd.xlane.f32.xlu1 %v3120_v14 }
 0x67e   :  { %v3035_v25 = vmul.f32 1.442695, %v6523_v45 }
 0x67f   :  { %v2846_v18 = vpop.xlane.xlu1 %2845  ;;  %v3152_v19 = vpop.xlane.xlu0 %3151 }
 0x680   :  { %v4535_v53 = vpop.eup %4534  ;;  %4542 = vpow2.f32 %v3035_v25  ;;  %v6527_v50 = vsub.f32 %v6182_v51, %v2846_v18 }
 0x681   :  { %4544 = vlog2.f32 %v3152_v19  ;;  %v3121_v55 = vsel %vm2698_vm0, %v4535_v53, 0.0 }
 0x682   :  { %6961 = vst [vmem:[#allocation16_spill] sm:$0xff] %v6527_v50  ;;  %v4537_v37 = vpop.eup %4536  ;;  %v3037_v57 = vmul.f32 1.442695, %v6527_v50  ;;  %3223 = vadd.xlane.f32.xlu0 %v3121_v55 }
 0x683   :  { %v4539_v34 = vpop.eup %4538  ;;  %v3154_v10 = vpop.xlane.xlu1 %3153  ;;  %v3122_v21 = vsel %vm2698_vm0, %v4537_v37, 0.0 }
 0x684   :  { %v2848_v38 = vpop.xlane.xlu0 %2847  ;;  %v3276_v14 = vmul.f32 0.6931472, %v4539_v34  ;;  %4546 = vpow2.f32 %v3037_v57  ;;  %3225 = vadd.xlane.f32.xlu1 %v3122_v21 }
 0x685   :  { %v6535_v25 = vsub.f32 %v6195_v15, %v2848_v38  ;;  %4548 = vlog2.f32 %v3154_v10 }
 0x686   :  { %v4541_v51 = vpop.eup %4540  ;;  %v3403_v18 = vsub.f32 %v6120_v3, %v3276_v14 }
 0x687   :  { %v3039_v19 = vmul.f32 1.442695, %v6535_v25  ;;  %v3278_v53 = vmul.f32 0.6931472, %v4541_v51  ;;  %v2850_v55 = vpop.xlane.xlu1 %2849 }
 0x688   :  { %v3156_v50 = vpop.xlane.xlu0 %3155  ;;  %3467 = vst [vmem:[%s6931_s5] sm:$0xff] %v3403_v18  ;;  %v6543_v37 = vsub.f32 %v6204_v32, %v2850_v55 }
 0x689   :  { %4550 = vpow2.f32 %v3039_v19  ;;  %v3404_v15 = vsub.f32 %v6134_v54, %v3278_v53 }
 0x68a   :  { %4552 = vlog2.f32 %v3156_v50  ;;  %v4543_v57 = vpop.eup %4542  ;;  %v3041_v34 = vmul.f32 1.442695, %v6543_v37 }
 0x68b   :  { %v4545_v3 = vpop.eup %4544  ;;  %3468 = vst [vmem:[%s6931_s5 + $0x8] sm:$0xff] %v3404_v15  ;;  %v3158_v10 = vpop.xlane.xlu1 %3157  ;;  %v3123_v21 = vsel %vm2698_vm0, %v4543_v57, 0.0 }
 0x68c   :  { %v2852_v38 = vpop.xlane.xlu0 %2851  ;;  %v3280_v14 = vmul.f32 0.6931472, %v4545_v3  ;;  %4554 = vpow2.f32 %v3041_v34  ;;  %3227 = vadd.xlane.f32.xlu0 %v3123_v21 }
 0x68d   :  { %v6553_v32 = vsub.f32 %v6221_v29, %v2852_v38  ;;  %4556 = vlog2.f32 %v3158_v10 }
 0x68e   :  { %v4547_v54 = vpop.eup %4546  ;;  %v3405_v50 = vsub.f32 %v6140_v30, %v3280_v14 }
 0x68f   :  { %v3043_v51 = vmul.f32 1.442695, %v6553_v32  ;;  %v4549_v18 = vpop.eup %4548  ;;  %v2854_v19 = vpop.xlane.xlu1 %2853  ;;  %v3124_v55 = vsel %vm2698_vm0, %v4547_v54, 0.0 }
 0x690   :  { %v3160_v53 = vpop.xlane.xlu0 %3159  ;;  %3469 = vst [vmem:[%s6931_s5 + $0x10] sm:$0xff] %v3405_v50  ;;  %v3282_v15 = vmul.f32 0.6931472, %v4549_v18  ;;  %v6563_v29 = vsub.f32 %v6228_v11, %v2854_v19  ;;  %3229 = vadd.xlane.f32.xlu1 %v3124_v55 }
 0x691   :  { %4558 = vpow2.f32 %v3043_v51 }
 0x692   :  { %4560 = vlog2.f32 %v3160_v53  ;;  %v3406_v57 = vsub.f32 %v6154_v1, %v3282_v15  ;;  %v3045_v34 = vmul.f32 1.442695, %v6563_v29 }
 0x693   :  { %v4551_v30 = vpop.eup %4550  ;;  %v3162_v10 = vpop.xlane.xlu1 %3161 }
 0x694   :  { %v4553_v3 = vpop.eup %4552  ;;  %v2856_v38 = vpop.xlane.xlu0 %2855  ;;  %v3125_v21 = vsel %vm2698_vm0, %v4551_v30, 0.0  ;;  %3470 = vst [vmem:[%s6931_s5 + $0x18] sm:$0xff] %v3406_v57  ;;  %4562 = vpow2.f32 %v3045_v34 }
 0x695   :  { %v3284_v14 = vmul.f32 0.6931472, %v4553_v3  ;;  %v6573_v11 = vsub.f32 %v6245_v39, %v2856_v38  ;;  %3231 = vadd.xlane.f32.xlu0 %v3125_v21  ;;  %4564 = vlog2.f32 %v3162_v10 }
 0x696   :  { %v4555_v1 = vpop.eup %4554 }
 0x697   :  { %v3407_v54 = vsub.f32 %v6162_v8, %v3284_v14  ;;  %v3047_v50 = vmul.f32 1.442695, %v6573_v11  ;;  %v4557_v51 = vpop.eup %4556  ;;  %v2858_v18 = vpop.xlane.xlu1 %2857  ;;  %v3126_v53 = vsel %vm2698_vm0, %v4555_v1, 0.0 }
 0x698   :  { %v3164_v19 = vpop.xlane.xlu0 %3163  ;;  %v3286_v55 = vmul.f32 0.6931472, %v4557_v51  ;;  %v6583_v39 = vsub.f32 %v6252_v23, %v2858_v18  ;;  %3233 = vadd.xlane.f32.xlu1 %v3126_v53 }
 0x699   :  { %3471 = vst [vmem:[%s6931_s5 + $0x20] sm:$0xff] %v3407_v54  ;;  %4566 = vpow2.f32 %v3047_v50 }
 0x69a   :  { %4568 = vlog2.f32 %v3164_v19  ;;  %v3408_v15 = vsub.f32 %v6166_v22, %v3286_v55  ;;  %v3049_v30 = vmul.f32 1.442695, %v6583_v39 }
 0x69b   :  { %v4559_v8 = vpop.eup %4558  ;;  %v3166_v34 = vpop.xlane.xlu1 %3165 }
 0x69c   :  { %v4561_v57 = vpop.eup %4560  ;;  %v2860_v3 = vpop.xlane.xlu0 %2859  ;;  %v3127_v10 = vsel %vm2698_vm0, %v4559_v8, 0.0  ;;  %3472 = vst [vmem:[%s6931_s5 + $0x28] sm:$0xff] %v3408_v15  ;;  %4570 = vpow2.f32 %v3049_v30 }
 0x69d   :  { %v3288_v38 = vmul.f32 0.6931472, %v4561_v57  ;;  %v6593_v23 = vsub.f32 %v6269_v49, %v2860_v3  ;;  %3235 = vadd.xlane.f32.xlu0 %v3127_v10  ;;  %4572 = vlog2.f32 %v3166_v34 }
 0x69e   :  { %v4563_v22 = vpop.eup %4562 }
 0x69f   :  { %v3409_v21 = vsub.f32 %v6185_v52, %v3288_v38  ;;  %v3051_v14 = vmul.f32 1.442695, %v6593_v23  ;;  %v4565_v1 = vpop.eup %4564  ;;  %v2862_v54 = vpop.xlane.xlu1 %2861  ;;  %v3128_v51 = vsel %vm2698_vm0, %v4563_v22, 0.0 }
 0x6a0   :  { %v3168_v50 = vpop.xlane.xlu0 %3167  ;;  %v3290_v18 = vmul.f32 0.6931472, %v4565_v1  ;;  %v6603_v49 = vsub.f32 %v6276_v28, %v2862_v54  ;;  %3237 = vadd.xlane.f32.xlu1 %v3128_v51 }
 0x6a1   :  { %3473 = vst [vmem:[%s6931_s5 + $0x30] sm:$0xff] %v3409_v21  ;;  %4574 = vpow2.f32 %v3051_v14 }
 0x6a2   :  { %4576 = vlog2.f32 %v3168_v50  ;;  %v3410_v19 = vsub.f32 %v6190_v9, %v3290_v18  ;;  %v3053_v53 = vmul.f32 1.442695, %v6603_v49 }
 0x6a3   :  { %v4567_v52 = vpop.eup %4566  ;;  %v3170_v8 = vpop.xlane.xlu1 %3169 }
 0x6a4   :  { %v4569_v55 = vpop.eup %4568  ;;  %v2864_v15 = vpop.xlane.xlu0 %2863  ;;  %v3129_v30 = vsel %vm2698_vm0, %v4567_v52, 0.0  ;;  %3474 = vst [vmem:[%s6931_s5 + $0x38] sm:$0xff] %v3410_v19  ;;  %4578 = vpow2.f32 %v3053_v53 }
 0x6a5   :  { %v3292_v57 = vmul.f32 0.6931472, %v4569_v55  ;;  %v6613_v28 = vsub.f32 %v6293_v59, %v2864_v15  ;;  %3239 = vadd.xlane.f32.xlu0 %v3129_v30  ;;  %4580 = vlog2.f32 %v3170_v8 }
 0x6a6   :  { %v4571_v9 = vpop.eup %4570 }
 0x6a7   :  { %v3411_v34 = vsub.f32 %v6209_v41, %v3292_v57  ;;  %v3055_v3 = vmul.f32 1.442695, %v6613_v28  ;;  %v4573_v10 = vpop.eup %4572  ;;  %v2866_v38 = vpop.xlane.xlu1 %2865  ;;  %v3130_v21 = vsel %vm2698_vm0, %v4571_v9, 0.0 }
 0x6a8   :  { %v3172_v22 = vpop.xlane.xlu0 %3171  ;;  %v3294_v14 = vmul.f32 0.6931472, %v4573_v10  ;;  %v6623_v59 = vsub.f32 %v6300_v43, %v2866_v38  ;;  %3241 = vadd.xlane.f32.xlu1 %v3130_v21 }
 0x6a9   :  { %3475 = vst [vmem:[%s6931_s5 + $0x40] sm:$0xff] %v3411_v34  ;;  %4582 = vpow2.f32 %v3055_v3 }
 0x6aa   :  { %4584 = vlog2.f32 %v3172_v22  ;;  %v3412_v1 = vsub.f32 %v6214_v63, %v3294_v14  ;;  %v3057_v54 = vmul.f32 1.442695, %v6623_v59 }
 0x6ab   :  { %v4575_v41 = vpop.eup %4574  ;;  %v3174_v51 = vpop.xlane.xlu1 %3173 }
 0x6ac   :  { %v4577_v50 = vpop.eup %4576  ;;  %v2868_v18 = vpop.xlane.xlu0 %2867  ;;  %v3131_v52 = vsel %vm2698_vm0, %v4575_v41, 0.0  ;;  %3476 = vst [vmem:[%s6931_s5 + $0x48] sm:$0xff] %v3412_v1  ;;  %4586 = vpow2.f32 %v3057_v54  ;;  %v6962_v41 = vld [vmem:[#allocation2_spill] sm:$0xff] }
 0x6ad   :  { %v3296_v19 = vmul.f32 0.6931472, %v4577_v50  ;;  %v6633_v43 = vsub.f32 %v6317_v6, %v2868_v18  ;;  %3243 = vadd.xlane.f32.xlu0 %v3131_v52  ;;  %4588 = vlog2.f32 %v3174_v51 }
 0x6ae   :  { %v4579_v63 = vpop.eup %4578 }
 0x6af   :  { %v3413_v53 = vsub.f32 %v6233_v33, %v3296_v19  ;;  %v3059_v55 = vmul.f32 1.442695, %v6633_v43  ;;  %v4581_v8 = vpop.eup %4580  ;;  %v2870_v15 = vpop.xlane.xlu1 %2869  ;;  %v3132_v57 = vsel %vm2698_vm0, %v4579_v63, 0.0 }
 0x6b0   :  { %v3176_v30 = vpop.xlane.xlu0 %3175  ;;  %v3298_v9 = vmul.f32 0.6931472, %v4581_v8  ;;  %v6643_v6 = vsub.f32 %v6324_v27, %v2870_v15  ;;  %3245 = vadd.xlane.f32.xlu1 %v3132_v57 }
 0x6b1   :  { %3477 = vst [vmem:[%s6931_s5 + $0x50] sm:$0xff] %v3413_v53  ;;  %4590 = vpow2.f32 %v3059_v55  ;;  %v6964_v55 = vld [vmem:[#allocation3_spill] sm:$0xff] }
 0x6b2   :  { %4592 = vlog2.f32 %v3176_v30  ;;  %v3414_v34 = vsub.f32 %v6238_v58, %v3298_v9  ;;  %v3061_v3 = vmul.f32 1.442695, %v6643_v6 }
 0x6b3   :  { %v4583_v33 = vpop.eup %4582  ;;  %v3178_v38 = vpop.xlane.xlu1 %3177 }
 0x6b4   :  { %v4585_v10 = vpop.eup %4584  ;;  %v2872_v22 = vpop.xlane.xlu0 %2871  ;;  %v3133_v21 = vsel %vm2698_vm0, %v4583_v33, 0.0  ;;  %3478 = vst [vmem:[%s6931_s5 + $0x58] sm:$0xff] %v3414_v34  ;;  %4594 = vpow2.f32 %v3061_v3  ;;  %v6965_v3 = vld [vmem:[#allocation11_spill] sm:$0xff] }
 0x6b5   :  { %v3300_v14 = vmul.f32 0.6931472, %v4585_v10  ;;  %v6653_v27 = vsub.f32 %v6341_v16, %v2872_v22  ;;  %3247 = vadd.xlane.f32.xlu0 %v3133_v21  ;;  %4596 = vlog2.f32 %v3178_v38  ;;  %v6963_v16 = vld [vmem:[#allocation10_spill] sm:$0xff]  ;;  %v6966_v22 = vld [vmem:[#allocation4_spill] sm:$0xff] }
 0x6b6   :  { %v4587_v58 = vpop.eup %4586 }
 0x6b7   :  { %v3415_v1 = vsub.f32 %v6962_v41, %v3300_v14  ;;  %v3063_v54 = vmul.f32 1.442695, %v6653_v27  ;;  %v4589_v50 = vpop.eup %4588  ;;  %v2874_v51 = vpop.xlane.xlu1 %2873  ;;  %v3134_v52 = vsel %vm2698_vm0, %v4587_v58, 0.0 }
 0x6b8   :  { %v3180_v18 = vpop.xlane.xlu0 %3179  ;;  %v3302_v19 = vmul.f32 0.6931472, %v4589_v50  ;;  %v6663_v63 = vsub.f32 %v6963_v16, %v2874_v51  ;;  %3249 = vadd.xlane.f32.xlu1 %v3134_v52  ;;  %v6967_v52 = vld [vmem:[#allocation5_spill] sm:$0xff] }
 0x6b9   :  { %3479 = vst [vmem:[%s6931_s5 + $0x60] sm:$0xff] %v3415_v1  ;;  %4598 = vpow2.f32 %v3063_v54 }
 0x6ba   :  { %4600 = vlog2.f32 %v3180_v18  ;;  %v3416_v8 = vsub.f32 %v6964_v55, %v3302_v19  ;;  %v3065_v15 = vmul.f32 1.442695, %v6663_v63 }
 0x6bb   :  { %v4591_v53 = vpop.eup %4590  ;;  %v3182_v57 = vpop.xlane.xlu1 %3181 }
 0x6bc   :  { %v4593_v30 = vpop.eup %4592  ;;  %v2876_v9 = vpop.xlane.xlu0 %2875  ;;  %v3135_v33 = vsel %vm2698_vm0, %v4591_v53, 0.0  ;;  %3480 = vst [vmem:[%s6931_s5 + $0x68] sm:$0xff] %v3416_v8  ;;  %4602 = vpow2.f32 %v3065_v15 }
 0x6bd   :  { %v3304_v34 = vmul.f32 0.6931472, %v4593_v30  ;;  %v6673_v10 = vsub.f32 %v6965_v3, %v2876_v9  ;;  %3251 = vadd.xlane.f32.xlu0 %v3135_v33  ;;  %4604 = vlog2.f32 %v3182_v57  ;;  %v6968_v9 = vld [vmem:[#allocation6_spill] sm:$0xff] }
 0x6be   :  { %v4595_v38 = vpop.eup %4594 }
 0x6bf   :  { %v3417_v21 = vsub.f32 %v6966_v22, %v3304_v34  ;;  %v3067_v14 = vmul.f32 1.442695, %v6673_v10  ;;  %v4597_v58 = vpop.eup %4596  ;;  %v2878_v41 = vpop.xlane.xlu1 %2877  ;;  %v3136_v54 = vsel %vm2698_vm0, %v4595_v38, 0.0 }
 0x6c0   :  { %v3184_v1 = vpop.xlane.xlu0 %3183  ;;  %v3306_v50 = vmul.f32 0.6931472, %v4597_v58  ;;  %v6683_v51 = vsub.f32 %v6364_v42, %v2878_v41  ;;  %3253 = vadd.xlane.f32.xlu1 %v3136_v54  ;;  %v6969_v41 = vld [vmem:[#allocation7_spill] sm:$0xff] }
 0x6c1   :  { %3481 = vst [vmem:[%s6931_s5 + $0x70] sm:$0xff] %v3417_v21  ;;  %4606 = vpow2.f32 %v3067_v14 }
 0x6c2   :  { %4608 = vlog2.f32 %v3184_v1  ;;  %v3418_v19 = vsub.f32 %v6967_v52, %v3306_v50  ;;  %v3069_v16 = vmul.f32 1.442695, %v6683_v51 }
 0x6c3   :  { %v4599_v18 = vpop.eup %4598  ;;  %v3186_v55 = vpop.xlane.xlu1 %3185 }
 0x6c4   :  { %v4601_v53 = vpop.eup %4600  ;;  %v2880_v8 = vpop.xlane.xlu0 %2879  ;;  %v3137_v15 = vsel %vm2698_vm0, %v4599_v18, 0.0  ;;  %3482 = vst [vmem:[%s6931_s5 + $0x78] sm:$0xff] %v3418_v19  ;;  %4610 = vpow2.f32 %v3069_v16 }
 0x6c5   :  { %v3308_v30 = vmul.f32 0.6931472, %v4601_v53  ;;  %v6693_v42 = vsub.f32 %v6380_v60, %v2880_v8  ;;  %3255 = vadd.xlane.f32.xlu0 %v3137_v15  ;;  %4612 = vlog2.f32 %v3186_v55 }
 0x6c6   :  { %v4603_v57 = vpop.eup %4602 }
 0x6c7   :  { %v3419_v33 = vsub.f32 %v6968_v9, %v3308_v30  ;;  %v3071_v34 = vmul.f32 1.442695, %v6693_v42  ;;  %v4605_v3 = vpop.eup %4604  ;;  %v2882_v38 = vpop.xlane.xlu1 %2881  ;;  %v3138_v22 = vsel %vm2698_vm0, %v4603_v57, 0.0 }
 0x6c8   :  { %v3310_v21 = vmul.f32 0.6931472, %v4605_v3  ;;  %v6703_v60 = vsub.f32 %v6394_v4, %v2882_v38  ;;  %3257 = vadd.xlane.f32.xlu1 %v3138_v22 }
 0x6c9   :  { %3483 = vst [vmem:[%s6931_s5 + $0x80] sm:$0xff] %v3419_v33  ;;  %4614 = vpow2.f32 %v3071_v34  ;;  %v2884_v14 = vpop.xlane.xlu0 %2883  ;;  %v6971_v34 = vld [vmem:[#allocation9_spill] sm:$0xff] }
 0x6ca   :  { %v3420_v1 = vsub.f32 %v6969_v41, %v3310_v21  ;;  %v3073_v54 = vmul.f32 1.442695, %v6703_v60  ;;  %v6708_v50 = vsub.f32 %v6404_v40, %v2884_v14  ;;  %v6970_v40 = vld [vmem:[#allocation8_spill] sm:$0xff] }
 0x6cb   :  { %v4607_v58 = vpop.eup %4606  ;;  %v2886_v52 = vpop.xlane.xlu1 %2885 }
 0x6cc   :  { %v4609_v18 = vpop.eup %4608  ;;  %v3139_v19 = vsel %vm2698_vm0, %v4607_v58, 0.0  ;;  %3484 = vst [vmem:[%s6931_s5 + $0x88] sm:$0xff] %v3420_v1  ;;  %4616 = vpow2.f32 %v3073_v54  ;;  %v3075_v16 = vmul.f32 1.442695, %v6708_v50  ;;  %v6717_v53 = vsub.f32 %v6413_v47, %v2886_v52 }
 0x6cd   :  { %v3312_v4 = vmul.f32 0.6931472, %v4609_v18  ;;  %3259 = vadd.xlane.f32.xlu0 %v3139_v19 }
 0x6ce   :  { %v4611_v55 = vpop.eup %4610  ;;  %4618 = vpow2.f32 %v3075_v16  ;;  %v3077_v15 = vmul.f32 1.442695, %v6717_v53 }
 0x6cf   :  { %v3421_v8 = vsub.f32 %v6970_v40, %v3312_v4  ;;  %v4613_v30 = vpop.eup %4612  ;;  %v3140_v57 = vsel %vm2698_vm0, %v4611_v55, 0.0 }
 0x6d0   :  { %v3314_v9 = vmul.f32 0.6931472, %v4613_v30  ;;  %4620 = vpow2.f32 %v3077_v15  ;;  %3261 = vadd.xlane.f32.xlu1 %v3140_v57 }
 0x6d1   :  { %3485 = vst [vmem:[%s6931_s5 + $0x90] sm:$0xff] %v3421_v8  ;;  %v2888_v47 = vpop.xlane.xlu0 %2887 }
 0x6d2   :  { %v3422_v3 = vsub.f32 %v6971_v34, %v3314_v9  ;;  %v6728_v38 = vsub.f32 %v6425_v13, %v2888_v47 }
 0x6d3   :  { %v4615_v33 = vpop.eup %4614  ;;  %v2890_v22 = vpop.xlane.xlu1 %2889 }
 0x6d4   :  { %v3141_v21 = vsel %vm2698_vm0, %v4615_v33, 0.0  ;;  %3486 = vst [vmem:[%s6931_s5 + $0x98] sm:$0xff] %v3422_v3  ;;  %v3079_v14 = vmul.f32 1.442695, %v6728_v38  ;;  %v6737_v58 = vsub.f32 %v6434_v61, %v2890_v22 }
 0x6d5   :  { %3263 = vadd.xlane.f32.xlu0 %v3141_v21  ;;  %v3188_v41 = vpop.xlane.xlu0 %3187 }
 0x6d6   :  { %v4617_v1 = vpop.eup %4616  ;;  %4622 = vpow2.f32 %v3079_v14  ;;  %v3081_v13 = vmul.f32 1.442695, %v6737_v58 }
 0x6d7   :  { %4624 = vlog2.f32 %v3188_v41  ;;  %v3190_v54 = vpop.xlane.xlu1 %3189  ;;  %v3142_v18 = vsel %vm2698_vm0, %v4617_v1, 0.0 }
 0x6d8   :  { %v4619_v52 = vpop.eup %4618  ;;  %4626 = vpow2.f32 %v3081_v13  ;;  %3265 = vadd.xlane.f32.xlu1 %v3142_v18 }
 0x6d9   :  { %4628 = vlog2.f32 %v3190_v54  ;;  %v3192_v19 = vpop.xlane.xlu0 %3191  ;;  %v3143_v61 = vsel %vm2698_vm0, %v4619_v52, 0.0  ;;  %v6972_v54 = vld [vmem:[#allocation12_spill] sm:$0xff] }
 0x6da   :  { %v4621_v4 = vpop.eup %4620  ;;  %4630 = vlog2.f32 %v3192_v19  ;;  %3267 = vadd.xlane.f32.xlu0 %v3143_v61 }
 0x6db   :  { %v3194_v16 = vpop.xlane.xlu1 %3193  ;;  %v3144_v55 = vsel %vm2698_vm0, %v4621_v4, 0.0 }
 0x6dc   :  { %4632 = vlog2.f32 %v3194_v16  ;;  %3269 = vadd.xlane.f32.xlu1 %v3144_v55 }
 0x6dd   :  { %v3196_v40 = vpop.xlane.xlu0 %3195 }
 0x6de   :  { %4634 = vlog2.f32 %v3196_v40 }
 0x6df   :  { %v3198_v8 = vpop.xlane.xlu1 %3197 }
 0x6e0   :  { %v4623_v15 = vpop.eup %4622  ;;  %4636 = vlog2.f32 %v3198_v8 }
 0x6e1   :  { %v4625_v30 = vpop.eup %4624  ;;  %v3200_v57 = vpop.xlane.xlu0 %3199  ;;  %v3145_v9 = vsel %vm2698_vm0, %v4623_v15, 0.0 }
 0x6e2   :  { %v4627_v47 = vpop.eup %4626  ;;  %v3316_v33 = vmul.f32 0.6931472, %v4625_v30  ;;  %4638 = vlog2.f32 %v3200_v57  ;;  %3271 = vadd.xlane.f32.xlu0 %v3145_v9  ;;  %v6975_v57 = vld [vmem:[#allocation15_spill] sm:$0xff] }
 0x6e3   :  { %v4629_v34 = vpop.eup %4628  ;;  %v3202_v3 = vpop.xlane.xlu1 %3201  ;;  %v3146_v22 = vsel %vm2698_vm0, %v4627_v47, 0.0 }
 0x6e4   :  { %v4631_v21 = vpop.eup %4630  ;;  %v3423_v14 = vsub.f32 %v6369_v17, %v3316_v33  ;;  %v3318_v41 = vmul.f32 0.6931472, %v4629_v34  ;;  %4640 = vlog2.f32 %v3202_v3  ;;  %3273 = vadd.xlane.f32.xlu1 %v3146_v22  ;;  %v6973_v17 = vld [vmem:[#allocation13_spill] sm:$0xff] }
 0x6e5   :  { %v3320_v1 = vmul.f32 0.6931472, %v4631_v21 }
 0x6e6   :  { %v4633_v13 = vpop.eup %4632  ;;  %3487 = vst [vmem:[%s6931_s5 + $0xa0] sm:$0xff] %v3423_v14  ;;  %v3424_v18 = vsub.f32 %v6972_v54, %v3318_v41 }
 0x6e7   :  { %v3425_v52 = vsub.f32 %v6384_v2, %v3320_v1  ;;  %v3322_v19 = vmul.f32 0.6931472, %v4633_v13  ;;  %v3204_v61 = vpop.xlane.xlu0 %3203  ;;  %v6974_v2 = vld [vmem:[#allocation14_spill] sm:$0xff] }
 0x6e8   :  { %v4635_v44 = vpop.eup %4634  ;;  %3488 = vst [vmem:[%s6931_s5 + $0xa8] sm:$0xff] %v3424_v18  ;;  %4642 = vlog2.f32 %v3204_v61 }
 0x6e9   :  { %3489 = vst [vmem:[%s6931_s5 + $0xb0] sm:$0xff] %v3425_v52  ;;  %v3426_v4 = vsub.f32 %v6973_v17, %v3322_v19  ;;  %v3324_v16 = vmul.f32 0.6931472, %v4635_v44  ;;  %v3206_v55 = vpop.xlane.xlu1 %3205 }
 0x6ea   :  { %v4637_v40 = vpop.eup %4636  ;;  %4644 = vlog2.f32 %v3206_v55 }
 0x6eb   :  { %3490 = vst [vmem:[%s6931_s5 + $0xb8] sm:$0xff] %v3426_v4  ;;  %v3427_v8 = vsub.f32 %v6974_v2, %v3324_v16  ;;  %v3326_v15 = vmul.f32 0.6931472, %v4637_v40 }
 0x6ec   :  { %v4639_v30 = vpop.eup %4638 }
 0x6ed   :  { %3491 = vst [vmem:[%s6931_s5 + $0xc0] sm:$0xff] %v3427_v8  ;;  %v3428_v9 = vsub.f32 %v6975_v57, %v3326_v15  ;;  %v3328_v47 = vmul.f32 0.6931472, %v4639_v30 }
 0x6ee   :  { %v4641_v33 = vpop.eup %4640 }
 0x6ef   :  { %3492 = vst [vmem:[%s6931_s5 + $0xc8] sm:$0xff] %v3428_v9  ;;  %v3429_v34 = vsub.f32 %v6420_v31, %v3328_v47  ;;  %v3330_v3 = vmul.f32 0.6931472, %v4641_v33  ;;  %v3208_v22 = vpop.xlane.xlu0 %3207 }
 0x6f0   :  { %4646 = vlog2.f32 %v3208_v22 }
 0x6f1   :  { %3493 = vst [vmem:[%s6931_s5 + $0xd0] sm:$0xff] %v3429_v34  ;;  %v3430_v21 = vsub.f32 %v6429_v0, %v3330_v3  ;;  %v3210_v14 = vpop.xlane.xlu1 %3209 }
 0x6f2   :  { %v4643_v41 = vpop.eup %4642  ;;  %4648 = vlog2.f32 %v3210_v14 }
 0x6f3   :  { %3494 = vst [vmem:[%s6931_s5 + $0xd8] sm:$0xff] %v3430_v21  ;;  %v3332_v1 = vmul.f32 0.6931472, %v4643_v41 }
 0x6f4   :  { %v4645_v13 = vpop.eup %4644 }
 0x6f5   :  { %v3431_v31 = vsub.f32 %v6443_v48, %v3332_v1  ;;  %v3334_v54 = vmul.f32 0.6931472, %v4645_v13 }
 0x6f7   :  { %3495 = vst [vmem:[%s6931_s5 + $0xe0] sm:$0xff] %v3431_v31  ;;  %v3432_v18 = vsub.f32 %v6449_v7, %v3334_v54  ;;  %v3212_v52 = vpop.xlane.xlu0 %3211 }
 0x6f8   :  { %4650 = vlog2.f32 %v3212_v52 }
 0x6f9   :  { %3496 = vst [vmem:[%s6931_s5 + $0xe8] sm:$0xff] %v3432_v18  ;;  %v3214_v0 = vpop.xlane.xlu1 %3213 }
 0x6fa   :  { %v4647_v19 = vpop.eup %4646  ;;  %4652 = vlog2.f32 %v3214_v0 }
 0x6fb   :  { %v3336_v61 = vmul.f32 0.6931472, %v4647_v19 }
 0x6fc   :  { %v4649_v44 = vpop.eup %4648 }
 0x6fd   :  { %v3433_v48 = vsub.f32 %v6459_v26, %v3336_v61  ;;  %v3338_v17 = vmul.f32 0.6931472, %v4649_v44 }
 0x6ff   :  { %3497 = vst [vmem:[%s6931_s5 + $0xf0] sm:$0xff] %v3433_v48  ;;  %v3434_v7 = vsub.f32 %v6465_v36, %v3338_v17  ;;  %v3216_v4 = vpop.xlane.xlu0 %3215 }
 0x700   :  { %4654 = vlog2.f32 %v3216_v4 }
 0x701   :  { %3498 = vst [vmem:[%s6931_s5 + $0xf8] sm:$0xff] %v3434_v7  ;;  %v3218_v16 = vpop.xlane.xlu1 %3217 }
 0x702   :  { %v4651_v55 = vpop.eup %4650  ;;  %4656 = vlog2.f32 %v3218_v16 }
 0x703   :  { %v3340_v40 = vmul.f32 0.6931472, %v4651_v55 }
 0x704   :  { %v4653_v2 = vpop.eup %4652 }
 0x705   :  { %v3435_v26 = vsub.f32 %v6473_v20, %v3340_v40  ;;  %v3342_v8 = vmul.f32 0.6931472, %v4653_v2 }
 0x707   :  { %3499 = vst [vmem:[%s6931_s5 + $0x100] sm:$0xff] %v3435_v26  ;;  %v3436_v36 = vsub.f32 %v6479_v5, %v3342_v8  ;;  %v3220_v15 = vpop.xlane.xlu0 %3219 }
 0x708   :  { %4658 = vlog2.f32 %v3220_v15 }
 0x709   :  { %3500 = vst [vmem:[%s6931_s5 + $0x108] sm:$0xff] %v3436_v36  ;;  %v3222_v30 = vpop.xlane.xlu1 %3221 }
 0x70a   :  { %v4655_v57 = vpop.eup %4654  ;;  %4660 = vlog2.f32 %v3222_v30 }
 0x70b   :  { %v3344_v9 = vmul.f32 0.6931472, %v4655_v57 }
 0x70c   :  { %v4657_v47 = vpop.eup %4656 }
 0x70d   :  { %v3437_v20 = vsub.f32 %v6485_v24, %v3344_v9  ;;  %v3346_v33 = vmul.f32 0.6931472, %v4657_v47 }
 0x70f   :  { %3501 = vst [vmem:[%s6931_s5 + $0x110] sm:$0xff] %v3437_v20  ;;  %v3438_v5 = vsub.f32 %v6491_v62, %v3346_v33  ;;  %v3224_v34 = vpop.xlane.xlu0 %3223 }
 0x710   :  { %4662 = vlog2.f32 %v3224_v34 }
 0x711   :  { %3502 = vst [vmem:[%s6931_s5 + $0x118] sm:$0xff] %v3438_v5  ;;  %v3226_v3 = vpop.xlane.xlu1 %3225 }
 0x712   :  { %v4659_v22 = vpop.eup %4658  ;;  %4664 = vlog2.f32 %v3226_v3 }
 0x713   :  { %v3348_v21 = vmul.f32 0.6931472, %v4659_v22 }
 0x714   :  { %v4661_v14 = vpop.eup %4660 }
 0x715   :  { %v3439_v24 = vsub.f32 %v6497_v35, %v3348_v21  ;;  %v3350_v41 = vmul.f32 0.6931472, %v4661_v14 }
 0x717   :  { %3503 = vst [vmem:[%s6931_s5 + $0x120] sm:$0xff] %v3439_v24  ;;  %v3440_v62 = vsub.f32 %v6503_v46, %v3350_v41 }
 0x719   :  { %3504 = vst [vmem:[%s6931_s5 + $0x128] sm:$0xff] %v3440_v62  ;;  %v3228_v1 = vpop.xlane.xlu0 %3227 }
 0x71a   :  { %v4663_v13 = vpop.eup %4662  ;;  %4666 = vlog2.f32 %v3228_v1 }
 0x71b   :  { %v3352_v31 = vmul.f32 0.6931472, %v4663_v13 }
 0x71c   :  { %v4665_v54 = vpop.eup %4664 }
 0x71d   :  { %v3441_v18 = vsub.f32 %v6509_v12, %v3352_v31  ;;  %v3354_v52 = vmul.f32 0.6931472, %v4665_v54  ;;  %v3230_v35 = vpop.xlane.xlu1 %3229 }
 0x71e   :  { %4668 = vlog2.f32 %v3230_v35 }
 0x71f   :  { %3505 = vst [vmem:[%s6931_s5 + $0x130] sm:$0xff] %v3441_v18  ;;  %v3442_v46 = vsub.f32 %v6515_v56, %v3354_v52  ;;  %v6976_v56 = vld [vmem:[#allocation16_spill] sm:$0xff] }
 0x721   :  { %3506 = vst [vmem:[%s6931_s5 + $0x138] sm:$0xff] %v3442_v46 }
 0x722   :  { %v3232_v0 = vpop.xlane.xlu0 %3231 }
 0x723   :  { %4670 = vlog2.f32 %v3232_v0 }
 0x724   :  { %v4667_v19 = vpop.eup %4666 }
 0x725   :  { %v3356_v61 = vmul.f32 0.6931472, %v4667_v19  ;;  %v3234_v44 = vpop.xlane.xlu1 %3233 }
 0x726   :  { %4672 = vlog2.f32 %v3234_v44 }
 0x727   :  { %v3443_v12 = vsub.f32 %v6523_v45, %v3356_v61 }
 0x728   :  { %v4669_v48 = vpop.eup %4668 }
 0x729   :  { %3507 = vst [vmem:[%s6931_s5 + $0x140] sm:$0xff] %v3443_v12  ;;  %v3358_v17 = vmul.f32 0.6931472, %v4669_v48 }
 0x72a   :  { %v3236_v7 = vpop.xlane.xlu0 %3235 }
 0x72b   :  { %4674 = vlog2.f32 %v3236_v7  ;;  %v3444_v4 = vsub.f32 %v6976_v56, %v3358_v17 }
 0x72d   :  { %v4671_v16 = vpop.eup %4670  ;;  %3508 = vst [vmem:[%s6931_s5 + $0x148] sm:$0xff] %v3444_v4  ;;  %v3238_v40 = vpop.xlane.xlu1 %3237 }
 0x72e   :  { %v3360_v55 = vmul.f32 0.6931472, %v4671_v16  ;;  %4676 = vlog2.f32 %v3238_v40 }
 0x730   :  { %v3445_v45 = vsub.f32 %v6535_v25, %v3360_v55  ;;  %v4673_v2 = vpop.eup %4672 }
 0x731   :  { %v3362_v26 = vmul.f32 0.6931472, %v4673_v2 }
 0x732   :  { %3509 = vst [vmem:[%s6931_s5 + $0x150] sm:$0xff] %v3445_v45  ;;  %v3240_v8 = vpop.xlane.xlu0 %3239 }
 0x733   :  { %4678 = vlog2.f32 %v3240_v8  ;;  %v3446_v36 = vsub.f32 %v6543_v37, %v3362_v26 }
 0x735   :  { %v4675_v15 = vpop.eup %4674  ;;  %3510 = vst [vmem:[%s6931_s5 + $0x158] sm:$0xff] %v3446_v36  ;;  %v3242_v57 = vpop.xlane.xlu1 %3241 }
 0x736   :  { %v3364_v30 = vmul.f32 0.6931472, %v4675_v15  ;;  %4680 = vlog2.f32 %v3242_v57 }
 0x738   :  { %v3447_v25 = vsub.f32 %v6553_v32, %v3364_v30  ;;  %v4677_v9 = vpop.eup %4676 }
 0x739   :  { %v3366_v47 = vmul.f32 0.6931472, %v4677_v9 }
 0x73a   :  { %3511 = vst [vmem:[%s6931_s5 + $0x160] sm:$0xff] %v3447_v25  ;;  %v3244_v20 = vpop.xlane.xlu0 %3243 }
 0x73b   :  { %4682 = vlog2.f32 %v3244_v20  ;;  %v3448_v37 = vsub.f32 %v6563_v29, %v3366_v47 }
 0x73d   :  { %v4679_v33 = vpop.eup %4678  ;;  %3512 = vst [vmem:[%s6931_s5 + $0x168] sm:$0xff] %v3448_v37  ;;  %v3246_v34 = vpop.xlane.xlu1 %3245 }
 0x73e   :  { %v3368_v5 = vmul.f32 0.6931472, %v4679_v33  ;;  %4684 = vlog2.f32 %v3246_v34 }
 0x740   :  { %v3449_v32 = vsub.f32 %v6573_v11, %v3368_v5  ;;  %v4681_v3 = vpop.eup %4680 }
 0x741   :  { %v3370_v22 = vmul.f32 0.6931472, %v4681_v3 }
 0x742   :  { %3513 = vst [vmem:[%s6931_s5 + $0x170] sm:$0xff] %v3449_v32  ;;  %v3248_v21 = vpop.xlane.xlu0 %3247 }
 0x743   :  { %4686 = vlog2.f32 %v3248_v21  ;;  %v3450_v29 = vsub.f32 %v6583_v39, %v3370_v22 }
 0x745   :  { %v4683_v14 = vpop.eup %4682  ;;  %3514 = vst [vmem:[%s6931_s5 + $0x178] sm:$0xff] %v3450_v29  ;;  %v3250_v41 = vpop.xlane.xlu1 %3249 }
 0x746   :  { %v3372_v24 = vmul.f32 0.6931472, %v4683_v14  ;;  %4688 = vlog2.f32 %v3250_v41 }
 0x748   :  { %v3451_v11 = vsub.f32 %v6593_v23, %v3372_v24  ;;  %v4685_v62 = vpop.eup %4684 }
 0x749   :  { %v3374_v1 = vmul.f32 0.6931472, %v4685_v62 }
 0x74a   :  { %3515 = vst [vmem:[%s6931_s5 + $0x180] sm:$0xff] %v3451_v11  ;;  %v3252_v13 = vpop.xlane.xlu0 %3251 }
 0x74b   :  { %4690 = vlog2.f32 %v3252_v13  ;;  %v3452_v39 = vsub.f32 %v6603_v49, %v3374_v1 }
 0x74d   :  { %v4687_v31 = vpop.eup %4686  ;;  %3516 = vst [vmem:[%s6931_s5 + $0x188] sm:$0xff] %v3452_v39  ;;  %v3254_v18 = vpop.xlane.xlu1 %3253 }
 0x74e   :  { %v3376_v54 = vmul.f32 0.6931472, %v4687_v31  ;;  %4692 = vlog2.f32 %v3254_v18 }
 0x750   :  { %v3453_v23 = vsub.f32 %v6613_v28, %v3376_v54  ;;  %v4689_v52 = vpop.eup %4688 }
 0x751   :  { %v3378_v35 = vmul.f32 0.6931472, %v4689_v52 }
 0x752   :  { %3517 = vst [vmem:[%s6931_s5 + $0x190] sm:$0xff] %v3453_v23  ;;  %v3256_v46 = vpop.xlane.xlu0 %3255 }
 0x753   :  { %4694 = vlog2.f32 %v3256_v46  ;;  %v3454_v49 = vsub.f32 %v6623_v59, %v3378_v35 }
 0x755   :  { %v4691_v0 = vpop.eup %4690  ;;  %3518 = vst [vmem:[%s6931_s5 + $0x198] sm:$0xff] %v3454_v49  ;;  %v3258_v61 = vpop.xlane.xlu1 %3257 }
 0x756   :  { %v3380_v19 = vmul.f32 0.6931472, %v4691_v0  ;;  %4696 = vlog2.f32 %v3258_v61 }
 0x758   :  { %v3455_v28 = vsub.f32 %v6633_v43, %v3380_v19  ;;  %v4693_v44 = vpop.eup %4692 }
 0x759   :  { %v3382_v12 = vmul.f32 0.6931472, %v4693_v44 }
 0x75a   :  { %3519 = vst [vmem:[%s6931_s5 + $0x1a0] sm:$0xff] %v3455_v28  ;;  %v3260_v48 = vpop.xlane.xlu0 %3259 }
 0x75b   :  { %4698 = vlog2.f32 %v3260_v48  ;;  %v3456_v59 = vsub.f32 %v6643_v6, %v3382_v12 }
 0x75d   :  { %v4695_v17 = vpop.eup %4694  ;;  %3520 = vst [vmem:[%s6931_s5 + $0x1a8] sm:$0xff] %v3456_v59  ;;  %v3262_v56 = vpop.xlane.xlu1 %3261 }
 0x75e   :  { %v3384_v7 = vmul.f32 0.6931472, %v4695_v17  ;;  %4700 = vlog2.f32 %v3262_v56 }
 0x760   :  { %v3457_v43 = vsub.f32 %v6653_v27, %v3384_v7  ;;  %v4697_v4 = vpop.eup %4696 }
 0x761   :  { %v3386_v16 = vmul.f32 0.6931472, %v4697_v4 }
 0x762   :  { %3521 = vst [vmem:[%s6931_s5 + $0x1b0] sm:$0xff] %v3457_v43  ;;  %v3264_v55 = vpop.xlane.xlu0 %3263 }
 0x763   :  { %4702 = vlog2.f32 %v3264_v55  ;;  %v3458_v6 = vsub.f32 %v6663_v63, %v3386_v16 }
 0x765   :  { %v4699_v40 = vpop.eup %4698  ;;  %3522 = vst [vmem:[%s6931_s5 + $0x1b8] sm:$0xff] %v3458_v6  ;;  %v3266_v2 = vpop.xlane.xlu1 %3265 }
 0x766   :  { %v3388_v45 = vmul.f32 0.6931472, %v4699_v40  ;;  %4704 = vlog2.f32 %v3266_v2 }
 0x767   :  { %v3268_v26 = vpop.xlane.xlu0 %3267 }
 0x768   :  { %v3459_v27 = vsub.f32 %v6673_v10, %v3388_v45  ;;  %v4701_v8 = vpop.eup %4700  ;;  %4706 = vlog2.f32 %v3268_v26 }
 0x769   :  { %v3390_v36 = vmul.f32 0.6931472, %v4701_v8  ;;  %v3270_v15 = vpop.xlane.xlu1 %3269 }
 0x76a   :  { %3523 = vst [vmem:[%s6931_s5 + $0x1c0] sm:$0xff] %v3459_v27  ;;  %4708 = vlog2.f32 %v3270_v15 }
 0x76b   :  { %v3460_v63 = vsub.f32 %v6683_v51, %v3390_v36 }
 0x76d   :  { %v4703_v30 = vpop.eup %4702  ;;  %3524 = vst [vmem:[%s6931_s5 + $0x1c8] sm:$0xff] %v3460_v63 }
 0x76e   :  { %v3392_v57 = vmul.f32 0.6931472, %v4703_v30 }
 0x76f   :  { %v3272_v25 = vpop.xlane.xlu0 %3271 }
 0x770   :  { %v3461_v10 = vsub.f32 %v6693_v42, %v3392_v57  ;;  %v4705_v9 = vpop.eup %4704  ;;  %4710 = vlog2.f32 %v3272_v25 }
 0x771   :  { %v3394_v47 = vmul.f32 0.6931472, %v4705_v9  ;;  %v3274_v20 = vpop.xlane.xlu1 %3273 }
 0x772   :  { %3525 = vst [vmem:[%s6931_s5 + $0x1d0] sm:$0xff] %v3461_v10  ;;  %v4707_v37 = vpop.eup %4706  ;;  %4712 = vlog2.f32 %v3274_v20 }
 0x773   :  { %v3462_v51 = vsub.f32 %v6703_v60, %v3394_v47  ;;  %v3396_v33 = vmul.f32 0.6931472, %v4707_v37 }
 0x774   :  { %v4709_v5 = vpop.eup %4708 }
 0x775   :  { %3526 = vst [vmem:[%s6931_s5 + $0x1d8] sm:$0xff] %v3462_v51  ;;  %v3463_v42 = vsub.f32 %v6708_v50, %v3396_v33  ;;  %v3398_v34 = vmul.f32 0.6931472, %v4709_v5 }
 0x777   :  { %3527 = vst [vmem:[%s6931_s5 + $0x1e0] sm:$0xff] %v3463_v42  ;;  %v3464_v32 = vsub.f32 %v6717_v53, %v3398_v34 }
 0x779   :  { %3528 = vst [vmem:[%s6931_s5 + $0x1e8] sm:$0xff] %v3464_v32 }
 0x77a   :  { %v4711_v60 = vpop.eup %4710 }
 0x77b   :  { %v3400_v3 = vmul.f32 0.6931472, %v4711_v60 }
 0x77c   :  { %v4713_v22 = vpop.eup %4712 }
 0x77d   :  { %v3465_v21 = vsub.f32 %v6728_v38, %v3400_v3  ;;  %v3402_v29 = vmul.f32 0.6931472, %v4713_v22 }
 0x77f   :  { %3529 = vst [vmem:[%s6931_s5 + $0x1f0] sm:$0xff] %v3465_v21  ;;  %v3466_v50 = vsub.f32 %v6737_v58, %v3402_v29 }
 0x781   :  { %3530 = vst [vmem:[%s6931_s5 + $0x1f8] sm:$0xff] %v3466_v50 }

</bundles_post_ra>
